<compile_context>
chip_gen: v7x
topology: tpu7x:2x2x1
jax: 0.10.0
libtpu: 0.0.40
codegen_flags: <defaults>
</compile_context>

<pallas_src>
import jax
import jax.numpy as jnp
from jax import lax
from jax.experimental import pallas as pl
from jax.experimental.pallas import tpu as pltpu

C_PAD = 128    # lane-padded channel width (covers Cin=4 and Cmid=64)
W_HALO = 16    # spatial-W halo: keeps interior bf16 stores on (16,128) tile boundaries
HC = 8         # output rows per M-chunk -> matmul M = HC*W = 128 rows per MXU call


def diffusion_kernel(p1_ref, w1_ref, b1_ref, w2_ref, b2_ref, w3_ref, b3_ref,
                     out_ref, ha_ref, hb_ref):
    # p1_ref : (H*W, C_PAD) bf16   conv1 im2col slab (built in wrapper, per batch)
    # w1_ref : (C_PAD, C_PAD) bf16 conv1 weights (rows = 9 taps * Cin packed, padded)
    # w2/w3  : (9, C_PAD, C_PAD) bf16 per-tap weights    b* : (1, C_PAD) f32
    # out_ref: (H*W, C_PAD) bf16   lane-dense output slab (per batch)
    # ha/hb  : (H+2, W+2*W_HALO, C_PAD) bf16 scratch -- padded hidden act. ping/pong
    Hp, Wp, Cp = ha_ref.shape
    H = Hp - 2
    W = Wp - 2 * W_HALO
    MC = HC * W                      # rows per matmul chunk (=128 for W=16)
    n_chunks = H // HC

    # Zero only the halo the conv "padding=1" reads (interior is always written
    # before it is read).  Done every grid step: scratch is per-core and the batch
    # axis is "parallel", so step 0 of one core never runs on the other core.
    for h_ref in (ha_ref, hb_ref):
        zband = jnp.zeros((Hp, W_HALO, Cp), h_ref.dtype)
        h_ref[:, pl.ds(0, W_HALO), :] = zband
        h_ref[:, pl.ds(W_HALO + W, W_HALO), :] = zband
        zrow = jnp.zeros((1, W, Cp), h_ref.dtype)
        h_ref[pl.ds(0, 1), pl.ds(W_HALO, W), :] = zrow
        h_ref[pl.ds(Hp - 1, 1), pl.ds(W_HALO, W), :] = zrow

    def store_hidden(dst_ref, c, y_f32):
        # Unmasked, aligned store: row offset is an untiled dim, col offset W_HALO is
        # a bf16 16-sublane tile boundary, full 128 lanes.  The reshape is a no-op
        # relayout because W == 16 == one bf16 sublane tile.
        dst_ref[pl.ds(1 + c * HC, HC), pl.ds(W_HALO, W), :] = (
            y_f32.astype(dst_ref.dtype).reshape(HC, W, Cp))

    def store_out(c, y_f32):
        out_ref[pl.ds(c * MC, MC), :] = y_f32.astype(out_ref.dtype)

    # ---- conv1 + ReLU: patches prebuilt in wrapper -> one K=128 matmul per chunk
    for c in range(n_chunks):
        rows = p1_ref[pl.ds(c * MC, MC), :]
        acc = jnp.dot(rows, w1_ref[...], preferred_element_type=jnp.float32)
        store_hidden(ha_ref, c, jnp.maximum(acc + b1_ref[...], 0.0))

    # ---- conv2 / conv3: per-tap K=128 matmuls, fp32 accumulation in registers,
    #      chunked over M.  One load per dw, reused by the 3 dh taps.
    def conv3x3(src_ref, w_ref, b_ref, relu, emit):
        for c in range(n_chunks):
            acc = None
            for dw in range(3):
                # (HC+2, W, Cp) slab; dw=0/2 are unaligned sublane offsets (handled
                # by the load), dw=1 is tile-aligned.
                slab = src_ref[pl.ds(c * HC, HC + 2),
                               pl.ds(W_HALO - 1 + dw, W), :]
                for dh in range(3):
                    tap = slab[dh:dh + HC].reshape(MC, Cp)   # no-op reshape (W==16)
                    part = jnp.dot(tap, w_ref[3 * dh + dw],
                                   preferred_element_type=jnp.float32)
                    acc = part if acc is None else acc + part
            y = acc + b_ref[...]
            if relu:
                y = jnp.maximum(y, 0.0)
            emit(c, y)

    conv3x3(ha_ref, w2_ref, b2_ref, True,
            lambda c, y: store_hidden(hb_ref, c, y))
    conv3x3(hb_ref, w3_ref, b3_ref, False, store_out)


# ------------------------------- host wrapper --------------------------------
def _prep_w1(w_oihw, cp):
    """conv1 (Cout, Cin, 3, 3) -> (cp, cp): rows = tap-major/cin-minor, padded."""
    cout, cin, kh, kw = w_oihw.shape
    w = jnp.transpose(w_oihw, (2, 3, 1, 0)).reshape(kh * kw * cin, cout)
    w = jnp.pad(w, ((0, cp - kh * kw * cin), (0, cp - cout)))
    return w.astype(jnp.bfloat16)


def _prep_w(w_oihw, cp):
    """conv2/3 (Cout, Cin, 3, 3) -> (9, cp, cp) per-tap matrices, channel-padded."""
    cout, cin, kh, kw = w_oihw.shape
    w = jnp.transpose(w_oihw, (2, 3, 1, 0)).reshape(kh * kw, cin, cout)
    w = jnp.pad(w, ((0, 0), (0, cp - cin), (0, cp - cout)))
    return w.astype(jnp.bfloat16)


def _prep_b(b, cp):
    return jnp.pad(b, (0, cp - b.shape[0])).reshape(1, cp).astype(jnp.float32)


@jax.jit
def diffusion_forward(x_nchw, w1, b1, w2, b2, w3, b3):
    """x_nchw: (B, C, H, W) f32. Weights in PyTorch (Cout, Cin, 3, 3) layout."""
    B, C, H, W = x_nchw.shape
    cp = C_PAD
    assert W % 16 == 0 and H % HC == 0, "kernel assumes W % 16 == 0 and H % 8 == 0"
    assert 9 * C <= cp, "conv1 im2col packing assumes 9*C <= 128"
    # TODO(synk): for large images, tile H across the grid (1-row halo) instead of
    # keeping whole padded activation slabs resident, and set vmem_limit_bytes.

    # conv1 im2col built once in XLA: 9 taps * C channels packed into the first
    # 9*C lanes -> the in-kernel conv1 is a single K=128 matmul (no patch build).
    x = jnp.transpose(x_nchw, (0, 2, 3, 1))                        # NHWC
    xp = jnp.pad(x, ((0, 0), (1, 1), (1, 1), (0, 0)))
    taps = [xp[:, dh:dh + H, dw:dw + W, :] for dh in range(3) for dw in range(3)]
    p1 = jnp.concatenate(taps, axis=-1)                            # (B, H, W, 9*C)
    p1 = jnp.pad(p1, ((0, 0), (0, 0), (0, 0), (0, cp - 9 * C)))
    p1 = p1.reshape(B, H * W, cp).astype(jnp.bfloat16)

    w1k, b1k = _prep_w1(w1, cp), _prep_b(b1, cp)
    w2k, b2k = _prep_w(w2, cp), _prep_b(b2, cp)
    w3k, b3k = _prep_w(w3, cp), _prep_b(b3, cp)

    hw = H * W
    out2d = pl.pallas_call(
        diffusion_kernel,
        out_shape=jax.ShapeDtypeStruct((B, hw, cp), jnp.bfloat16),
        grid_spec=pltpu.PrefetchScalarGridSpec(
            num_scalar_prefetch=0,
            grid=(B,),                      # one batch element per grid step
            in_specs=[
                pl.BlockSpec((None, hw, cp), lambda b: (b, 0, 0)),   # conv1 patches
                pl.BlockSpec((cp, cp), lambda b: (0, 0)),            # w1 (resident)
                pl.BlockSpec((1, cp), lambda b: (0, 0)),             # b1
                pl.BlockSpec((9, cp, cp), lambda b: (0, 0, 0)),      # w2
                pl.BlockSpec((1, cp), lambda b: (0, 0)),             # b2
                pl.BlockSpec((9, cp, cp), lambda b: (0, 0, 0)),      # w3
                pl.BlockSpec((1, cp), lambda b: (0, 0)),             # b3
            ],
            out_specs=pl.BlockSpec((None, hw, cp), lambda b: (b, 0, 0)),
            # ~440 KB of scratch; scales ~0.5 KB/pixel (vs ~2.3 KB/pixel before).
            scratch_shapes=[
                pltpu.VMEM((H + 2, W + 2 * W_HALO, cp), jnp.bfloat16),  # hidden ping
                pltpu.VMEM((H + 2, W + 2 * W_HALO, cp), jnp.bfloat16),  # hidden pong
            ],
        ),
        compiler_params=pltpu.CompilerParams(
            dimension_semantics=("parallel",)),   # v7x megacore: batch across TCs
    )(p1, w1k, b1k, w2k, b2k, w3k, b3k)

    out = out2d[:, :, :C].astype(jnp.float32).reshape(B, H, W, C)  # drop lane padding
    return jnp.transpose(out, (0, 3, 1, 2))                        # back to NCHW


# ---------------------------- reference (plain JAX) ---------------------------
def diffusion_reference(x_nchw, w1, b1, w2, b2, w3, b3):
    x = jnp.transpose(x_nchw, (0, 2, 3, 1))                        # NHWC
    def conv(x, w_oihw, b):
        w = jnp.transpose(w_oihw, (2, 3, 1, 0))                    # HWIO
        y = lax.conv_general_dilated(
            x, w, window_strides=(1, 1), padding="SAME",
            dimension_numbers=("NHWC", "HWIO", "NHWC"))
        return y + b
    h = jax.nn.relu(conv(x, w1, b1))
    h = jax.nn.relu(conv(h, w2, b2))
    y = conv(h, w3, b3)
    return jnp.transpose(y, (0, 3, 1, 2))


def init_params(key, num_channels, c_mid=64):
    ks = jax.random.split(key, 6)
    def conv_init(kw, kb, cin, cout):
        fan_in = cin * 9
        bound = 1.0 / jnp.sqrt(fan_in)
        w = jax.random.uniform(kw, (cout, cin, 3, 3), jnp.float32, -bound, bound)
        b = jax.random.uniform(kb, (cout,), jnp.float32, -bound, bound)
        return w, b
    w1, b1 = conv_init(ks[0], ks[1], num_channels, c_mid)
    w2, b2 = conv_init(ks[2], ks[3], c_mid, c_mid)
    w3, b3 = conv_init(ks[4], ks[5], c_mid, num_channels)
    return w1, b1, w2, b2, w3, b3


if __name__ == "__main__":
    key = jax.random.PRNGKey(0)
    k_x, k_p = jax.random.split(key)

    B, C, H, W = 2, 4, 16, 16
    x = jax.random.normal(k_x, (B, C, H, W), jnp.float32)
    params = init_params(k_p, C)

    out = jax.block_until_ready(diffusion_forward(x, *params))
    ref = diffusion_reference(x, *params)

    assert out.shape == (B, C, H, W)
    # bf16 matmul operands / activations with fp32 accumulation -> small deviation
    # vs the fp32 reference.
    max_err = float(jnp.max(jnp.abs(out - ref)))
    assert jnp.allclose(out, ref, atol=2e-2, rtol=2e-2), max_err

    print("KERNEL_OK")
</pallas_src>

<mosaic_0001>
module attributes {stable_mosaic.version = 11 : i64} {
  func.func @diffusion_kernel(%arg0: i32, %arg1: memref<1x256x128xbf16, #tpu.memory_space<vmem>>, %arg2: memref<128x128xbf16, #tpu.memory_space<vmem>>, %arg3: memref<1x128xf32, #tpu.memory_space<vmem>>, %arg4: memref<9x128x128xbf16, #tpu.memory_space<vmem>>, %arg5: memref<1x128xf32, #tpu.memory_space<vmem>>, %arg6: memref<9x128x128xbf16, #tpu.memory_space<vmem>>, %arg7: memref<1x128xf32, #tpu.memory_space<vmem>>, %arg8: memref<1x256x128xbf16, #tpu.memory_space<vmem>>, %arg9: memref<18x48x128xbf16, #tpu.memory_space<vmem>>, %arg10: memref<18x48x128xbf16, #tpu.memory_space<vmem>>) attributes {dimension_semantics = [#tpu.dimension_semantics<parallel>], iteration_bounds = array<i64: 2>, scalar_prefetch = 0 : i64, scratch_operands = 2 : i64, tpu.core_type = #tpu.core_type<tc>, window_params = [{transform_indices = @transform_0, window_bounds = array<i64: 1, 256, 128>}, {pipeline_mode = #tpu.pipeline_mode<synchronous>, transform_indices = @transform_1, window_bounds = array<i64: 128, 128>}, {pipeline_mode = #tpu.pipeline_mode<synchronous>, transform_indices = @transform_2, window_bounds = array<i64: 1, 128>}, {pipeline_mode = #tpu.pipeline_mode<synchronous>, transform_indices = @transform_3, window_bounds = array<i64: 9, 128, 128>}, {pipeline_mode = #tpu.pipeline_mode<synchronous>, transform_indices = @transform_4, window_bounds = array<i64: 1, 128>}, {pipeline_mode = #tpu.pipeline_mode<synchronous>, transform_indices = @transform_5, window_bounds = array<i64: 9, 128, 128>}, {pipeline_mode = #tpu.pipeline_mode<synchronous>, transform_indices = @transform_6, window_bounds = array<i64: 1, 128>}, {transform_indices = @transform_7, window_bounds = array<i64: 1, 256, 128>}]} {
    %cst = arith.constant 0.000000e+00 : bf16
    %0 = vector.broadcast %cst : bf16 to vector<18x16x128xbf16>
    %c0 = arith.constant 0 : index
    %c0_0 = arith.constant 0 : index
    %c0_1 = arith.constant 0 : index
    %1 = vector.load %arg9[%c0, %c0_0, %c0_1] : memref<18x48x128xbf16, #tpu.memory_space<vmem>>, vector<18x16x128xbf16>
    tpu.vector_store %arg9[%c0, %c0_0, %c0_1], %0 {strides = array<i32>} : memref<18x48x128xbf16, #tpu.memory_space<vmem>>, vector<18x16x128xbf16>,
    %c0_2 = arith.constant 0 : index
    %c32 = arith.constant 32 : index
    %c0_3 = arith.constant 0 : index
    %2 = vector.load %arg9[%c0_2, %c32, %c0_3] : memref<18x48x128xbf16, #tpu.memory_space<vmem>>, vector<18x16x128xbf16>
    tpu.vector_store %arg9[%c0_2, %c32, %c0_3], %0 {strides = array<i32>} : memref<18x48x128xbf16, #tpu.memory_space<vmem>>, vector<18x16x128xbf16>,
    %cst_4 = arith.constant 0.000000e+00 : bf16
    %3 = vector.broadcast %cst_4 : bf16 to vector<1x16x128xbf16>
    %c0_5 = arith.constant 0 : index
    %c16 = arith.constant 16 : index
    %c0_6 = arith.constant 0 : index
    %4 = vector.load %arg9[%c0_5, %c16, %c0_6] : memref<18x48x128xbf16, #tpu.memory_space<vmem>>, vector<1x16x128xbf16>
    tpu.vector_store %arg9[%c0_5, %c16, %c0_6], %3 {strides = array<i32>} : memref<18x48x128xbf16, #tpu.memory_space<vmem>>, vector<1x16x128xbf16>,
    %c17 = arith.constant 17 : index
    %c16_7 = arith.constant 16 : index
    %c0_8 = arith.constant 0 : index
    %5 = vector.load %arg9[%c17, %c16_7, %c0_8] : memref<18x48x128xbf16, #tpu.memory_space<vmem>>, vector<1x16x128xbf16>
    tpu.vector_store %arg9[%c17, %c16_7, %c0_8], %3 {strides = array<i32>} : memref<18x48x128xbf16, #tpu.memory_space<vmem>>, vector<1x16x128xbf16>,
    %cst_9 = arith.constant 0.000000e+00 : bf16
    %6 = vector.broadcast %cst_9 : bf16 to vector<18x16x128xbf16>
    %c0_10 = arith.constant 0 : index
    %c0_11 = arith.constant 0 : index
    %c0_12 = arith.constant 0 : index
    %7 = vector.load %arg10[%c0_10, %c0_11, %c0_12] : memref<18x48x128xbf16, #tpu.memory_space<vmem>>, vector<18x16x128xbf16>
    tpu.vector_store %arg10[%c0_10, %c0_11, %c0_12], %6 {strides = array<i32>} : memref<18x48x128xbf16, #tpu.memory_space<vmem>>, vector<18x16x128xbf16>,
    %c0_13 = arith.constant 0 : index
    %c32_14 = arith.constant 32 : index
    %c0_15 = arith.constant 0 : index
    %8 = vector.load %arg10[%c0_13, %c32_14, %c0_15] : memref<18x48x128xbf16, #tpu.memory_space<vmem>>, vector<18x16x128xbf16>
    tpu.vector_store %arg10[%c0_13, %c32_14, %c0_15], %6 {strides = array<i32>} : memref<18x48x128xbf16, #tpu.memory_space<vmem>>, vector<18x16x128xbf16>,
    %cst_16 = arith.constant 0.000000e+00 : bf16
    %9 = vector.broadcast %cst_16 : bf16 to vector<1x16x128xbf16>
    %c0_17 = arith.constant 0 : index
    %c16_18 = arith.constant 16 : index
    %c0_19 = arith.constant 0 : index
    %10 = vector.load %arg10[%c0_17, %c16_18, %c0_19] : memref<18x48x128xbf16, #tpu.memory_space<vmem>>, vector<1x16x128xbf16>
    tpu.vector_store %arg10[%c0_17, %c16_18, %c0_19], %9 {strides = array<i32>} : memref<18x48x128xbf16, #tpu.memory_space<vmem>>, vector<1x16x128xbf16>,
    %c17_20 = arith.constant 17 : index
    %c16_21 = arith.constant 16 : index
    %c0_22 = arith.constant 0 : index
    %11 = vector.load %arg10[%c17_20, %c16_21, %c0_22] : memref<18x48x128xbf16, #tpu.memory_space<vmem>>, vector<1x16x128xbf16>
    tpu.vector_store %arg10[%c17_20, %c16_21, %c0_22], %9 {strides = array<i32>} : memref<18x48x128xbf16, #tpu.memory_space<vmem>>, vector<1x16x128xbf16>,
    %c0_23 = arith.constant 0 : index
    %c0_24 = arith.constant 0 : index
    %c0_25 = arith.constant 0 : index
    %12 = vector.load %arg1[%c0_23, %c0_24, %c0_25] : memref<1x256x128xbf16, #tpu.memory_space<vmem>>, vector<1x128x128xbf16>
    %13 = vector.shape_cast %12 : vector<1x128x128xbf16> to vector<128x128xbf16>
    %c0_26 = arith.constant 0 : index
    %c0_27 = arith.constant 0 : index
    %14 = vector.load %arg2[%c0_26, %c0_27] : memref<128x128xbf16, #tpu.memory_space<vmem>>, vector<128x128xbf16>
    %cst_28 = arith.constant dense<0.000000e+00> : vector<128x128xf32>
    %15 = tpu.matmul %13, %14, %cst_28 {dimension_numbers = #tpu.dot_dimension_numbers<[1], [0], [0], [1], [0, 0, 1, 1], [], []>} : vector<128x128xbf16>, vector<128x128xbf16>, vector<128x128xf32> -> vector<128x128xf32>
    %c0_29 = arith.constant 0 : index
    %c0_30 = arith.constant 0 : index
    %16 = vector.load %arg3[%c0_29, %c0_30] : memref<1x128xf32, #tpu.memory_space<vmem>>, vector<1x128xf32>
    %17 = vector.broadcast %16 : vector<1x128xf32> to vector<128x128xf32>
    %18 = arith.addf %15, %17 : vector<128x128xf32>
    %cst_31 = arith.constant 0.000000e+00 : f32
    %19 = vector.broadcast %cst_31 : f32 to vector<128x128xf32>
    %20 = arith.maximumf %18, %19 : vector<128x128xf32>
    %21 = arith.truncf %20 : vector<128x128xf32> to vector<128x128xbf16>
    %22 = vector.shape_cast %21 : vector<128x128xbf16> to vector<8x16x128xbf16>
    %c1 = arith.constant 1 : index
    %c16_32 = arith.constant 16 : index
    %c0_33 = arith.constant 0 : index
    %23 = vector.load %arg9[%c1, %c16_32, %c0_33] : memref<18x48x128xbf16, #tpu.memory_space<vmem>>, vector<8x16x128xbf16>
    tpu.vector_store %arg9[%c1, %c16_32, %c0_33], %22 {strides = array<i32>} : memref<18x48x128xbf16, #tpu.memory_space<vmem>>, vector<8x16x128xbf16>,
    %c0_34 = arith.constant 0 : index
    %c128 = arith.constant 128 : index
    %c0_35 = arith.constant 0 : index
    %24 = vector.load %arg1[%c0_34, %c128, %c0_35] : memref<1x256x128xbf16, #tpu.memory_space<vmem>>, vector<1x128x128xbf16>
    %25 = vector.shape_cast %24 : vector<1x128x128xbf16> to vector<128x128xbf16>
    %c0_36 = arith.constant 0 : index
    %c0_37 = arith.constant 0 : index
    %26 = vector.load %arg2[%c0_36, %c0_37] : memref<128x128xbf16, #tpu.memory_space<vmem>>, vector<128x128xbf16>
    %cst_38 = arith.constant dense<0.000000e+00> : vector<128x128xf32>
    %27 = tpu.matmul %25, %26, %cst_38 {dimension_numbers = #tpu.dot_dimension_numbers<[1], [0], [0], [1], [0, 0, 1, 1], [], []>} : vector<128x128xbf16>, vector<128x128xbf16>, vector<128x128xf32> -> vector<128x128xf32>
    %c0_39 = arith.constant 0 : index
    %c0_40 = arith.constant 0 : index
    %28 = vector.load %arg3[%c0_39, %c0_40] : memref<1x128xf32, #tpu.memory_space<vmem>>, vector<1x128xf32>
    %29 = vector.broadcast %28 : vector<1x128xf32> to vector<128x128xf32>
    %30 = arith.addf %27, %29 : vector<128x128xf32>
    %cst_41 = arith.constant 0.000000e+00 : f32
    %31 = vector.broadcast %cst_41 : f32 to vector<128x128xf32>
    %32 = arith.maximumf %30, %31 : vector<128x128xf32>
    %33 = arith.truncf %32 : vector<128x128xf32> to vector<128x128xbf16>
    %34 = vector.shape_cast %33 : vector<128x128xbf16> to vector<8x16x128xbf16>
    %c9 = arith.constant 9 : index
    %c16_42 = arith.constant 16 : index
    %c0_43 = arith.constant 0 : index
    %35 = vector.load %arg9[%c9, %c16_42, %c0_43] : memref<18x48x128xbf16, #tpu.memory_space<vmem>>, vector<8x16x128xbf16>
    tpu.vector_store %arg9[%c9, %c16_42, %c0_43], %34 {strides = array<i32>} : memref<18x48x128xbf16, #tpu.memory_space<vmem>>, vector<8x16x128xbf16>,
    %c0_44 = arith.constant 0 : index
    %c15 = arith.constant 15 : index
    %c0_45 = arith.constant 0 : index
    %36 = vector.load %arg9[%c0_44, %c15, %c0_45] : memref<18x48x128xbf16, #tpu.memory_space<vmem>>, vector<10x16x128xbf16>
    %37 = vector.extract_strided_slice %36 {offsets = [0, 0, 0], sizes = [8, 16, 128], strides = [1, 1, 1]} : vector<10x16x128xbf16> to vector<8x16x128xbf16>
    %38 = vector.shape_cast %37 : vector<8x16x128xbf16> to vector<128x128xbf16>
    %c0_46 = arith.constant 0 : index
    %c0_47 = arith.constant 0 : index
    %c0_48 = arith.constant 0 : index
    %39 = vector.load %arg4[%c0_46, %c0_47, %c0_48] : memref<9x128x128xbf16, #tpu.memory_space<vmem>>, vector<1x128x128xbf16>
    %40 = vector.shape_cast %39 : vector<1x128x128xbf16> to vector<128x128xbf16>
    %cst_49 = arith.constant dense<0.000000e+00> : vector<128x128xf32>
    %41 = tpu.matmul %38, %40, %cst_49 {dimension_numbers = #tpu.dot_dimension_numbers<[1], [0], [0], [1], [0, 0, 1, 1], [], []>} : vector<128x128xbf16>, vector<128x128xbf16>, vector<128x128xf32> -> vector<128x128xf32>
    %42 = vector.extract_strided_slice %36 {offsets = [1, 0, 0], sizes = [8, 16, 128], strides = [1, 1, 1]} : vector<10x16x128xbf16> to vector<8x16x128xbf16>
    %43 = vector.shape_cast %42 : vector<8x16x128xbf16> to vector<128x128xbf16>
    %c3 = arith.constant 3 : index
    %c0_50 = arith.constant 0 : index
    %c0_51 = arith.constant 0 : index
    %44 = vector.load %arg4[%c3, %c0_50, %c0_51] : memref<9x128x128xbf16, #tpu.memory_space<vmem>>, vector<1x128x128xbf16>
    %45 = vector.shape_cast %44 : vector<1x128x128xbf16> to vector<128x128xbf16>
    %cst_52 = arith.constant dense<0.000000e+00> : vector<128x128xf32>
    %46 = tpu.matmul %43, %45, %cst_52 {dimension_numbers = #tpu.dot_dimension_numbers<[1], [0], [0], [1], [0, 0, 1, 1], [], []>} : vector<128x128xbf16>, vector<128x128xbf16>, vector<128x128xf32> -> vector<128x128xf32>
    %47 = arith.addf %41, %46 : vector<128x128xf32>
    %48 = vector.extract_strided_slice %36 {offsets = [2, 0, 0], sizes = [8, 16, 128], strides = [1, 1, 1]} : vector<10x16x128xbf16> to vector<8x16x128xbf16>
    %49 = vector.shape_cast %48 : vector<8x16x128xbf16> to vector<128x128xbf16>
    %c6 = arith.constant 6 : index
    %c0_53 = arith.constant 0 : index
    %c0_54 = arith.constant 0 : index
    %50 = vector.load %arg4[%c6, %c0_53, %c0_54] : memref<9x128x128xbf16, #tpu.memory_space<vmem>>, vector<1x128x128xbf16>
    %51 = vector.shape_cast %50 : vector<1x128x128xbf16> to vector<128x128xbf16>
    %cst_55 = arith.constant dense<0.000000e+00> : vector<128x128xf32>
    %52 = tpu.matmul %49, %51, %cst_55 {dimension_numbers = #tpu.dot_dimension_numbers<[1], [0], [0], [1], [0, 0, 1, 1], [], []>} : vector<128x128xbf16>, vector<128x128xbf16>, vector<128x128xf32> -> vector<128x128xf32>
    %53 = arith.addf %47, %52 : vector<128x128xf32>
    %c0_56 = arith.constant 0 : index
    %c16_57 = arith.constant 16 : index
    %c0_58 = arith.constant 0 : index
    %54 = vector.load %arg9[%c0_56, %c16_57, %c0_58] : memref<18x48x128xbf16, #tpu.memory_space<vmem>>, vector<10x16x128xbf16>
    %55 = vector.extract_strided_slice %54 {offsets = [0, 0, 0], sizes = [8, 16, 128], strides = [1, 1, 1]} : vector<10x16x128xbf16> to vector<8x16x128xbf16>
    %56 = vector.shape_cast %55 : vector<8x16x128xbf16> to vector<128x128xbf16>
    %c1_59 = arith.constant 1 : index
    %c0_60 = arith.constant 0 : index
    %c0_61 = arith.constant 0 : index
    %57 = vector.load %arg4[%c1_59, %c0_60, %c0_61] : memref<9x128x128xbf16, #tpu.memory_space<vmem>>, vector<1x128x128xbf16>
    %58 = vector.shape_cast %57 : vector<1x128x128xbf16> to vector<128x128xbf16>
    %cst_62 = arith.constant dense<0.000000e+00> : vector<128x128xf32>
    %59 = tpu.matmul %56, %58, %cst_62 {dimension_numbers = #tpu.dot_dimension_numbers<[1], [0], [0], [1], [0, 0, 1, 1], [], []>} : vector<128x128xbf16>, vector<128x128xbf16>, vector<128x128xf32> -> vector<128x128xf32>
    %60 = arith.addf %53, %59 : vector<128x128xf32>
    %61 = vector.extract_strided_slice %54 {offsets = [1, 0, 0], sizes = [8, 16, 128], strides = [1, 1, 1]} : vector<10x16x128xbf16> to vector<8x16x128xbf16>
    %62 = vector.shape_cast %61 : vector<8x16x128xbf16> to vector<128x128xbf16>
    %c4 = arith.constant 4 : index
    %c0_63 = arith.constant 0 : index
    %c0_64 = arith.constant 0 : index
    %63 = vector.load %arg4[%c4, %c0_63, %c0_64] : memref<9x128x128xbf16, #tpu.memory_space<vmem>>, vector<1x128x128xbf16>
    %64 = vector.shape_cast %63 : vector<1x128x128xbf16> to vector<128x128xbf16>
    %cst_65 = arith.constant dense<0.000000e+00> : vector<128x128xf32>
    %65 = tpu.matmul %62, %64, %cst_65 {dimension_numbers = #tpu.dot_dimension_numbers<[1], [0], [0], [1], [0, 0, 1, 1], [], []>} : vector<128x128xbf16>, vector<128x128xbf16>, vector<128x128xf32> -> vector<128x128xf32>
    %66 = arith.addf %60, %65 : vector<128x128xf32>
    %67 = vector.extract_strided_slice %54 {offsets = [2, 0, 0], sizes = [8, 16, 128], strides = [1, 1, 1]} : vector<10x16x128xbf16> to vector<8x16x128xbf16>
    %68 = vector.shape_cast %67 : vector<8x16x128xbf16> to vector<128x128xbf16>
    %c7 = arith.constant 7 : index
    %c0_66 = arith.constant 0 : index
    %c0_67 = arith.constant 0 : index
    %69 = vector.load %arg4[%c7, %c0_66, %c0_67] : memref<9x128x128xbf16, #tpu.memory_space<vmem>>, vector<1x128x128xbf16>
    %70 = vector.shape_cast %69 : vector<1x128x128xbf16> to vector<128x128xbf16>
    %cst_68 = arith.constant dense<0.000000e+00> : vector<128x128xf32>
    %71 = tpu.matmul %68, %70, %cst_68 {dimension_numbers = #tpu.dot_dimension_numbers<[1], [0], [0], [1], [0, 0, 1, 1], [], []>} : vector<128x128xbf16>, vector<128x128xbf16>, vector<128x128xf32> -> vector<128x128xf32>
    %72 = arith.addf %66, %71 : vector<128x128xf32>
    %c0_69 = arith.constant 0 : index
    %c17_70 = arith.constant 17 : index
    %c0_71 = arith.constant 0 : index
    %73 = vector.load %arg9[%c0_69, %c17_70, %c0_71] : memref<18x48x128xbf16, #tpu.memory_space<vmem>>, vector<10x16x128xbf16>
    %74 = vector.extract_strided_slice %73 {offsets = [0, 0, 0], sizes = [8, 16, 128], strides = [1, 1, 1]} : vector<10x16x128xbf16> to vector<8x16x128xbf16>
    %75 = vector.shape_cast %74 : vector<8x16x128xbf16> to vector<128x128xbf16>
    %c2 = arith.constant 2 : index
    %c0_72 = arith.constant 0 : index
    %c0_73 = arith.constant 0 : index
    %76 = vector.load %arg4[%c2, %c0_72, %c0_73] : memref<9x128x128xbf16, #tpu.memory_space<vmem>>, vector<1x128x128xbf16>
    %77 = vector.shape_cast %76 : vector<1x128x128xbf16> to vector<128x128xbf16>
    %cst_74 = arith.constant dense<0.000000e+00> : vector<128x128xf32>
    %78 = tpu.matmul %75, %77, %cst_74 {dimension_numbers = #tpu.dot_dimension_numbers<[1], [0], [0], [1], [0, 0, 1, 1], [], []>} : vector<128x128xbf16>, vector<128x128xbf16>, vector<128x128xf32> -> vector<128x128xf32>
    %79 = arith.addf %72, %78 : vector<128x128xf32>
    %80 = vector.extract_strided_slice %73 {offsets = [1, 0, 0], sizes = [8, 16, 128], strides = [1, 1, 1]} : vector<10x16x128xbf16> to vector<8x16x128xbf16>
    %81 = vector.shape_cast %80 : vector<8x16x128xbf16> to vector<128x128xbf16>
    %c5 = arith.constant 5 : index
    %c0_75 = arith.constant 0 : index
    %c0_76 = arith.constant 0 : index
    %82 = vector.load %arg4[%c5, %c0_75, %c0_76] : memref<9x128x128xbf16, #tpu.memory_space<vmem>>, vector<1x128x128xbf16>
    %83 = vector.shape_cast %82 : vector<1x128x128xbf16> to vector<128x128xbf16>
    %cst_77 = arith.constant dense<0.000000e+00> : vector<128x128xf32>
    %84 = tpu.matmul %81, %83, %cst_77 {dimension_numbers = #tpu.dot_dimension_numbers<[1], [0], [0], [1], [0, 0, 1, 1], [], []>} : vector<128x128xbf16>, vector<128x128xbf16>, vector<128x128xf32> -> vector<128x128xf32>
    %85 = arith.addf %79, %84 : vector<128x128xf32>
    %86 = vector.extract_strided_slice %73 {offsets = [2, 0, 0], sizes = [8, 16, 128], strides = [1, 1, 1]} : vector<10x16x128xbf16> to vector<8x16x128xbf16>
    %87 = vector.shape_cast %86 : vector<8x16x128xbf16> to vector<128x128xbf16>
    %c8 = arith.constant 8 : index
    %c0_78 = arith.constant 0 : index
    %c0_79 = arith.constant 0 : index
    %88 = vector.load %arg4[%c8, %c0_78, %c0_79] : memref<9x128x128xbf16, #tpu.memory_space<vmem>>, vector<1x128x128xbf16>
    %89 = vector.shape_cast %88 : vector<1x128x128xbf16> to vector<128x128xbf16>
    %cst_80 = arith.constant dense<0.000000e+00> : vector<128x128xf32>
    %90 = tpu.matmul %87, %89, %cst_80 {dimension_numbers = #tpu.dot_dimension_numbers<[1], [0], [0], [1], [0, 0, 1, 1], [], []>} : vector<128x128xbf16>, vector<128x128xbf16>, vector<128x128xf32> -> vector<128x128xf32>
    %91 = arith.addf %85, %90 : vector<128x128xf32>
    %c0_81 = arith.constant 0 : index
    %c0_82 = arith.constant 0 : index
    %92 = vector.load %arg5[%c0_81, %c0_82] : memref<1x128xf32, #tpu.memory_space<vmem>>, vector<1x128xf32>
    %93 = vector.broadcast %92 : vector<1x128xf32> to vector<128x128xf32>
    %94 = arith.addf %91, %93 : vector<128x128xf32>
    %cst_83 = arith.constant 0.000000e+00 : f32
    %95 = vector.broadcast %cst_83 : f32 to vector<128x128xf32>
    %96 = arith.maximumf %94, %95 : vector<128x128xf32>
    %97 = arith.truncf %96 : vector<128x128xf32> to vector<128x128xbf16>
    %98 = vector.shape_cast %97 : vector<128x128xbf16> to vector<8x16x128xbf16>
    %c1_84 = arith.constant 1 : index
    %c16_85 = arith.constant 16 : index
    %c0_86 = arith.constant 0 : index
    %99 = vector.load %arg10[%c1_84, %c16_85, %c0_86] : memref<18x48x128xbf16, #tpu.memory_space<vmem>>, vector<8x16x128xbf16>
    tpu.vector_store %arg10[%c1_84, %c16_85, %c0_86], %98 {strides = array<i32>} : memref<18x48x128xbf16, #tpu.memory_space<vmem>>, vector<8x16x128xbf16>,
    %c8_87 = arith.constant 8 : index
    %c15_88 = arith.constant 15 : index
    %c0_89 = arith.constant 0 : index
    %100 = vector.load %arg9[%c8_87, %c15_88, %c0_89] : memref<18x48x128xbf16, #tpu.memory_space<vmem>>, vector<10x16x128xbf16>
    %101 = vector.extract_strided_slice %100 {offsets = [0, 0, 0], sizes = [8, 16, 128], strides = [1, 1, 1]} : vector<10x16x128xbf16> to vector<8x16x128xbf16>
    %102 = vector.shape_cast %101 : vector<8x16x128xbf16> to vector<128x128xbf16>
    %c0_90 = arith.constant 0 : index
    %c0_91 = arith.constant 0 : index
    %c0_92 = arith.constant 0 : index
    %103 = vector.load %arg4[%c0_90, %c0_91, %c0_92] : memref<9x128x128xbf16, #tpu.memory_space<vmem>>, vector<1x128x128xbf16>
    %104 = vector.shape_cast %103 : vector<1x128x128xbf16> to vector<128x128xbf16>
    %cst_93 = arith.constant dense<0.000000e+00> : vector<128x128xf32>
    %105 = tpu.matmul %102, %104, %cst_93 {dimension_numbers = #tpu.dot_dimension_numbers<[1], [0], [0], [1], [0, 0, 1, 1], [], []>} : vector<128x128xbf16>, vector<128x128xbf16>, vector<128x128xf32> -> vector<128x128xf32>
    %106 = vector.extract_strided_slice %100 {offsets = [1, 0, 0], sizes = [8, 16, 128], strides = [1, 1, 1]} : vector<10x16x128xbf16> to vector<8x16x128xbf16>
    %107 = vector.shape_cast %106 : vector<8x16x128xbf16> to vector<128x128xbf16>
    %c3_94 = arith.constant 3 : index
    %c0_95 = arith.constant 0 : index
    %c0_96 = arith.constant 0 : index
    %108 = vector.load %arg4[%c3_94, %c0_95, %c0_96] : memref<9x128x128xbf16, #tpu.memory_space<vmem>>, vector<1x128x128xbf16>
    %109 = vector.shape_cast %108 : vector<1x128x128xbf16> to vector<128x128xbf16>
    %cst_97 = arith.constant dense<0.000000e+00> : vector<128x128xf32>
    %110 = tpu.matmul %107, %109, %cst_97 {dimension_numbers = #tpu.dot_dimension_numbers<[1], [0], [0], [1], [0, 0, 1, 1], [], []>} : vector<128x128xbf16>, vector<128x128xbf16>, vector<128x128xf32> -> vector<128x128xf32>
    %111 = arith.addf %105, %110 : vector<128x128xf32>
    %112 = vector.extract_strided_slice %100 {offsets = [2, 0, 0], sizes = [8, 16, 128], strides = [1, 1, 1]} : vector<10x16x128xbf16> to vector<8x16x128xbf16>
    %113 = vector.shape_cast %112 : vector<8x16x128xbf16> to vector<128x128xbf16>
    %c6_98 = arith.constant 6 : index
    %c0_99 = arith.constant 0 : index
    %c0_100 = arith.constant 0 : index
    %114 = vector.load %arg4[%c6_98, %c0_99, %c0_100] : memref<9x128x128xbf16, #tpu.memory_space<vmem>>, vector<1x128x128xbf16>
    %115 = vector.shape_cast %114 : vector<1x128x128xbf16> to vector<128x128xbf16>
    %cst_101 = arith.constant dense<0.000000e+00> : vector<128x128xf32>
    %116 = tpu.matmul %113, %115, %cst_101 {dimension_numbers = #tpu.dot_dimension_numbers<[1], [0], [0], [1], [0, 0, 1, 1], [], []>} : vector<128x128xbf16>, vector<128x128xbf16>, vector<128x128xf32> -> vector<128x128xf32>
    %117 = arith.addf %111, %116 : vector<128x128xf32>
    %c8_102 = arith.constant 8 : index
    %c16_103 = arith.constant 16 : index
    %c0_104 = arith.constant 0 : index
    %118 = vector.load %arg9[%c8_102, %c16_103, %c0_104] : memref<18x48x128xbf16, #tpu.memory_space<vmem>>, vector<10x16x128xbf16>
    %119 = vector.extract_strided_slice %118 {offsets = [0, 0, 0], sizes = [8, 16, 128], strides = [1, 1, 1]} : vector<10x16x128xbf16> to vector<8x16x128xbf16>
    %120 = vector.shape_cast %119 : vector<8x16x128xbf16> to vector<128x128xbf16>
    %c1_105 = arith.constant 1 : index
    %c0_106 = arith.constant 0 : index
    %c0_107 = arith.constant 0 : index
    %121 = vector.load %arg4[%c1_105, %c0_106, %c0_107] : memref<9x128x128xbf16, #tpu.memory_space<vmem>>, vector<1x128x128xbf16>
    %122 = vector.shape_cast %121 : vector<1x128x128xbf16> to vector<128x128xbf16>
    %cst_108 = arith.constant dense<0.000000e+00> : vector<128x128xf32>
    %123 = tpu.matmul %120, %122, %cst_108 {dimension_numbers = #tpu.dot_dimension_numbers<[1], [0], [0], [1], [0, 0, 1, 1], [], []>} : vector<128x128xbf16>, vector<128x128xbf16>, vector<128x128xf32> -> vector<128x128xf32>
    %124 = arith.addf %117, %123 : vector<128x128xf32>
    %125 = vector.extract_strided_slice %118 {offsets = [1, 0, 0], sizes = [8, 16, 128], strides = [1, 1, 1]} : vector<10x16x128xbf16> to vector<8x16x128xbf16>
    %126 = vector.shape_cast %125 : vector<8x16x128xbf16> to vector<128x128xbf16>
    %c4_109 = arith.constant 4 : index
    %c0_110 = arith.constant 0 : index
    %c0_111 = arith.constant 0 : index
    %127 = vector.load %arg4[%c4_109, %c0_110, %c0_111] : memref<9x128x128xbf16, #tpu.memory_space<vmem>>, vector<1x128x128xbf16>
    %128 = vector.shape_cast %127 : vector<1x128x128xbf16> to vector<128x128xbf16>
    %cst_112 = arith.constant dense<0.000000e+00> : vector<128x128xf32>
    %129 = tpu.matmul %126, %128, %cst_112 {dimension_numbers = #tpu.dot_dimension_numbers<[1], [0], [0], [1], [0, 0, 1, 1], [], []>} : vector<128x128xbf16>, vector<128x128xbf16>, vector<128x128xf32> -> vector<128x128xf32>
    %130 = arith.addf %124, %129 : vector<128x128xf32>
    %131 = vector.extract_strided_slice %118 {offsets = [2, 0, 0], sizes = [8, 16, 128], strides = [1, 1, 1]} : vector<10x16x128xbf16> to vector<8x16x128xbf16>
    %132 = vector.shape_cast %131 : vector<8x16x128xbf16> to vector<128x128xbf16>
    %c7_113 = arith.constant 7 : index
    %c0_114 = arith.constant 0 : index
    %c0_115 = arith.constant 0 : index
    %133 = vector.load %arg4[%c7_113, %c0_114, %c0_115] : memref<9x128x128xbf16, #tpu.memory_space<vmem>>, vector<1x128x128xbf16>
    %134 = vector.shape_cast %133 : vector<1x128x128xbf16> to vector<128x128xbf16>
    %cst_116 = arith.constant dense<0.000000e+00> : vector<128x128xf32>
    %135 = tpu.matmul %132, %134, %cst_116 {dimension_numbers = #tpu.dot_dimension_numbers<[1], [0], [0], [1], [0, 0, 1, 1], [], []>} : vector<128x128xbf16>, vector<128x128xbf16>, vector<128x128xf32> -> vector<128x128xf32>
    %136 = arith.addf %130, %135 : vector<128x128xf32>
    %c8_117 = arith.constant 8 : index
    %c17_118 = arith.constant 17 : index
    %c0_119 = arith.constant 0 : index
    %137 = vector.load %arg9[%c8_117, %c17_118, %c0_119] : memref<18x48x128xbf16, #tpu.memory_space<vmem>>, vector<10x16x128xbf16>
    %138 = vector.extract_strided_slice %137 {offsets = [0, 0, 0], sizes = [8, 16, 128], strides = [1, 1, 1]} : vector<10x16x128xbf16> to vector<8x16x128xbf16>
    %139 = vector.shape_cast %138 : vector<8x16x128xbf16> to vector<128x128xbf16>
    %c2_120 = arith.constant 2 : index
    %c0_121 = arith.constant 0 : index
    %c0_122 = arith.constant 0 : index
    %140 = vector.load %arg4[%c2_120, %c0_121, %c0_122] : memref<9x128x128xbf16, #tpu.memory_space<vmem>>, vector<1x128x128xbf16>
    %141 = vector.shape_cast %140 : vector<1x128x128xbf16> to vector<128x128xbf16>
    %cst_123 = arith.constant dense<0.000000e+00> : vector<128x128xf32>
    %142 = tpu.matmul %139, %141, %cst_123 {dimension_numbers = #tpu.dot_dimension_numbers<[1], [0], [0], [1], [0, 0, 1, 1], [], []>} : vector<128x128xbf16>, vector<128x128xbf16>, vector<128x128xf32> -> vector<128x128xf32>
    %143 = arith.addf %136, %142 : vector<128x128xf32>
    %144 = vector.extract_strided_slice %137 {offsets = [1, 0, 0], sizes = [8, 16, 128], strides = [1, 1, 1]} : vector<10x16x128xbf16> to vector<8x16x128xbf16>
    %145 = vector.shape_cast %144 : vector<8x16x128xbf16> to vector<128x128xbf16>
    %c5_124 = arith.constant 5 : index
    %c0_125 = arith.constant 0 : index
    %c0_126 = arith.constant 0 : index
    %146 = vector.load %arg4[%c5_124, %c0_125, %c0_126] : memref<9x128x128xbf16, #tpu.memory_space<vmem>>, vector<1x128x128xbf16>
    %147 = vector.shape_cast %146 : vector<1x128x128xbf16> to vector<128x128xbf16>
    %cst_127 = arith.constant dense<0.000000e+00> : vector<128x128xf32>
    %148 = tpu.matmul %145, %147, %cst_127 {dimension_numbers = #tpu.dot_dimension_numbers<[1], [0], [0], [1], [0, 0, 1, 1], [], []>} : vector<128x128xbf16>, vector<128x128xbf16>, vector<128x128xf32> -> vector<128x128xf32>
    %149 = arith.addf %143, %148 : vector<128x128xf32>
    %150 = vector.extract_strided_slice %137 {offsets = [2, 0, 0], sizes = [8, 16, 128], strides = [1, 1, 1]} : vector<10x16x128xbf16> to vector<8x16x128xbf16>
    %151 = vector.shape_cast %150 : vector<8x16x128xbf16> to vector<128x128xbf16>
    %c8_128 = arith.constant 8 : index
    %c0_129 = arith.constant 0 : index
    %c0_130 = arith.constant 0 : index
    %152 = vector.load %arg4[%c8_128, %c0_129, %c0_130] : memref<9x128x128xbf16, #tpu.memory_space<vmem>>, vector<1x128x128xbf16>
    %153 = vector.shape_cast %152 : vector<1x128x128xbf16> to vector<128x128xbf16>
    %cst_131 = arith.constant dense<0.000000e+00> : vector<128x128xf32>
    %154 = tpu.matmul %151, %153, %cst_131 {dimension_numbers = #tpu.dot_dimension_numbers<[1], [0], [0], [1], [0, 0, 1, 1], [], []>} : vector<128x128xbf16>, vector<128x128xbf16>, vector<128x128xf32> -> vector<128x128xf32>
    %155 = arith.addf %149, %154 : vector<128x128xf32>
    %c0_132 = arith.constant 0 : index
    %c0_133 = arith.constant 0 : index
    %156 = vector.load %arg5[%c0_132, %c0_133] : memref<1x128xf32, #tpu.memory_space<vmem>>, vector<1x128xf32>
    %157 = vector.broadcast %156 : vector<1x128xf32> to vector<128x128xf32>
    %158 = arith.addf %155, %157 : vector<128x128xf32>
    %cst_134 = arith.constant 0.000000e+00 : f32
    %159 = vector.broadcast %cst_134 : f32 to vector<128x128xf32>
    %160 = arith.maximumf %158, %159 : vector<128x128xf32>
    %161 = arith.truncf %160 : vector<128x128xf32> to vector<128x128xbf16>
    %162 = vector.shape_cast %161 : vector<128x128xbf16> to vector<8x16x128xbf16>
    %c9_135 = arith.constant 9 : index
    %c16_136 = arith.constant 16 : index
    %c0_137 = arith.constant 0 : index
    %163 = vector.load %arg10[%c9_135, %c16_136, %c0_137] : memref<18x48x128xbf16, #tpu.memory_space<vmem>>, vector<8x16x128xbf16>
    tpu.vector_store %arg10[%c9_135, %c16_136, %c0_137], %162 {strides = array<i32>} : memref<18x48x128xbf16, #tpu.memory_space<vmem>>, vector<8x16x128xbf16>,
    %c0_138 = arith.constant 0 : index
    %c15_139 = arith.constant 15 : index
    %c0_140 = arith.constant 0 : index
    %164 = vector.load %arg10[%c0_138, %c15_139, %c0_140] : memref<18x48x128xbf16, #tpu.memory_space<vmem>>, vector<10x16x128xbf16>
    %165 = vector.extract_strided_slice %164 {offsets = [0, 0, 0], sizes = [8, 16, 128], strides = [1, 1, 1]} : vector<10x16x128xbf16> to vector<8x16x128xbf16>
    %166 = vector.shape_cast %165 : vector<8x16x128xbf16> to vector<128x128xbf16>
    %c0_141 = arith.constant 0 : index
    %c0_142 = arith.constant 0 : index
    %c0_143 = arith.constant 0 : index
    %167 = vector.load %arg6[%c0_141, %c0_142, %c0_143] : memref<9x128x128xbf16, #tpu.memory_space<vmem>>, vector<1x128x128xbf16>
    %168 = vector.shape_cast %167 : vector<1x128x128xbf16> to vector<128x128xbf16>
    %cst_144 = arith.constant dense<0.000000e+00> : vector<128x128xf32>
    %169 = tpu.matmul %166, %168, %cst_144 {dimension_numbers = #tpu.dot_dimension_numbers<[1], [0], [0], [1], [0, 0, 1, 1], [], []>} : vector<128x128xbf16>, vector<128x128xbf16>, vector<128x128xf32> -> vector<128x128xf32>
    %170 = vector.extract_strided_slice %164 {offsets = [1, 0, 0], sizes = [8, 16, 128], strides = [1, 1, 1]} : vector<10x16x128xbf16> to vector<8x16x128xbf16>
    %171 = vector.shape_cast %170 : vector<8x16x128xbf16> to vector<128x128xbf16>
    %c3_145 = arith.constant 3 : index
    %c0_146 = arith.constant 0 : index
    %c0_147 = arith.constant 0 : index
    %172 = vector.load %arg6[%c3_145, %c0_146, %c0_147] : memref<9x128x128xbf16, #tpu.memory_space<vmem>>, vector<1x128x128xbf16>
    %173 = vector.shape_cast %172 : vector<1x128x128xbf16> to vector<128x128xbf16>
    %cst_148 = arith.constant dense<0.000000e+00> : vector<128x128xf32>
    %174 = tpu.matmul %171, %173, %cst_148 {dimension_numbers = #tpu.dot_dimension_numbers<[1], [0], [0], [1], [0, 0, 1, 1], [], []>} : vector<128x128xbf16>, vector<128x128xbf16>, vector<128x128xf32> -> vector<128x128xf32>
    %175 = arith.addf %169, %174 : vector<128x128xf32>
    %176 = vector.extract_strided_slice %164 {offsets = [2, 0, 0], sizes = [8, 16, 128], strides = [1, 1, 1]} : vector<10x16x128xbf16> to vector<8x16x128xbf16>
    %177 = vector.shape_cast %176 : vector<8x16x128xbf16> to vector<128x128xbf16>
    %c6_149 = arith.constant 6 : index
    %c0_150 = arith.constant 0 : index
    %c0_151 = arith.constant 0 : index
    %178 = vector.load %arg6[%c6_149, %c0_150, %c0_151] : memref<9x128x128xbf16, #tpu.memory_space<vmem>>, vector<1x128x128xbf16>
    %179 = vector.shape_cast %178 : vector<1x128x128xbf16> to vector<128x128xbf16>
    %cst_152 = arith.constant dense<0.000000e+00> : vector<128x128xf32>
    %180 = tpu.matmul %177, %179, %cst_152 {dimension_numbers = #tpu.dot_dimension_numbers<[1], [0], [0], [1], [0, 0, 1, 1], [], []>} : vector<128x128xbf16>, vector<128x128xbf16>, vector<128x128xf32> -> vector<128x128xf32>
    %181 = arith.addf %175, %180 : vector<128x128xf32>
    %c0_153 = arith.constant 0 : index
    %c16_154 = arith.constant 16 : index
    %c0_155 = arith.constant 0 : index
    %182 = vector.load %arg10[%c0_153, %c16_154, %c0_155] : memref<18x48x128xbf16, #tpu.memory_space<vmem>>, vector<10x16x128xbf16>
    %183 = vector.extract_strided_slice %182 {offsets = [0, 0, 0], sizes = [8, 16, 128], strides = [1, 1, 1]} : vector<10x16x128xbf16> to vector<8x16x128xbf16>
    %184 = vector.shape_cast %183 : vector<8x16x128xbf16> to vector<128x128xbf16>
    %c1_156 = arith.constant 1 : index
    %c0_157 = arith.constant 0 : index
    %c0_158 = arith.constant 0 : index
    %185 = vector.load %arg6[%c1_156, %c0_157, %c0_158] : memref<9x128x128xbf16, #tpu.memory_space<vmem>>, vector<1x128x128xbf16>
    %186 = vector.shape_cast %185 : vector<1x128x128xbf16> to vector<128x128xbf16>
    %cst_159 = arith.constant dense<0.000000e+00> : vector<128x128xf32>
    %187 = tpu.matmul %184, %186, %cst_159 {dimension_numbers = #tpu.dot_dimension_numbers<[1], [0], [0], [1], [0, 0, 1, 1], [], []>} : vector<128x128xbf16>, vector<128x128xbf16>, vector<128x128xf32> -> vector<128x128xf32>
    %188 = arith.addf %181, %187 : vector<128x128xf32>
    %189 = vector.extract_strided_slice %182 {offsets = [1, 0, 0], sizes = [8, 16, 128], strides = [1, 1, 1]} : vector<10x16x128xbf16> to vector<8x16x128xbf16>
    %190 = vector.shape_cast %189 : vector<8x16x128xbf16> to vector<128x128xbf16>
    %c4_160 = arith.constant 4 : index
    %c0_161 = arith.constant 0 : index
    %c0_162 = arith.constant 0 : index
    %191 = vector.load %arg6[%c4_160, %c0_161, %c0_162] : memref<9x128x128xbf16, #tpu.memory_space<vmem>>, vector<1x128x128xbf16>
    %192 = vector.shape_cast %191 : vector<1x128x128xbf16> to vector<128x128xbf16>
    %cst_163 = arith.constant dense<0.000000e+00> : vector<128x128xf32>
    %193 = tpu.matmul %190, %192, %cst_163 {dimension_numbers = #tpu.dot_dimension_numbers<[1], [0], [0], [1], [0, 0, 1, 1], [], []>} : vector<128x128xbf16>, vector<128x128xbf16>, vector<128x128xf32> -> vector<128x128xf32>
    %194 = arith.addf %188, %193 : vector<128x128xf32>
    %195 = vector.extract_strided_slice %182 {offsets = [2, 0, 0], sizes = [8, 16, 128], strides = [1, 1, 1]} : vector<10x16x128xbf16> to vector<8x16x128xbf16>
    %196 = vector.shape_cast %195 : vector<8x16x128xbf16> to vector<128x128xbf16>
    %c7_164 = arith.constant 7 : index
    %c0_165 = arith.constant 0 : index
    %c0_166 = arith.constant 0 : index
    %197 = vector.load %arg6[%c7_164, %c0_165, %c0_166] : memref<9x128x128xbf16, #tpu.memory_space<vmem>>, vector<1x128x128xbf16>
    %198 = vector.shape_cast %197 : vector<1x128x128xbf16> to vector<128x128xbf16>
    %cst_167 = arith.constant dense<0.000000e+00> : vector<128x128xf32>
    %199 = tpu.matmul %196, %198, %cst_167 {dimension_numbers = #tpu.dot_dimension_numbers<[1], [0], [0], [1], [0, 0, 1, 1], [], []>} : vector<128x128xbf16>, vector<128x128xbf16>, vector<128x128xf32> -> vector<128x128xf32>
    %200 = arith.addf %194, %199 : vector<128x128xf32>
    %c0_168 = arith.constant 0 : index
    %c17_169 = arith.constant 17 : index
    %c0_170 = arith.constant 0 : index
    %201 = vector.load %arg10[%c0_168, %c17_169, %c0_170] : memref<18x48x128xbf16, #tpu.memory_space<vmem>>, vector<10x16x128xbf16>
    %202 = vector.extract_strided_slice %201 {offsets = [0, 0, 0], sizes = [8, 16, 128], strides = [1, 1, 1]} : vector<10x16x128xbf16> to vector<8x16x128xbf16>
    %203 = vector.shape_cast %202 : vector<8x16x128xbf16> to vector<128x128xbf16>
    %c2_171 = arith.constant 2 : index
    %c0_172 = arith.constant 0 : index
    %c0_173 = arith.constant 0 : index
    %204 = vector.load %arg6[%c2_171, %c0_172, %c0_173] : memref<9x128x128xbf16, #tpu.memory_space<vmem>>, vector<1x128x128xbf16>
    %205 = vector.shape_cast %204 : vector<1x128x128xbf16> to vector<128x128xbf16>
    %cst_174 = arith.constant dense<0.000000e+00> : vector<128x128xf32>
    %206 = tpu.matmul %203, %205, %cst_174 {dimension_numbers = #tpu.dot_dimension_numbers<[1], [0], [0], [1], [0, 0, 1, 1], [], []>} : vector<128x128xbf16>, vector<128x128xbf16>, vector<128x128xf32> -> vector<128x128xf32>
    %207 = arith.addf %200, %206 : vector<128x128xf32>
    %208 = vector.extract_strided_slice %201 {offsets = [1, 0, 0], sizes = [8, 16, 128], strides = [1, 1, 1]} : vector<10x16x128xbf16> to vector<8x16x128xbf16>
    %209 = vector.shape_cast %208 : vector<8x16x128xbf16> to vector<128x128xbf16>
    %c5_175 = arith.constant 5 : index
    %c0_176 = arith.constant 0 : index
    %c0_177 = arith.constant 0 : index
    %210 = vector.load %arg6[%c5_175, %c0_176, %c0_177] : memref<9x128x128xbf16, #tpu.memory_space<vmem>>, vector<1x128x128xbf16>
    %211 = vector.shape_cast %210 : vector<1x128x128xbf16> to vector<128x128xbf16>
    %cst_178 = arith.constant dense<0.000000e+00> : vector<128x128xf32>
    %212 = tpu.matmul %209, %211, %cst_178 {dimension_numbers = #tpu.dot_dimension_numbers<[1], [0], [0], [1], [0, 0, 1, 1], [], []>} : vector<128x128xbf16>, vector<128x128xbf16>, vector<128x128xf32> -> vector<128x128xf32>
    %213 = arith.addf %207, %212 : vector<128x128xf32>
    %214 = vector.extract_strided_slice %201 {offsets = [2, 0, 0], sizes = [8, 16, 128], strides = [1, 1, 1]} : vector<10x16x128xbf16> to vector<8x16x128xbf16>
    %215 = vector.shape_cast %214 : vector<8x16x128xbf16> to vector<128x128xbf16>
    %c8_179 = arith.constant 8 : index
    %c0_180 = arith.constant 0 : index
    %c0_181 = arith.constant 0 : index
    %216 = vector.load %arg6[%c8_179, %c0_180, %c0_181] : memref<9x128x128xbf16, #tpu.memory_space<vmem>>, vector<1x128x128xbf16>
    %217 = vector.shape_cast %216 : vector<1x128x128xbf16> to vector<128x128xbf16>
    %cst_182 = arith.constant dense<0.000000e+00> : vector<128x128xf32>
    %218 = tpu.matmul %215, %217, %cst_182 {dimension_numbers = #tpu.dot_dimension_numbers<[1], [0], [0], [1], [0, 0, 1, 1], [], []>} : vector<128x128xbf16>, vector<128x128xbf16>, vector<128x128xf32> -> vector<128x128xf32>
    %219 = arith.addf %213, %218 : vector<128x128xf32>
    %c0_183 = arith.constant 0 : index
    %c0_184 = arith.constant 0 : index
    %220 = vector.load %arg7[%c0_183, %c0_184] : memref<1x128xf32, #tpu.memory_space<vmem>>, vector<1x128xf32>
    %221 = vector.broadcast %220 : vector<1x128xf32> to vector<128x128xf32>
    %222 = arith.addf %219, %221 : vector<128x128xf32>
    %223 = arith.truncf %222 : vector<128x128xf32> to vector<128x128xbf16>
    %c0_185 = arith.constant 0 : index
    %c0_186 = arith.constant 0 : index
    %c0_187 = arith.constant 0 : index
    %224 = vector.load %arg8[%c0_185, %c0_186, %c0_187] : memref<1x256x128xbf16, #tpu.memory_space<vmem>>, vector<1x128x128xbf16>
    %225 = vector.shape_cast %224 : vector<1x128x128xbf16> to vector<128x128xbf16>
    %226 = vector.shape_cast %223 : vector<128x128xbf16> to vector<1x128x128xbf16>
    tpu.vector_store %arg8[%c0_185, %c0_186, %c0_187], %226 {strides = array<i32>} : memref<1x256x128xbf16, #tpu.memory_space<vmem>>, vector<1x128x128xbf16>,
    %c8_188 = arith.constant 8 : index
    %c15_189 = arith.constant 15 : index
    %c0_190 = arith.constant 0 : index
    %227 = vector.load %arg10[%c8_188, %c15_189, %c0_190] : memref<18x48x128xbf16, #tpu.memory_space<vmem>>, vector<10x16x128xbf16>
    %228 = vector.extract_strided_slice %227 {offsets = [0, 0, 0], sizes = [8, 16, 128], strides = [1, 1, 1]} : vector<10x16x128xbf16> to vector<8x16x128xbf16>
    %229 = vector.shape_cast %228 : vector<8x16x128xbf16> to vector<128x128xbf16>
    %c0_191 = arith.constant 0 : index
    %c0_192 = arith.constant 0 : index
    %c0_193 = arith.constant 0 : index
    %230 = vector.load %arg6[%c0_191, %c0_192, %c0_193] : memref<9x128x128xbf16, #tpu.memory_space<vmem>>, vector<1x128x128xbf16>
    %231 = vector.shape_cast %230 : vector<1x128x128xbf16> to vector<128x128xbf16>
    %cst_194 = arith.constant dense<0.000000e+00> : vector<128x128xf32>
    %232 = tpu.matmul %229, %231, %cst_194 {dimension_numbers = #tpu.dot_dimension_numbers<[1], [0], [0], [1], [0, 0, 1, 1], [], []>} : vector<128x128xbf16>, vector<128x128xbf16>, vector<128x128xf32> -> vector<128x128xf32>
    %233 = vector.extract_strided_slice %227 {offsets = [1, 0, 0], sizes = [8, 16, 128], strides = [1, 1, 1]} : vector<10x16x128xbf16> to vector<8x16x128xbf16>
    %234 = vector.shape_cast %233 : vector<8x16x128xbf16> to vector<128x128xbf16>
    %c3_195 = arith.constant 3 : index
    %c0_196 = arith.constant 0 : index
    %c0_197 = arith.constant 0 : index
    %235 = vector.load %arg6[%c3_195, %c0_196, %c0_197] : memref<9x128x128xbf16, #tpu.memory_space<vmem>>, vector<1x128x128xbf16>
    %236 = vector.shape_cast %235 : vector<1x128x128xbf16> to vector<128x128xbf16>
    %cst_198 = arith.constant dense<0.000000e+00> : vector<128x128xf32>
    %237 = tpu.matmul %234, %236, %cst_198 {dimension_numbers = #tpu.dot_dimension_numbers<[1], [0], [0], [1], [0, 0, 1, 1], [], []>} : vector<128x128xbf16>, vector<128x128xbf16>, vector<128x128xf32> -> vector<128x128xf32>
    %238 = arith.addf %232, %237 : vector<128x128xf32>
    %239 = vector.extract_strided_slice %227 {offsets = [2, 0, 0], sizes = [8, 16, 128], strides = [1, 1, 1]} : vector<10x16x128xbf16> to vector<8x16x128xbf16>
    %240 = vector.shape_cast %239 : vector<8x16x128xbf16> to vector<128x128xbf16>
    %c6_199 = arith.constant 6 : index
    %c0_200 = arith.constant 0 : index
    %c0_201 = arith.constant 0 : index
    %241 = vector.load %arg6[%c6_199, %c0_200, %c0_201] : memref<9x128x128xbf16, #tpu.memory_space<vmem>>, vector<1x128x128xbf16>
    %242 = vector.shape_cast %241 : vector<1x128x128xbf16> to vector<128x128xbf16>
    %cst_202 = arith.constant dense<0.000000e+00> : vector<128x128xf32>
    %243 = tpu.matmul %240, %242, %cst_202 {dimension_numbers = #tpu.dot_dimension_numbers<[1], [0], [0], [1], [0, 0, 1, 1], [], []>} : vector<128x128xbf16>, vector<128x128xbf16>, vector<128x128xf32> -> vector<128x128xf32>
    %244 = arith.addf %238, %243 : vector<128x128xf32>
    %c8_203 = arith.constant 8 : index
    %c16_204 = arith.constant 16 : index
    %c0_205 = arith.constant 0 : index
    %245 = vector.load %arg10[%c8_203, %c16_204, %c0_205] : memref<18x48x128xbf16, #tpu.memory_space<vmem>>, vector<10x16x128xbf16>
    %246 = vector.extract_strided_slice %245 {offsets = [0, 0, 0], sizes = [8, 16, 128], strides = [1, 1, 1]} : vector<10x16x128xbf16> to vector<8x16x128xbf16>
    %247 = vector.shape_cast %246 : vector<8x16x128xbf16> to vector<128x128xbf16>
    %c1_206 = arith.constant 1 : index
    %c0_207 = arith.constant 0 : index
    %c0_208 = arith.constant 0 : index
    %248 = vector.load %arg6[%c1_206, %c0_207, %c0_208] : memref<9x128x128xbf16, #tpu.memory_space<vmem>>, vector<1x128x128xbf16>
    %249 = vector.shape_cast %248 : vector<1x128x128xbf16> to vector<128x128xbf16>
    %cst_209 = arith.constant dense<0.000000e+00> : vector<128x128xf32>
    %250 = tpu.matmul %247, %249, %cst_209 {dimension_numbers = #tpu.dot_dimension_numbers<[1], [0], [0], [1], [0, 0, 1, 1], [], []>} : vector<128x128xbf16>, vector<128x128xbf16>, vector<128x128xf32> -> vector<128x128xf32>
    %251 = arith.addf %244, %250 : vector<128x128xf32>
    %252 = vector.extract_strided_slice %245 {offsets = [1, 0, 0], sizes = [8, 16, 128], strides = [1, 1, 1]} : vector<10x16x128xbf16> to vector<8x16x128xbf16>
    %253 = vector.shape_cast %252 : vector<8x16x128xbf16> to vector<128x128xbf16>
    %c4_210 = arith.constant 4 : index
    %c0_211 = arith.constant 0 : index
    %c0_212 = arith.constant 0 : index
    %254 = vector.load %arg6[%c4_210, %c0_211, %c0_212] : memref<9x128x128xbf16, #tpu.memory_space<vmem>>, vector<1x128x128xbf16>
    %255 = vector.shape_cast %254 : vector<1x128x128xbf16> to vector<128x128xbf16>
    %cst_213 = arith.constant dense<0.000000e+00> : vector<128x128xf32>
    %256 = tpu.matmul %253, %255, %cst_213 {dimension_numbers = #tpu.dot_dimension_numbers<[1], [0], [0], [1], [0, 0, 1, 1], [], []>} : vector<128x128xbf16>, vector<128x128xbf16>, vector<128x128xf32> -> vector<128x128xf32>
    %257 = arith.addf %251, %256 : vector<128x128xf32>
    %258 = vector.extract_strided_slice %245 {offsets = [2, 0, 0], sizes = [8, 16, 128], strides = [1, 1, 1]} : vector<10x16x128xbf16> to vector<8x16x128xbf16>
    %259 = vector.shape_cast %258 : vector<8x16x128xbf16> to vector<128x128xbf16>
    %c7_214 = arith.constant 7 : index
    %c0_215 = arith.constant 0 : index
    %c0_216 = arith.constant 0 : index
    %260 = vector.load %arg6[%c7_214, %c0_215, %c0_216] : memref<9x128x128xbf16, #tpu.memory_space<vmem>>, vector<1x128x128xbf16>
    %261 = vector.shape_cast %260 : vector<1x128x128xbf16> to vector<128x128xbf16>
    %cst_217 = arith.constant dense<0.000000e+00> : vector<128x128xf32>
    %262 = tpu.matmul %259, %261, %cst_217 {dimension_numbers = #tpu.dot_dimension_numbers<[1], [0], [0], [1], [0, 0, 1, 1], [], []>} : vector<128x128xbf16>, vector<128x128xbf16>, vector<128x128xf32> -> vector<128x128xf32>
    %263 = arith.addf %257, %262 : vector<128x128xf32>
    %c8_218 = arith.constant 8 : index
    %c17_219 = arith.constant 17 : index
    %c0_220 = arith.constant 0 : index
    %264 = vector.load %arg10[%c8_218, %c17_219, %c0_220] : memref<18x48x128xbf16, #tpu.memory_space<vmem>>, vector<10x16x128xbf16>
    %265 = vector.extract_strided_slice %264 {offsets = [0, 0, 0], sizes = [8, 16, 128], strides = [1, 1, 1]} : vector<10x16x128xbf16> to vector<8x16x128xbf16>
    %266 = vector.shape_cast %265 : vector<8x16x128xbf16> to vector<128x128xbf16>
    %c2_221 = arith.constant 2 : index
    %c0_222 = arith.constant 0 : index
    %c0_223 = arith.constant 0 : index
    %267 = vector.load %arg6[%c2_221, %c0_222, %c0_223] : memref<9x128x128xbf16, #tpu.memory_space<vmem>>, vector<1x128x128xbf16>
    %268 = vector.shape_cast %267 : vector<1x128x128xbf16> to vector<128x128xbf16>
    %cst_224 = arith.constant dense<0.000000e+00> : vector<128x128xf32>
    %269 = tpu.matmul %266, %268, %cst_224 {dimension_numbers = #tpu.dot_dimension_numbers<[1], [0], [0], [1], [0, 0, 1, 1], [], []>} : vector<128x128xbf16>, vector<128x128xbf16>, vector<128x128xf32> -> vector<128x128xf32>
    %270 = arith.addf %263, %269 : vector<128x128xf32>
    %271 = vector.extract_strided_slice %264 {offsets = [1, 0, 0], sizes = [8, 16, 128], strides = [1, 1, 1]} : vector<10x16x128xbf16> to vector<8x16x128xbf16>
    %272 = vector.shape_cast %271 : vector<8x16x128xbf16> to vector<128x128xbf16>
    %c5_225 = arith.constant 5 : index
    %c0_226 = arith.constant 0 : index
    %c0_227 = arith.constant 0 : index
    %273 = vector.load %arg6[%c5_225, %c0_226, %c0_227] : memref<9x128x128xbf16, #tpu.memory_space<vmem>>, vector<1x128x128xbf16>
    %274 = vector.shape_cast %273 : vector<1x128x128xbf16> to vector<128x128xbf16>
    %cst_228 = arith.constant dense<0.000000e+00> : vector<128x128xf32>
    %275 = tpu.matmul %272, %274, %cst_228 {dimension_numbers = #tpu.dot_dimension_numbers<[1], [0], [0], [1], [0, 0, 1, 1], [], []>} : vector<128x128xbf16>, vector<128x128xbf16>, vector<128x128xf32> -> vector<128x128xf32>
    %276 = arith.addf %270, %275 : vector<128x128xf32>
    %277 = vector.extract_strided_slice %264 {offsets = [2, 0, 0], sizes = [8, 16, 128], strides = [1, 1, 1]} : vector<10x16x128xbf16> to vector<8x16x128xbf16>
    %278 = vector.shape_cast %277 : vector<8x16x128xbf16> to vector<128x128xbf16>
    %c8_229 = arith.constant 8 : index
    %c0_230 = arith.constant 0 : index
    %c0_231 = arith.constant 0 : index
    %279 = vector.load %arg6[%c8_229, %c0_230, %c0_231] : memref<9x128x128xbf16, #tpu.memory_space<vmem>>, vector<1x128x128xbf16>
    %280 = vector.shape_cast %279 : vector<1x128x128xbf16> to vector<128x128xbf16>
    %cst_232 = arith.constant dense<0.000000e+00> : vector<128x128xf32>
    %281 = tpu.matmul %278, %280, %cst_232 {dimension_numbers = #tpu.dot_dimension_numbers<[1], [0], [0], [1], [0, 0, 1, 1], [], []>} : vector<128x128xbf16>, vector<128x128xbf16>, vector<128x128xf32> -> vector<128x128xf32>
    %282 = arith.addf %276, %281 : vector<128x128xf32>
    %c0_233 = arith.constant 0 : index
    %c0_234 = arith.constant 0 : index
    %283 = vector.load %arg7[%c0_233, %c0_234] : memref<1x128xf32, #tpu.memory_space<vmem>>, vector<1x128xf32>
    %284 = vector.broadcast %283 : vector<1x128xf32> to vector<128x128xf32>
    %285 = arith.addf %282, %284 : vector<128x128xf32>
    %286 = arith.truncf %285 : vector<128x128xf32> to vector<128x128xbf16>
    %c0_235 = arith.constant 0 : index
    %c128_236 = arith.constant 128 : index
    %c0_237 = arith.constant 0 : index
    %287 = vector.load %arg8[%c0_235, %c128_236, %c0_237] : memref<1x256x128xbf16, #tpu.memory_space<vmem>>, vector<1x128x128xbf16>
    %288 = vector.shape_cast %287 : vector<1x128x128xbf16> to vector<128x128xbf16>
    %289 = vector.shape_cast %286 : vector<128x128xbf16> to vector<1x128x128xbf16>
    tpu.vector_store %arg8[%c0_235, %c128_236, %c0_237], %289 {strides = array<i32>} : memref<1x256x128xbf16, #tpu.memory_space<vmem>>, vector<1x128x128xbf16>,
    return
  }
  func.func @transform_0(%arg0: i32) -> (i32, i32, i32) {
    %c0_i32 = arith.constant 0 : i32
    %c0_i32_0 = arith.constant 0 : i32
    %c0_i32_1 = arith.constant 0 : i32
    return %arg0, %c0_i32, %c0_i32_0 : i32, i32, i32
  }
  func.func @transform_1(%arg0: i32) -> (i32, i32) {
    %c0_i32 = arith.constant 0 : i32
    %c0_i32_0 = arith.constant 0 : i32
    %c0_i32_1 = arith.constant 0 : i32
    return %c0_i32, %c0_i32_0 : i32, i32
  }
  func.func @transform_2(%arg0: i32) -> (i32, i32) {
    %c0_i32 = arith.constant 0 : i32
    %c0_i32_0 = arith.constant 0 : i32
    %c0_i32_1 = arith.constant 0 : i32
    return %c0_i32, %c0_i32_0 : i32, i32
  }
  func.func @transform_3(%arg0: i32) -> (i32, i32, i32) {
    %c0_i32 = arith.constant 0 : i32
    %c0_i32_0 = arith.constant 0 : i32
    %c0_i32_1 = arith.constant 0 : i32
    %c0_i32_2 = arith.constant 0 : i32
    return %c0_i32, %c0_i32_0, %c0_i32_1 : i32, i32, i32
  }
  func.func @transform_4(%arg0: i32) -> (i32, i32) {
    %c0_i32 = arith.constant 0 : i32
    %c0_i32_0 = arith.constant 0 : i32
    %c0_i32_1 = arith.constant 0 : i32
    return %c0_i32, %c0_i32_0 : i32, i32
  }
  func.func @transform_5(%arg0: i32) -> (i32, i32, i32) {
    %c0_i32 = arith.constant 0 : i32
    %c0_i32_0 = arith.constant 0 : i32
    %c0_i32_1 = arith.constant 0 : i32
    %c0_i32_2 = arith.constant 0 : i32
    return %c0_i32, %c0_i32_0, %c0_i32_1 : i32, i32, i32
  }
  func.func @transform_6(%arg0: i32) -> (i32, i32) {
    %c0_i32 = arith.constant 0 : i32
    %c0_i32_0 = arith.constant 0 : i32
    %c0_i32_1 = arith.constant 0 : i32
    return %c0_i32, %c0_i32_0 : i32, i32
  }
  func.func @transform_7(%arg0: i32) -> (i32, i32, i32) {
    %c0_i32 = arith.constant 0 : i32
    %c0_i32_0 = arith.constant 0 : i32
    %c0_i32_1 = arith.constant 0 : i32
    return %arg0, %c0_i32, %c0_i32_0 : i32, i32, i32
  }
}

</mosaic_0001>

<bundles_post_ra>
// kernel: diffusion_forward.1
= control target key start
LH: loop header
LB: loop body
LE: loop exit
PB: predicated region body
PF: predicated region fallthrough
CT: control target
= control target key end

     0   :  { %s12463_s24 = smov 0   ;;  %s14479_s0 = inlined_call_operand.vmem [shape: bf16[2,256,128], index: 0, kind: input, shape index: {}]   ;;  %s14480_s1 = inlined_call_operand.vmem [shape: bf16[128,128], index: 1, kind: input, shape index: {}]   ;;  %s14481_s2 = inlined_call_operand.vmem [shape: f32[1,128], index: 2, kind: input, shape index: {}]   ;;  %s14482_s3 = inlined_call_operand.vmem [shape: bf16[9,128,128], index: 3, kind: input, shape index: {}]   ;;  %s14483_s4 = inlined_call_operand.vmem [shape: f32[1,128], index: 4, kind: input, shape index: {}]   ;;  %s14484_s5 = inlined_call_operand.vmem [shape: bf16[9,128,128], index: 5, kind: input, shape index: {}]   ;;  %s14485_s6 = inlined_call_operand.vmem [shape: f32[1,128], index: 6, kind: input, shape index: {}]   ;;  %s14486_s7 = inlined_call_operand.vmem [shape: bf16[2,256,128], index: 7, kind: output, shape index: {}]  }
   0x1 LB: > { %s8725_s25 = sadd.s32 4294967295, %s12420_s24   ;;  %p8729_p0 = scmp.ge.s32.totalorder %s12420_s24, 1  ;;  %s12420_s24 = sphi %s12463_s24, %s17_s24  }
   0x2   : > { %p237_p1 = scmp.lt.s32.totalorder %s12420_s24, 3 }
   0x4   : > { %p238_p2 = pnand %p8729_p0, %p237_p1 }
   0x5   : > { %v12080_v0 = vld [vmem:[%s14480_s1] sm:$0xff] (!%p238_p2)   ;;  %v12082_v2 = vld [vmem:[%s14480_s1 + $0x8] sm:$0xff] (!%p238_p2)   ;;  %p269_p3 = scmp.lt.s32.totalorder (!%p238_p2), %s8725_s25, 1  ;;  %v12084_v4 = vld [vmem:[%s14480_s1 + $0x10] sm:$0xff] (!%p238_p2)   ;;  %v12422_v42 = vmov (!%p238_p2), 0  }
   0x6   : > { %241 = sbr.rel (%p238_p2) target bundleno = 1274 (0x4fa), region = 48  ;;  %v12081_v1 = vld [vmem:[%s14480_s1] sm:$0xff] (!%p238_p2)   ;;  %10343 = vmatprep.subr.bf16.mxu0 (!%p238_p2), %v12080_v0  ;;  %v12083_v3 = vld [vmem:[%s14480_s1 + $0x8] sm:$0xff] (!%p238_p2)   ;;  %v12085_v5 = vld [vmem:[%s14480_s1 + $0x10] sm:$0xff] (!%p238_p2)   ;;  %281 = vst [vmem:[#allocation2 + $0x18] sm:$0xff] (!%p238_p2), %v12422_v42 }
   0x7   : > { %10375 = vmatprep.subr.bf16.mxu1 (!%p238_p2), %v12081_v1  ;;  %10344 = vmatpush3.bf16.msra.mxu0 (!%p238_p2), %v12080_v0  ;;  %v12086_v6 = vld [vmem:[%s14480_s1 + $0x18] sm:$0xff] (!%p238_p2)   ;;  %v12088_v8 = vld [vmem:[%s14480_s1 + $0x20] sm:$0xff] (!%p238_p2)   ;;  %v12090_v10 = vld [vmem:[%s14480_s1 + $0x28] sm:$0xff] (!%p238_p2)   ;;  %280 = vst [vmem:[#allocation2] sm:$0xff] (!%p238_p2), %v12422_v42  ;;  %vm908_vm0 = vsmask.f32 (!%p238_p2), 256 }
   0x8   : > { %10376 = vmatpush3.bf16.msra.mxu1 (!%p238_p2), %v12081_v1  ;;  %10345 = vmatprep.subr.bf16.mxu0 (!%p238_p2), %v12082_v2  ;;  %v12087_v7 = vld [vmem:[%s14480_s1 + $0x18] sm:$0xff] (!%p238_p2)   ;;  %v12089_v9 = vld [vmem:[%s14480_s1 + $0x20] sm:$0xff] (!%p238_p2)   ;;  %v12091_v11 = vld [vmem:[%s14480_s1 + $0x28] sm:$0xff] (!%p238_p2)   ;;  %282 = vst [vmem:[#allocation2 + $0x30] sm:$0xff] (!%p238_p2), %v12422_v42  ;;  %vm2094_vm1 = vsmask.f32 (!%p238_p2), 7424 }
   0x9   : > { %10377 = vmatprep.subr.bf16.mxu1 (!%p238_p2), %v12083_v3  ;;  %v12092_v14 = vld [vmem:[%s14480_s1 + $0x30] sm:$0xff] (!%p238_p2)   ;;  %v12094_v16 = vld [vmem:[%s14480_s1 + $0x38] sm:$0xff] (!%p238_p2)   ;;  %v12112_v22 = vld [vmem:[%s14482_s3 + $0xc0] sm:$0xff] (!%p238_p2)   ;;  %283 = vst [vmem:[#allocation2 + $0x48] sm:$0xff] (!%p238_p2), %v12422_v42 }
   0xa   : > { %v12093_v15 = vld [vmem:[%s14480_s1 + $0x30] sm:$0xff] (!%p238_p2)   ;;  %v12095_v17 = vld [vmem:[%s14480_s1 + $0x38] sm:$0xff] (!%p238_p2)   ;;  %v12113_v23 = vld [vmem:[%s14482_s3 + $0xc0] sm:$0xff] (!%p238_p2)   ;;  %284 = vst [vmem:[#allocation2 + $0x60] sm:$0xff] (!%p238_p2), %v12422_v42 }
   0xb   : > { %10346 = vmatpush3.bf16.msra.mxu0 (!%p238_p2), %v12082_v2  ;;  %v12114_v24 = vld [vmem:[%s14482_s3 + $0xc8] sm:$0xff] (!%p238_p2)   ;;  %v12116_v36 = vld [vmem:[%s14482_s3 + $0xd0] sm:$0xff] (!%p238_p2)   ;;  %v12118_v38 = vld [vmem:[%s14482_s3 + $0xd8] sm:$0xff] (!%p238_p2)   ;;  %285 = vst [vmem:[#allocation2 + $0x78] sm:$0xff] (!%p238_p2), %v12422_v42 }
   0xc   : > { %10378 = vmatpush3.bf16.msra.mxu1 (!%p238_p2), %v12083_v3  ;;  %10347 = vmatprep.subr.bf16.mxu0 (!%p238_p2), %v12084_v4  ;;  %v12115_v25 = vld [vmem:[%s14482_s3 + $0xc8] sm:$0xff] (!%p238_p2)   ;;  %v12117_v37 = vld [vmem:[%s14482_s3 + $0xd0] sm:$0xff] (!%p238_p2)   ;;  %v12119_v39 = vld [vmem:[%s14482_s3 + $0xd8] sm:$0xff] (!%p238_p2)   ;;  %286 = vst [vmem:[#allocation2 + $0x90] sm:$0xff] (!%p238_p2), %v12422_v42 }
   0xd   : > { %s14488_s25 = smov (!%p269_p3, %s8725_s25), 1  ;;  %10379 = vmatprep.subr.bf16.mxu1 %v12085_v5  ;;  %v12120_v40 = vld [vmem:[%s14482_s3 + $0xe0] sm:$0xff]   ;;  %287 = vst [vmem:[#allocation2 + $0xa8] sm:$0xff] %v12422_v42  ;;  %288 = vst [vmem:[#allocation2 + $0xc0] sm:$0xff] %v12422_v42  ;;  %v12122_v43 = vld [vmem:[%s14482_s3 + $0xe8] sm:$0xff]  }
   0xe   : > { %s9606_s19 = sshll.u32 %s14488_s25, 7  ;;  %v12121_v41 = vld [vmem:[%s14482_s3 + $0xe0] sm:$0xff]   ;;  %289 = vst [vmem:[#allocation2 + $0xd8] sm:$0xff] %v12422_v42  ;;  %290 = vst [vmem:[#allocation2 + $0xf0] sm:$0xff] %v12422_v42  ;;  %v12123_v44 = vld [vmem:[%s14482_s3 + $0xe8] sm:$0xff]  }
   0xf   : > { %10348 = vmatpush3.bf16.msra.mxu0 %v12084_v4  ;;  %s12509_s28 = scalar_lea.vmem %s14479_s0, %s9606_s19  ;;  %291 = vst [vmem:[#allocation2 + $0x108] sm:$0xff] %v12422_v42  ;;  %292 = vst [vmem:[#allocation2 + $0x120] sm:$0xff] %v12422_v42  ;;  %v12124_v45 = vld [vmem:[%s14482_s3 + $0xf0] sm:$0xff]   ;;  %v12126_v47 = vld [vmem:[%s14482_s3 + $0xf8] sm:$0xff]   ;;  %s14429_s23 = scalar_lea.vmem %s14486_s7, %s9606_s19 }
  0x10   : > { %10380 = vmatpush3.bf16.msra.mxu1 %v12085_v5  ;;  %10349 = vmatprep.subr.bf16.mxu0 %v12086_v6  ;;  %v12096_v12 = vld [vmem:[%s12509_s28] sm:$0xff]   ;;  %v12098_v18 = vld [vmem:[%s12509_s28 + $0x8] sm:$0xff]   ;;  %v12100_v20 = vld [vmem:[%s12509_s28 + $0x10] sm:$0xff]   ;;  %293 = vst [vmem:[#allocation2 + $0x138] sm:$0xff] %v12422_v42 }
  0x11   : > { %10381 = vmatprep.subr.bf16.mxu1 %v12087_v7  ;;  %v12097_v13 = vld [vmem:[%s12509_s28 + $0x40] sm:$0xff]   ;;  %10359 = vmatprep.mubr.bf16.mxu0 %v12096_v12  ;;  %v12099_v19 = vld [vmem:[%s12509_s28 + $0x48] sm:$0xff]   ;;  %v12101_v21 = vld [vmem:[%s12509_s28 + $0x50] sm:$0xff]   ;;  %294 = vst [vmem:[#allocation2 + $0x150] sm:$0xff] %v12422_v42 }
  0x12   : > { %10391 = vmatprep.mubr.bf16.mxu1 %v12097_v13  ;;  %v12102_v26 = vld [vmem:[%s12509_s28 + $0x18] sm:$0xff]   ;;  %v12104_v28 = vld [vmem:[%s12509_s28 + $0x20] sm:$0xff]   ;;  %v12106_v30 = vld [vmem:[%s12509_s28 + $0x28] sm:$0xff]   ;;  %295 = vst [vmem:[#allocation2 + $0x168] sm:$0xff] %v12422_v42 }
  0x13   : > { %10350 = vmatpush3.bf16.msra.mxu0 %v12086_v6  ;;  %v12103_v27 = vld [vmem:[%s12509_s28 + $0x58] sm:$0xff]   ;;  %v12105_v29 = vld [vmem:[%s12509_s28 + $0x60] sm:$0xff]   ;;  %v12107_v31 = vld [vmem:[%s12509_s28 + $0x68] sm:$0xff]   ;;  %296 = vst [vmem:[#allocation2 + $0x180] sm:$0xff] %v12422_v42 }
  0x14   : > { %10382 = vmatpush3.bf16.msra.mxu1 %v12087_v7  ;;  %10351 = vmatprep.subr.bf16.mxu0 %v12088_v8  ;;  %v12108_v32 = vld [vmem:[%s12509_s28 + $0x30] sm:$0xff]   ;;  %v12110_v34 = vld [vmem:[%s12509_s28 + $0x38] sm:$0xff]   ;;  %297 = vst [vmem:[#allocation2 + $0x198] sm:$0xff] %v12422_v42  ;;  %298 = vst [vmem:[#allocation2 + $0x10] sm:$0xff] %v12422_v42 }
  0x15   : > { %10383 = vmatprep.subr.bf16.mxu1 %v12089_v9  ;;  %v12109_v33 = vld [vmem:[%s12509_s28 + $0x70] sm:$0xff]   ;;  %v12111_v35 = vld [vmem:[%s12509_s28 + $0x78] sm:$0xff]   ;;  %299 = vst [vmem:[#allocation2 + $0x28] sm:$0xff] %v12422_v42  ;;  %300 = vst [vmem:[#allocation2 + $0x40] sm:$0xff] %v12422_v42 }
  0x16   : > { %301 = vst [vmem:[#allocation2 + $0x58] sm:$0xff] %v12422_v42  ;;  %302 = vst [vmem:[#allocation2 + $0x70] sm:$0xff] %v12422_v42  ;;  %v12125_v46 = vld [vmem:[%s14482_s3 + $0xf0] sm:$0xff]   ;;  %v12127_v48 = vld [vmem:[%s14482_s3 + $0xf8] sm:$0xff]  }
  0x17   : > { %10352 = vmatpush3.bf16.msra.mxu0 %v12088_v8  ;;  %303 = vst [vmem:[#allocation2 + $0x88] sm:$0xff] %v12422_v42  ;;  %304 = vst [vmem:[#allocation2 + $0xa0] sm:$0xff] %v12422_v42  ;;  %v12668_v49 = vld [vmem:[%s14482_s3] sm:$0xff]   ;;  %v890_v51 = vld [vmem:[#allocation2 + $0x18] sm:$0x80] }
  0x18   : > { %10384 = vmatpush3.bf16.msra.mxu1 %v12089_v9  ;;  %10353 = vmatprep.subr.bf16.mxu0 %v12090_v10  ;;  %305 = vst [vmem:[#allocation2 + $0xb8] sm:$0xff] %v12422_v42  ;;  %306 = vst [vmem:[#allocation2 + $0xd0] sm:$0xff] %v12422_v42  ;;  %v12674_v50 = vld [vmem:[%s14482_s3] sm:$0xff]   ;;  %v922_v52 = vshrl.u32 %v890_v51, 16  ;;  %v2818_v53 = vld [vmem:[#allocation2 + $0xd8] sm:$0x80] }
  0x19   : > { %10385 = vmatprep.subr.bf16.mxu1 %v12091_v11  ;;  %307 = vst [vmem:[#allocation2 + $0xe8] sm:$0xff] %v12422_v42  ;;  %308 = vst [vmem:[#allocation2 + $0x100] sm:$0xff] %v12422_v42  ;;  %v2849_v55 = vshrl.u32 %v2818_v53, 16  ;;  %v892_v56 = vld [vmem:[#allocation2 + $0x30] sm:$0x80] }
  0x1a   : > { %309 = vst [vmem:[#allocation2 + $0x118] sm:$0xff] %v12422_v42  ;;  %310 = vst [vmem:[#allocation2 + $0x130] sm:$0xff] %v12422_v42  ;;  %v12677_v54 = vrot.slane %v922_v52, 7  ;;  %v2820_v57 = vld [vmem:[#allocation2 + $0xf0] sm:$0x80]  ;;  %v934_v59 = vshrl.u32 %v892_v56, 16 }
  0x1b   : > { %10354 = vmatpush3.bf16.msra.mxu0 %v12090_v10  ;;  %311 = vst [vmem:[#allocation2 + $0x148] sm:$0xff] %v12422_v42  ;;  %312 = vst [vmem:[#allocation2 + $0x160] sm:$0xff] %v12422_v42  ;;  %v12679_v58 = vrot.slane %v2849_v55, 7  ;;  %v896_v60 = vld [vmem:[#allocation2 + $0x60] sm:$0x80]  ;;  %v2861_v62 = vshrl.u32 %v2820_v57, 16 }
  0x1c   : > { %10386 = vmatpush3.bf16.msra.mxu1 %v12091_v11  ;;  %10355 = vmatprep.subr.bf16.mxu0 %v12092_v14  ;;  %313 = vst [vmem:[#allocation2 + $0x178] sm:$0xff] %v12422_v42  ;;  %314 = vst [vmem:[#allocation2 + $0x190] sm:$0xff] %v12422_v42  ;;  %v894_v61 = vld [vmem:[#allocation2 + $0x48] sm:$0x80]  ;;  %v958_v0 = vshrl.u32 %v896_v60, 16  ;;  %v12681_v4 = vrot.slane %v934_v59, 7 }
  0x1d   : > { %10387 = vmatprep.subr.bf16.mxu1 %v12093_v15  ;;  %315 = vst [vmem:[#allocation2 + $0x1a8] sm:$0xff] %v12422_v42  ;;  %319 = vst [vmem:[#allocation3] sm:$0xff] %v12422_v42  ;;  %v2822_v63 = vld [vmem:[#allocation2 + $0x108] sm:$0x80]  ;;  %v946_v1 = vshrl.u32 %v894_v61, 16  ;;  %v12683_v5 = vrot.slane %v2861_v62, 7 }
  0x1e   : > { %320 = vst [vmem:[#allocation3 + $0x18] sm:$0xff] %v12422_v42  ;;  %321 = vst [vmem:[#allocation3 + $0x30] sm:$0xff] %v12422_v42  ;;  %v2873_v2 = vshrl.u32 %v2822_v63, 16  ;;  %v2824_v3 = vld [vmem:[#allocation2 + $0x120] sm:$0x80]  ;;  %v12685_v6 = vrot.slane %v958_v0, 7 }
  0x1f   : > { %10356 = vmatpush3.bf16.msra.mxu0 %v12092_v14  ;;  %322 = vst [vmem:[#allocation3 + $0x48] sm:$0xff] %v12422_v42  ;;  %323 = vst [vmem:[#allocation3 + $0x60] sm:$0xff] %v12422_v42  ;;  %v2885_v7 = vshrl.u32 %v2824_v3, 16  ;;  %v12687_v8 = vrot.slane %v946_v1, 7  ;;  %v898_v10 = vld [vmem:[#allocation2 + $0x78] sm:$0x80] }
  0x20   : > { %10388 = vmatpush3.bf16.msra.mxu1 %v12093_v15  ;;  %10357 = vmatprep.subr.bf16.mxu0 %v12094_v16  ;;  %324 = vst [vmem:[#allocation3 + $0x78] sm:$0xff] %v12422_v42  ;;  %325 = vst [vmem:[#allocation3 + $0x90] sm:$0xff] %v12422_v42  ;;  %v12689_v9 = vrot.slane %v2873_v2, 7  ;;  %v2826_v11 = vld [vmem:[#allocation2 + $0x138] sm:$0x80]  ;;  %v970_v14 = vshrl.u32 %v898_v10, 16 }
  0x21   : > { %10389 = vmatprep.subr.bf16.mxu1 %v12095_v17  ;;  %326 = vst [vmem:[#allocation3 + $0xa8] sm:$0xff] %v12422_v42  ;;  %327 = vst [vmem:[#allocation3 + $0xc0] sm:$0xff] %v12422_v42  ;;  %v900_v12 = vld [vmem:[#allocation2 + $0x90] sm:$0x80]  ;;  %v2897_v15 = vshrl.u32 %v2826_v11, 16 }
  0x22   : > { %328 = vst [vmem:[#allocation3 + $0xd8] sm:$0xff] %v12422_v42  ;;  %329 = vst [vmem:[#allocation3 + $0xf0] sm:$0xff] %v12422_v42  ;;  %v2828_v13 = vld [vmem:[#allocation2 + $0x150] sm:$0x80] }
  0x23   : > { %10358 = vmatpush3.bf16.msra.mxu0 %v12094_v16  ;;  %330 = vst [vmem:[#allocation3 + $0x108] sm:$0xff] %v12422_v42  ;;  %331 = vst [vmem:[#allocation3 + $0x120] sm:$0xff] %v12422_v42  ;;  %v982_v16 = vshrl.u32 %v900_v12, 16 }
  0x24   : > { %10390 = vmatpush3.bf16.msra.mxu1 %v12095_v17  ;;  %10407 = vmatprep.subr.bf16.mxu0 %v12112_v22  ;;  %332 = vst [vmem:[#allocation3 + $0x138] sm:$0xff] %v12422_v42  ;;  %333 = vst [vmem:[#allocation3 + $0x150] sm:$0xff] %v12422_v42  ;;  %v2909_v17 = vshrl.u32 %v2828_v13, 16 }
  0x25   : > { %10695 = vmatprep.subr.bf16.mxu1 %v12113_v23  ;;  %334 = vst [vmem:[#allocation3 + $0x168] sm:$0xff] %v12422_v42  ;;  %335 = vst [vmem:[#allocation3 + $0x180] sm:$0xff] %v12422_v42 }
  0x26   : > { %10360 = vmatmul.mubr.bf16.vlgmr.msra.gmra.mrb[0].mxu0 %v12098_v18  ;;  %336 = vst [vmem:[#allocation3 + $0x198] sm:$0xff] %v12422_v42  ;;  %337 = vst [vmem:[#allocation3 + $0x10] sm:$0xff] %v12422_v42  ;;  %v12694_v18 = vld [vmem:[%s14481_s2] ss:$0 sm:$0xff] }
  0x27   : > { %10392 = vmatmul.mubr.bf16.vlgmr.msra.gmra.mrb[0].mxu1 %v12099_v19  ;;  %10363 = vmatprep.mubr.bf16.mxu0 %v12100_v20  ;;  %338 = vst [vmem:[#allocation3 + $0x28] sm:$0xff] %v12422_v42  ;;  %339 = vst [vmem:[#allocation3 + $0x40] sm:$0xff] %v12422_v42  ;;  %v12696_v19 = vrot.slane %v2885_v7, 7  ;;  %v12698_v20 = vrot.slane %v970_v14, 7 }
  0x28   : > { %10395 = vmatprep.mubr.bf16.mxu1 %v12101_v21  ;;  %10408 = vmatpush3.bf16.msra.mxu0 %v12112_v22  ;;  %340 = vst [vmem:[#allocation3 + $0x58] sm:$0xff] %v12422_v42  ;;  %341 = vst [vmem:[#allocation3 + $0x70] sm:$0xff] %v12422_v42  ;;  %v12700_v21 = vrot.slane %v2897_v15, 7  ;;  %v12702_v22 = vrot.slane %v982_v16, 7 }
  0x29   : > { %10696 = vmatpush3.bf16.msra.mxu1 %v12113_v23  ;;  %10409 = vmatprep.subr.bf16.mxu0 %v12114_v24  ;;  %342 = vst [vmem:[#allocation3 + $0x88] sm:$0xff] %v12422_v42  ;;  %343 = vst [vmem:[#allocation3 + $0xa0] sm:$0xff] %v12422_v42 }
  0x2a   : > { %10697 = vmatprep.subr.bf16.mxu1 %v12115_v25  ;;  %344 = vst [vmem:[#allocation3 + $0xb8] sm:$0xff] %v12422_v42  ;;  %345 = vst [vmem:[#allocation3 + $0xd0] sm:$0xff] %v12422_v42 }
  0x2b   : > { %346 = vst [vmem:[#allocation3 + $0xe8] sm:$0xff] %v12422_v42  ;;  %347 = vst [vmem:[#allocation3 + $0x100] sm:$0xff] %v12422_v42 }
  0x2c   : > { %10410 = vmatpush3.bf16.msra.mxu0 %v12114_v24  ;;  %348 = vst [vmem:[#allocation3 + $0x118] sm:$0xff] %v12422_v42  ;;  %349 = vst [vmem:[#allocation3 + $0x130] sm:$0xff] %v12422_v42  ;;  %v12704_v24 = vrot.slane %v2909_v17, 7 }
  0x2d   : > { %10698 = vmatpush3.bf16.msra.mxu1 %v12115_v25  ;;  %10411 = vmatprep.subr.bf16.mxu0 %v12116_v36  ;;  %350 = vst [vmem:[#allocation3 + $0x148] sm:$0xff] %v12422_v42  ;;  %351 = vst [vmem:[#allocation3 + $0x160] sm:$0xff] %v12422_v42 }
  0x2e   : > { %10364 = vmatmul.mubr.bf16.gmra.mrb[4].mxu0 %v12102_v26  ;;  %10699 = vmatprep.subr.bf16.mxu1 %v12117_v37  ;;  %352 = vst [vmem:[#allocation3 + $0x178] sm:$0xff] %v12422_v42  ;;  %353 = vst [vmem:[#allocation3 + $0x190] sm:$0xff] %v12422_v42 }
  0x2f   : > { %10396 = vmatmul.mubr.bf16.gmra.mrb[4].mxu1 %v12103_v27  ;;  %10367 = vmatprep.mubr.bf16.mxu0 %v12104_v28  ;;  %354 = vst [vmem:[#allocation3 + $0x1a8] sm:$0xff] %v12422_v42 }
  0x30   : > { %10399 = vmatprep.mubr.bf16.mxu1 %v12105_v29  ;;  %10412 = vmatpush3.bf16.msra.mxu0 %v12116_v36  ;;  %v12711_v36 = vld [vmem:[#allocation2 + $0xa8] sm:$0x80] }
  0x31   : > { %10700 = vmatpush3.bf16.msra.mxu1 %v12117_v37  ;;  %10413 = vmatprep.subr.bf16.mxu0 %v12118_v38  ;;  %v12713_v37 = vld [vmem:[#allocation2 + $0x168] sm:$0x80]  ;;  %v994_v53 = vshrl.u32 %v12711_v36, 16 }
  0x32   : > { %10701 = vmatprep.subr.bf16.mxu1 %v12119_v39  ;;  %v2921_v59 = vshrl.u32 %v12713_v37, 16  ;;  %v12142_v37 = vld [vmem:[%s14482_s3 + $0x38] sm:$0xff]  }
  0x34   : > { %10414 = vmatpush3.bf16.msra.mxu0 %v12118_v38 }
  0x35   : > { %10702 = vmatpush3.bf16.msra.mxu1 %v12119_v39  ;;  %10415 = vmatprep.subr.bf16.mxu0 %v12120_v40 }
  0x36   : > { %10368 = vmatmul.mubr.bf16.gmra.mrb[8].mxu0 %v12106_v30  ;;  %10703 = vmatprep.subr.bf16.mxu1 %v12121_v41 }
  0x37   : > { %10400 = vmatmul.mubr.bf16.gmra.mrb[8].mxu1 %v12107_v31  ;;  %10371 = vmatprep.mubr.bf16.mxu0 %v12108_v32 }
  0x38   : > { %10403 = vmatprep.mubr.bf16.mxu1 %v12109_v33  ;;  %10416 = vmatpush3.bf16.msra.mxu0 %v12120_v40 }
  0x39   : > { %10704 = vmatpush3.bf16.msra.mxu1 %v12121_v41  ;;  %10417 = vmatprep.subr.bf16.mxu0 %v12122_v43 }
  0x3a   : > { %10705 = vmatprep.subr.bf16.mxu1 %v12123_v44 }
  0x3c   : > { %10418 = vmatpush3.bf16.msra.mxu0 %v12122_v43 }
  0x3d   : > { %10706 = vmatpush3.bf16.msra.mxu1 %v12123_v44  ;;  %10419 = vmatprep.subr.bf16.mxu0 %v12124_v45 }
  0x3e   : > { %10372 = vmatmul.mubr.bf16.gmra.mrb[12].mxu0 %v12110_v34  ;;  %10707 = vmatprep.subr.bf16.mxu1 %v12125_v46 }
  0x3f   : > { %10404 = vmatmul.mubr.bf16.gmra.mrb[12].mxu1 %v12111_v35 }
  0x40   : > { %10420 = vmatpush3.bf16.msra.mxu0 %v12124_v45 }
  0x41   : > { %10708 = vmatpush3.bf16.msra.mxu1 %v12125_v46  ;;  %10421 = vmatprep.subr.bf16.mxu0 %v12126_v47 }
  0x42   : > { %10709 = vmatprep.subr.bf16.mxu1 %v12127_v48 }
  0x44   : > { %10422 = vmatpush3.bf16.msra.mxu0 %v12126_v47 }
  0x45   : > { %10710 = vmatpush3.bf16.msra.mxu1 %v12127_v48  ;;  %10439 = vmatprep.subr.bf16.mxu0 %v12668_v49 }
  0x46   : > { %10727 = vmatprep.subr.bf16.mxu1 %v12674_v50 }
  0xf9   : > { %v10361_v23 = vpop.f32.mrb[0].mxu0 }
  0xfa   : > { %v536_v25 = vadd.f32 %v10361_v23, %v12694_v18  ;;  %v10393_v26 = vpop.f32.mrb[0].mxu1  ;;  %v527_v27 = vpop.f32.mrb[1].mxu0 }
  0xfb   : > { %v801_v28 = vadd.f32 %v10393_v26, %v12694_v18  ;;  %v528_v29 = vadd.f32 %v12694_v18, %v527_v27  ;;  %v792_v30 = vpop.f32.mrb[1].mxu1  ;;  %v10362_v31 = vpop.f32.mrb[2].mxu0 }
  0xfc   : > { %v793_v32 = vadd.f32 %v12694_v18, %v792_v30  ;;  %v539_v33 = vadd.f32 %v10362_v31, %v12694_v18  ;;  %v10394_v34 = vpop.f32.mrb[2].mxu1  ;;  %v530_v35 = vpop.f32.mrb[3].mxu0  ;;  %v592_v38 = vmax.f32 %v536_v25, 0.0 }
  0xfd   : > { %v857_v39 = vmax.f32 %v801_v28, 0.0  ;;  %v804_v40 = vadd.f32 %v10394_v34, %v12694_v18  ;;  %v531_v41 = vadd.f32 %v12694_v18, %v530_v35  ;;  %v795_v42 = vpop.f32.mrb[3].mxu1  ;;  %v590_v43 = vmax.f32 %v528_v29, 0.0 }
  0xfe   : > { %v593_v44 = vmax.f32 %v539_v33, 0.0  ;;  %v796_v45 = vadd.f32 %v12694_v18, %v795_v42  ;;  %v855_v48 = vmax.f32 %v793_v32, 0.0 }
  0xff   : > { %v858_v46 = vmax.f32 %v804_v40, 0.0  ;;  %v591_v47 = vmax.f32 %v531_v41, 0.0 }
 0x100   : > { %v12718_v51 = vpack.c.bf16 %v593_v44, %v592_v38  ;;  %v856_v52 = vmax.f32 %v796_v45, 0.0 }
 0x101   : > { %v12721_v55 = vpack.c.bf16 %v858_v46, %v857_v39  ;;  %v12723_v56 = vpack.c.bf16 %v591_v47, %v590_v43  ;;  %v10365_v57 = vpop.f32.mrb[4].mxu0 }
 0x102   : > { %616 = vst [vmem:[#allocation2 + $0x38] sm:$0xff] %v12718_v51  ;;  %v12727_v60 = vpack.c.bf16 %v856_v52, %v855_v48  ;;  %v552_v61 = vadd.f32 %v10365_v57, %v12694_v18  ;;  %v10397_v62 = vpop.f32.mrb[4].mxu1  ;;  %v543_v63 = vpop.f32.mrb[5].mxu0  ;;  %v938_v0 = vshrl.u32 %v12718_v51, 16  ;;  %v941_v1 = vshll.u32 %v12718_v51, 16 }
 0x103   : > { %881 = vst [vmem:[#allocation2 + $0xf8] sm:$0xff] %v12721_v55  ;;  %615 = vst [vmem:[#allocation2 + $0x20] sm:$0xff] %v12723_v56  ;;  %v817_v2 = vadd.f32 %v10397_v62, %v12694_v18  ;;  %v544_v3 = vadd.f32 %v12694_v18, %v543_v63  ;;  %v808_v7 = vpop.f32.mrb[5].mxu1  ;;  %v10366_v10 = vpop.f32.mrb[6].mxu0  ;;  %v926_v11 = vshrl.u32 %v12723_v56, 16  ;;  %v929_v12 = vshll.u32 %v12723_v56, 16 }
 0x104   : > { %880 = vst [vmem:[#allocation2 + $0xe0] sm:$0xff] %v12727_v60  ;;  %v596_v13 = vmax.f32 %v552_v61, 0.0  ;;  %v809_v14 = vadd.f32 %v12694_v18, %v808_v7  ;;  %v555_v15 = vadd.f32 %v10366_v10, %v12694_v18  ;;  %v10398_v16 = vpop.f32.mrb[6].mxu1  ;;  %v546_v17 = vpop.f32.mrb[7].mxu0  ;;  %v2853_v23 = vshrl.u32 %v12727_v60, 16 }
 0x105   : > { %v861_v25 = vmax.f32 %v817_v2, 0.0  ;;  %v594_v26 = vmax.f32 %v544_v3, 0.0  ;;  %v820_v27 = vadd.f32 %v10398_v16, %v12694_v18  ;;  %v547_v28 = vadd.f32 %v12694_v18, %v546_v17  ;;  %v811_v29 = vpop.f32.mrb[7].mxu1 }
 0x106   : > { %v859_v30 = vmax.f32 %v809_v14, 0.0  ;;  %v597_v31 = vmax.f32 %v555_v15, 0.0  ;;  %v812_v32 = vadd.f32 %v12694_v18, %v811_v29  ;;  %v928_v33 = vrot.slane %v926_v11, 7 }
 0x107   : > { %v862_v34 = vmax.f32 %v820_v27, 0.0  ;;  %v595_v35 = vmax.f32 %v547_v28, 0.0  ;;  %v2855_v38 = vrot.slane %v2853_v23, 7  ;;  %v2856_v39 = vshll.u32 %v12727_v60, 16 }
 0x108   : > { %v12746_v40 = vpack.c.bf16 %v597_v31, %v596_v13  ;;  %v860_v41 = vmax.f32 %v812_v32, 0.0  ;;  %v931_v42 = vor.u32 %v929_v12, %v928_v33  ;;  %v940_v43 = vrot.slane %v938_v0, 7 }
 0x109   : > { %v12748_v44 = vpack.c.bf16 %v862_v34, %v861_v25  ;;  %v12750_v45 = vpack.c.bf16 %v595_v35, %v594_v26  ;;  %v10369_v46 = vpop.f32.mrb[8].mxu0  ;;  %v2858_v47 = vor.u32 %v2856_v39, %v2855_v38  ;;  %v2865_v48 = vshrl.u32 %v12721_v55, 16 }
 0x10a   : > { %618 = vst [vmem:[#allocation2 + $0x68] sm:$0xff] %v12746_v40  ;;  %v12754_v52 = vpack.c.bf16 %v860_v41, %v859_v30  ;;  %v568_v57 = vadd.f32 %v10369_v46, %v12694_v18  ;;  %v10401_v61 = vpop.f32.mrb[8].mxu1  ;;  %v559_v62 = vpop.f32.mrb[9].mxu0  ;;  %v12759_v63 = vsel %vm908_vm0, %v12677_v54, %v931_v42  ;;  %v943_v0 = vor.u32 %v941_v1, %v940_v43  ;;  %v12130_v54 = vld [vmem:[%s14482_s3 + $0x8] sm:$0xff]  }
 0x10b   : > { %883 = vst [vmem:[#allocation2 + $0x128] sm:$0xff] %v12748_v44  ;;  %617 = vst [vmem:[#allocation2 + $0x50] sm:$0xff] %v12750_v45  ;;  %v833_v2 = vadd.f32 %v10401_v61, %v12694_v18  ;;  %v560_v3 = vadd.f32 %v12694_v18, %v559_v62  ;;  %v824_v7 = vpop.f32.mrb[9].mxu1  ;;  %v10370_v10 = vpop.f32.mrb[10].mxu0  ;;  %10423 = vmatprep.mubr.bf16.mxu0 %v12759_v63  ;;  %v12768_v11 = vsel %vm908_vm0, %v12679_v58, %v2858_v47  ;;  %v12131_v47 = vld [vmem:[%s14482_s3 + $0x8] sm:$0xff]  }
 0x10c   : > { %v2867_v12 = vrot.slane %v2865_v48, 7  ;;  %882 = vst [vmem:[#allocation2 + $0x110] sm:$0xff] %v12754_v52  ;;  %v600_v1 = vmax.f32 %v568_v57, 0.0  ;;  %v825_v13 = vadd.f32 %v12694_v18, %v824_v7  ;;  %v571_v14 = vadd.f32 %v10370_v10, %v12694_v18  ;;  %v10402_v15 = vpop.f32.mrb[10].mxu1  ;;  %v562_v16 = vpop.f32.mrb[11].mxu0  ;;  %10711 = vmatprep.mubr.bf16.mxu1 %v12768_v11 }
 0x10d   : > { %v12779_v58 = vsel %vm908_vm0, %v12681_v4, %v943_v0  ;;  %v865_v17 = vmax.f32 %v833_v2, 0.0  ;;  %v598_v23 = vmax.f32 %v560_v3, 0.0  ;;  %v836_v25 = vadd.f32 %v10402_v15, %v12694_v18  ;;  %v827_v27 = vpop.f32.mrb[11].mxu1  ;;  %v12132_v4 = vld [vmem:[%s14482_s3 + $0x10] sm:$0xff]  }
 0x10e   : > { %v563_v26 = vadd.f32 %v12694_v18, %v562_v16  ;;  %10424 = vmatmul.mubr.bf16.vlgmr.msra.gmra.mrb[16].mxu0 %v12779_v58  ;;  %v863_v28 = vmax.f32 %v825_v13, 0.0  ;;  %v601_v29 = vmax.f32 %v571_v14, 0.0  ;;  %v828_v30 = vadd.f32 %v12694_v18, %v827_v27 }
 0x10f   : > { %10440 = vmatpush3.bf16.msra.mxu0 %v12668_v49  ;;  %v2868_v31 = vshll.u32 %v12721_v55, 16  ;;  %v866_v32 = vmax.f32 %v836_v25, 0.0  ;;  %v950_v34 = vshrl.u32 %v12750_v45, 16  ;;  %v953_v35 = vshll.u32 %v12750_v45, 16 }
 0x110   : > { %v599_v33 = vmax.f32 %v563_v26, 0.0  ;;  %10441 = vmatprep.subr.bf16.mxu0 %v12130_v54  ;;  %v12792_v38 = vpack.c.bf16 %v601_v29, %v600_v1  ;;  %v864_v39 = vmax.f32 %v828_v30, 0.0  ;;  %v2877_v42 = vshrl.u32 %v12754_v52, 16 }
 0x111   : > { %v2870_v41 = vor.u32 %v2868_v31, %v2867_v12  ;;  %v12795_v49 = vpack.c.bf16 %v866_v32, %v865_v17  ;;  %v10373_v46 = vpop.f32.mrb[12].mxu0  ;;  %v952_v48 = vrot.slane %v950_v34, 7  ;;  %v2880_v57 = vshll.u32 %v12754_v52, 16  ;;  %v12133_v32 = vld [vmem:[%s14482_s3 + $0x10] sm:$0xff]  }
 0x112   : > { %v12797_v43 = vpack.c.bf16 %v599_v33, %v598_v23  ;;  %620 = vst [vmem:[#allocation2 + $0x98] sm:$0xff] %v12792_v38  ;;  %v12804_v61 = vpack.c.bf16 %v864_v39, %v863_v28  ;;  %v584_v62 = vadd.f32 %v10373_v46, %v12694_v18  ;;  %v10405_v0 = vpop.f32.mrb[12].mxu1  ;;  %v575_v2 = vpop.f32.mrb[13].mxu0  ;;  %v2879_v7 = vrot.slane %v2877_v42, 7 }
 0x113   : > { %v12809_v3 = vsel %vm908_vm0, %v12683_v5, %v2870_v41  ;;  %10442 = vmatpush3.bf16.msra.mxu0 %v12130_v54  ;;  %885 = vst [vmem:[#allocation2 + $0x158] sm:$0xff] %v12795_v49  ;;  %v849_v10 = vadd.f32 %v10405_v0, %v12694_v18  ;;  %v576_v12 = vadd.f32 %v12694_v18, %v575_v2  ;;  %v840_v1 = vpop.f32.mrb[13].mxu1  ;;  %v10374_v13 = vpop.f32.mrb[14].mxu0  ;;  %v962_v15 = vshrl.u32 %v12746_v40, 16  ;;  %v12134_v5 = vld [vmem:[%s14482_s3 + $0x18] sm:$0xff]  }
 0x114   : > { %619 = vst [vmem:[#allocation2 + $0x80] sm:$0xff] %v12797_v43  ;;  %10712 = vmatmul.mubr.bf16.vlgmr.msra.gmra.mrb[16].mxu1 %v12809_v3  ;;  %v955_v14 = vor.u32 %v953_v35, %v952_v48  ;;  %10443 = vmatprep.subr.bf16.mxu0 %v12132_v4  ;;  %884 = vst [vmem:[#allocation2 + $0x140] sm:$0xff] %v12804_v61  ;;  %v604_v54 = vmax.f32 %v584_v62, 0.0  ;;  %v841_v16 = vadd.f32 %v12694_v18, %v840_v1  ;;  %v10406_v23 = vpop.f32.mrb[14].mxu1  ;;  %v578_v25 = vpop.f32.mrb[15].mxu0  ;;  %v12136_v48 = vld [vmem:[%s14482_s3 + $0x20] sm:$0xff]  }
 0x115   : > { %v587_v17 = vadd.f32 %v10374_v13, %v12694_v18  ;;  %10728 = vmatpush3.bf16.msra.mxu1 %v12674_v50  ;;  %v2882_v26 = vor.u32 %v2880_v57, %v2879_v7  ;;  %v869_v27 = vmax.f32 %v849_v10, 0.0  ;;  %v602_v28 = vmax.f32 %v576_v12, 0.0  ;;  %v843_v31 = vpop.f32.mrb[15].mxu1  ;;  %v12135_v0 = vld [vmem:[%s14482_s3 + $0x18] sm:$0xff]  }
 0x116   : > { %v852_v29 = vadd.f32 %v10406_v23, %v12694_v18  ;;  %v579_v30 = vadd.f32 %v12694_v18, %v578_v25  ;;  %10729 = vmatprep.subr.bf16.mxu1 %v12131_v47  ;;  %v867_v33 = vmax.f32 %v841_v16, 0.0  ;;  %v844_v35 = vadd.f32 %v12694_v18, %v843_v31 }
 0x117   : > { %v605_v34 = vmax.f32 %v587_v17, 0.0  ;;  %v12832_v50 = vsel %vm908_vm0, %v12687_v8, %v955_v14  ;;  %10444 = vmatpush3.bf16.msra.mxu0 %v12132_v4  ;;  %v12837_v42 = vsel %vm908_vm0, %v12689_v9, %v2882_v26  ;;  %v964_v46 = vrot.slane %v962_v15, 7  ;;  %v12138_v15 = vld [vmem:[%s14482_s3 + $0x28] sm:$0xff]   ;;  %v12877_v17 = vld [vmem:[#allocation2 + $0x18] sm:$0xff] }
 0x118   : > { %v870_v39 = vmax.f32 %v852_v29, 0.0  ;;  %v603_v41 = vmax.f32 %v579_v30, 0.0  ;;  %10427 = vmatprep.mubr.bf16.mxu0 %v12832_v50  ;;  %10445 = vmatprep.subr.bf16.mxu0 %v12134_v5  ;;  %v868_v57 = vmax.f32 %v844_v35, 0.0  ;;  %v965_v8 = vshll.u32 %v12746_v40, 16 }
 0x119   : > { %v12842_v18 = vpack.c.bf16 %v605_v34, %v604_v54  ;;  %10730 = vmatpush3.bf16.msra.mxu1 %v12131_v47  ;;  %10715 = vmatprep.mubr.bf16.mxu1 %v12837_v42  ;;  %v2889_v4 = vshrl.u32 %v12748_v44, 16  ;;  %v974_v2 = vshrl.u32 %v12797_v43, 16  ;;  %v12857_v47 = vrot.slane %v994_v53, 7 }
 0x11a   : > { %v12847_v62 = vpack.c.bf16 %v870_v39, %v869_v27  ;;  %v12849_v9 = vpack.c.bf16 %v603_v41, %v602_v28  ;;  %10731 = vmatprep.subr.bf16.mxu1 %v12133_v32  ;;  %v12860_v7 = vpack.c.bf16 %v868_v57, %v867_v33  ;;  %v967_v10 = vor.u32 %v965_v8, %v964_v46  ;;  %v12140_v33 = vld [vmem:[%s14482_s3 + $0x30] sm:$0xff]   ;;  %v904_v41 = vld [vmem:[#allocation2 + $0xc0] sm:$0x80] }
 0x11b   : > { %622 = vst [vmem:[#allocation2 + $0xc8] sm:$0xff] %v12842_v18  ;;  %v2891_v12 = vrot.slane %v2889_v4, 7  ;;  %v2892_v1 = vshll.u32 %v12748_v44, 16  ;;  %10446 = vmatpush3.bf16.msra.mxu0 %v12134_v5  ;;  %v976_v13 = vrot.slane %v974_v2, 7  ;;  %v977_v14 = vshll.u32 %v12797_v43, 16 }
 0x11c   : > { %887 = vst [vmem:[#allocation2 + $0x188] sm:$0xff] %v12847_v62  ;;  %621 = vst [vmem:[#allocation2 + $0xb0] sm:$0xff] %v12849_v9  ;;  %10447 = vmatprep.subr.bf16.mxu0 %v12136_v48  ;;  %v2901_v36 = vshrl.u32 %v12804_v61, 16  ;;  %v986_v53 = vshrl.u32 %v12792_v38, 16  ;;  %v12874_v5 = vsel %vm908_vm0, %v12685_v6, %v967_v10  ;;  %v2913_v16 = vshrl.u32 %v12795_v49, 16  ;;  %v12137_v6 = vld [vmem:[%s14482_s3 + $0x20] sm:$0xff]  }
 0x11d   : > { %886 = vst [vmem:[#allocation2 + $0x170] sm:$0xff] %v12860_v7  ;;  %v2894_v54 = vor.u32 %v2892_v1, %v2891_v12  ;;  %10732 = vmatpush3.bf16.msra.mxu1 %v12133_v32  ;;  %v914_v23 = vshrl.u32 %v12877_v17, 16  ;;  %10428 = vmatmul.mubr.bf16.gmra.mrb[20].mxu0 %v12874_v5  ;;  %v979_v25 = vor.u32 %v977_v14, %v976_v13  ;;  %v2904_v27 = vshll.u32 %v12804_v61, 16  ;;  %v2832_v4 = vld [vmem:[#allocation2 + $0x180] sm:$0x80] }
 0x11e   : > { %10733 = vmatprep.subr.bf16.mxu1 %v12135_v0  ;;  %v2903_v26 = vrot.slane %v2901_v36, 7  ;;  %v988_v28 = vrot.slane %v986_v53, 7  ;;  %v989_v30 = vshll.u32 %v12792_v38, 16  ;;  %v2915_v31 = vrot.slane %v2913_v16, 7  ;;  %v888_v2 = vld [vmem:[#allocation2] sm:$0x80] }
 0x11f   : > { %v12887_v29 = vsel %vm908_vm0, %v12696_v19, %v2894_v54  ;;  %10448 = vmatpush3.bf16.msra.mxu0 %v12136_v48  ;;  %v998_v32 = vshrl.u32 %v12849_v9, 16  ;;  %v12897_v34 = vsel %vm908_vm0, %v12698_v20, %v979_v25  ;;  %v2916_v19 = vshll.u32 %v12795_v49, 16  ;;  %v12904_v20 = vld [vmem:[#allocation2 + $0xe0] sm:$0xff] }
 0x120   : > { %10716 = vmatmul.mubr.bf16.gmra.mrb[20].mxu1 %v12887_v29  ;;  %v2906_v35 = vor.u32 %v2904_v27, %v2903_v26  ;;  %10449 = vmatprep.subr.bf16.mxu0 %v12138_v15  ;;  %v2925_v39 = vshrl.u32 %v12860_v7, 16  ;;  %v991_v46 = vor.u32 %v989_v30, %v988_v28  ;;  %v1001_v57 = vshll.u32 %v12849_v9, 16 }
 0x121   : > { %10734 = vmatpush3.bf16.msra.mxu1 %v12135_v0  ;;  %10431 = vmatprep.mubr.bf16.mxu0 %v12897_v34  ;;  %v1000_v48 = vrot.slane %v998_v32, 7  ;;  %v1034_v8 = vshrl.u32 %v12842_v18, 16  ;;  %v12139_v0 = vld [vmem:[%s14482_s3 + $0x28] sm:$0xff]   ;;  %v2923_v12 = vrot.slane %v2921_v59, 7  ;;  %v2928_v13 = vshll.u32 %v12860_v7, 16  ;;  %v12141_v32 = vld [vmem:[%s14482_s3 + $0x30] sm:$0xff]  }
 0x122   : > { %v12908_v10 = vsel %vm908_vm0, %v12700_v21, %v2906_v35  ;;  %10735 = vmatprep.subr.bf16.mxu1 %v12137_v6  ;;  %v2927_v1 = vrot.slane %v2925_v39, 7  ;;  %v2918_v14 = vor.u32 %v2916_v19, %v2915_v31  ;;  %v2961_v53 = vshrl.u32 %v12847_v62, 16  ;;  %v2816_v21 = vld [vmem:[#allocation2 + $0xc0] sm:$0x80] }
 0x123   : > { %10719 = vmatprep.mubr.bf16.mxu1 %v12908_v10  ;;  %10450 = vmatpush3.bf16.msra.mxu0 %v12138_v15  ;;  %v1003_v36 = vor.u32 %v1001_v57, %v1000_v48  ;;  %v917_v54 = vshll.u32 %v12877_v17, 16  ;;  %v910_v59 = vshrl.u32 %v888_v2, 16  ;;  %v916_v25 = vrot.slane %v914_v23, 7 }
 0x124   : > { %10451 = vmatprep.subr.bf16.mxu0 %v12140_v33  ;;  %v2930_v16 = vor.u32 %v2928_v13, %v2927_v1  ;;  %v1357_v26 = vshll.u32 %v12904_v20, 16  ;;  %v12927_v15 = vsel %vm908_vm0, %v12702_v22, %v991_v46  ;;  %v1030_v28 = vshrl.u32 %v904_v41, 16  ;;  %v12144_v46 = vld [vmem:[%s14482_s3 + $0x180] sm:$0xff]  }
 0x125   : > { %10736 = vmatpush3.bf16.msra.mxu1 %v12137_v6  ;;  %v12931_v27 = vsel %vm908_vm0, %v12857_v47, %v1003_v36  ;;  %v1036_v30 = vrot.slane %v1034_v8, 7  ;;  %10432 = vmatmul.mubr.bf16.gmra.mrb[24].mxu0 %v12927_v15  ;;  %v2957_v35 = vshrl.u32 %v2832_v4, 16  ;;  %v2837_v22 = vshrl.u32 %v2816_v21, 16  ;;  %v12143_v4 = vld [vmem:[%s14482_s3 + $0x38] sm:$0xff]   ;;  %v12145_v36 = vld [vmem:[%s14482_s3 + $0x180] sm:$0xff]  }
 0x126   : > { %10737 = vmatprep.subr.bf16.mxu1 %v12139_v0  ;;  %v12935_v31 = vsel %vm908_vm0, %v2923_v12, %v2930_v16  ;;  %v12942_v6 = vsel %vm908_vm0, %v12704_v24, %v2918_v14  ;;  %10435 = vmatprep.mubr.bf16.mxu0 %v12931_v27  ;;  %v1037_v47 = vshll.u32 %v12842_v18, 16  ;;  %v2963_v19 = vrot.slane %v2961_v53, 7  ;;  %v12146_v16 = vld [vmem:[%s14482_s3 + $0x188] sm:$0xff]  }
 0x127   : > { %10452 = vmatpush3.bf16.msra.mxu0 %v12140_v33  ;;  %v912_v39 = vrot.slane %v910_v59, 7  ;;  %v12949_v41 = vor.u32 %v917_v54, %v916_v25  ;;  %v1354_v24 = vshrl.u32 %v12904_v20, 16  ;;  %v4033_v48 = vrot.slane %v1357_v26, 1  ;;  %v12148_v59 = vld [vmem:[%s14482_s3 + $0x190] sm:$0xff]   ;;  %v12150_v25 = vld [vmem:[%s14482_s3 + $0x198] sm:$0xff]  }
 0x128   : > { %10720 = vmatmul.mubr.bf16.gmra.mrb[24].mxu1 %v12942_v6  ;;  %10453 = vmatprep.subr.bf16.mxu0 %v12142_v37  ;;  %v1032_v33 = vrot.slane %v1030_v28, 7  ;;  %v1039_v57 = vor.u32 %v1037_v47, %v1036_v30  ;;  %v2964_v8 = vshll.u32 %v12847_v62, 16  ;;  %v2959_v12 = vrot.slane %v2957_v35, 7  ;;  %v12152_v28 = vld [vmem:[%s14482_s3 + $0x1a0] sm:$0xff]   ;;  %v12155_v35 = vld [vmem:[%s14482_s3 + $0x1a8] sm:$0xff]   ;;  %v12157_v47 = vld [vmem:[%s14482_s3 + $0x1b0] sm:$0xff]  }
 0x129   : > { %10738 = vmatpush3.bf16.msra.mxu1 %v12139_v0  ;;  %10723 = vmatprep.mubr.bf16.mxu1 %v12935_v31  ;;  %v12964_v2 = vor.u32 %v4033_v48, %v1354_v24  ;;  %v2839_v13 = vrot.slane %v2837_v22, 7  ;;  %v920_v0 = vsel %vm908_vm0, %v912_v39, %v12949_v41  ;;  %v12153_v30 = vld [vmem:[%s14482_s3 + $0x1a0] sm:$0xff]   ;;  %v12156_v22 = vld [vmem:[%s14482_s3 + $0x1b0] sm:$0xff]   ;;  %v12159_v39 = vld [vmem:[%s14482_s3 + $0x1b8] sm:$0xff]  }
 0x12a   : > { %10739 = vmatprep.subr.bf16.mxu1 %v12141_v32  ;;  %v2966_v1 = vor.u32 %v2964_v8, %v2963_v19  ;;  %v12969_v14 = vsel %vm908_vm0, %v1032_v33, %v1039_v57  ;;  %v12158_v19 = vld [vmem:[%s14482_s3 + $0x1b8] sm:$0xff]   ;;  %v12161_v48 = vld [vmem:[%s14482_s3 + $0x40] sm:$0xff]   ;;  %v12163_v33 = vld [vmem:[%s14482_s3 + $0x48] sm:$0xff]  }
 0x12b   : > { %10454 = vmatpush3.bf16.msra.mxu0 %v12142_v37  ;;  %v2847_v21 = vsel %vm908_vm0, %v2839_v13, %v1039_v57  ;;  %v12147_v37 = vld [vmem:[%s14482_s3 + $0x188] sm:$0xff]   ;;  %v906_v57 = vld [vmem:[#allocation2 + $0xd8] sm:$0x80] }
 0x12c   : > { %10471 = vmatprep.subr.bf16.mxu0 %v12144_v46  ;;  %v12976_v53 = vsel %vm908_vm0, %v2959_v12, %v2966_v1  ;;  %v2834_v8 = vld [vmem:[#allocation2 + $0x198] sm:$0x80]  ;;  %v12172_v1 = vld [vmem:[%s14482_s3 + $0x70] sm:$0xff]  }
 0x12d   : > { %10740 = vmatpush3.bf16.msra.mxu1 %v12141_v32  ;;  %10436 = vmatmul.mubr.bf16.gmra.mrb[28].mxu0 %v12969_v14  ;;  %v12154_v32 = vld [vmem:[%s14482_s3 + $0x1a8] sm:$0xff]   ;;  %v3276_v12 = vshrl.u32 %v2834_v8, 16 }
 0x12e   : > { %10741 = vmatprep.subr.bf16.mxu1 %v12143_v4  ;;  %10455 = vmatprep.mubr.bf16.mxu0 %v920_v0  ;;  %v12173_v0 = vld [vmem:[%s14482_s3 + $0x70] sm:$0xff]   ;;  %v12210_v8 = vld [vmem:[%s14482_s3 + $0x88] sm:$0xff]  }
 0x12f   : > { %v3278_v13 = vrot.slane %v3276_v12, 7  ;;  %v12407_v12 = vld [vmem:[#allocation2 + $0x110] sm:$0xff] }
 0x130   : > { %10724 = vmatmul.mubr.bf16.gmra.mrb[28].mxu1 %v12976_v53 }
 0x131   : > { %10743 = vmatprep.mubr.bf16.mxu1 %v2847_v21  ;;  %10742 = vmatpush3.bf16.msra.mxu1 %v12143_v4  ;;  %v1356_v4 = vrot.slane %v1354_v24, 7  ;;  %v12178_v21 = vld [vmem:[%s14482_s3 + $0x108] sm:$0xff]  }
 0x132   : > { %10759 = vmatprep.subr.bf16.mxu1 %v12145_v36 }
 0x135   : > { %10456 = vmatmul.mubr.bf16.vlgmr.msra.gmra.mrb[16].mxu0 %v12759_v63  ;;  %v12149_v63 = vld [vmem:[%s14482_s3 + $0x190] sm:$0xff]  }
 0x136   : > { %10472 = vmatpush3.bf16.msra.mxu0 %v12144_v46  ;;  %10459 = vmatprep.mubr.bf16.mxu0 %v12779_v58  ;;  %v12160_v46 = vld [vmem:[%s14482_s3 + $0x40] sm:$0xff]  }
 0x137   : > { %10473 = vmatprep.subr.bf16.mxu0 %v12146_v16 }
 0x138   : > { %10744 = vmatmul.mubr.bf16.vlgmr.msra.gmra.mrb[16].mxu1 %v12768_v11  ;;  %v12151_v11 = vld [vmem:[%s14482_s3 + $0x198] sm:$0xff]  }
 0x139   : > { %10760 = vmatpush3.bf16.msra.mxu1 %v12145_v36  ;;  %10747 = vmatprep.mubr.bf16.mxu1 %v12809_v3  ;;  %v3286_v36 = vsel %vm908_vm0, %v3278_v13, %v12949_v41  ;;  %v12177_v41 = vld [vmem:[%s14482_s3 + $0x100] sm:$0xff]   ;;  %v12215_v13 = vld [vmem:[%s14482_s3 + $0x98] sm:$0xff]  }
 0x13a   : > { %10761 = vmatprep.subr.bf16.mxu1 %v12147_v37  ;;  %10474 = vmatpush3.bf16.msra.mxu0 %v12146_v16  ;;  %v12179_v16 = vld [vmem:[%s14482_s3 + $0x108] sm:$0xff]  }
 0x13b   : > { %10475 = vmatprep.subr.bf16.mxu0 %v12148_v59 }
 0x13d   : > { %10762 = vmatpush3.bf16.msra.mxu1 %v12147_v37  ;;  %10460 = vmatmul.mubr.bf16.gmra.mrb[20].mxu0 %v12832_v50  ;;  %v12180_v37 = vld [vmem:[%s14482_s3 + $0x110] sm:$0xff]  }
 0x13e   : > { %10763 = vmatprep.subr.bf16.mxu1 %v12149_v63  ;;  %10476 = vmatpush3.bf16.msra.mxu0 %v12148_v59  ;;  %v12185_v59 = vld [vmem:[%s14482_s3 + $0x120] sm:$0xff]  }
 0x13f   : > { %10463 = vmatprep.mubr.bf16.mxu0 %v12874_v5  ;;  %10477 = vmatprep.subr.bf16.mxu0 %v12150_v25 }
 0x140   : > { %10748 = vmatmul.mubr.bf16.gmra.mrb[20].mxu1 %v12837_v42 }
 0x141   : > { %10764 = vmatpush3.bf16.msra.mxu1 %v12149_v63  ;;  %10751 = vmatprep.mubr.bf16.mxu1 %v12887_v29  ;;  %v12186_v63 = vld [vmem:[%s14482_s3 + $0x128] sm:$0xff]  }
 0x142   : > { %10765 = vmatprep.subr.bf16.mxu1 %v12151_v11  ;;  %10478 = vmatpush3.bf16.msra.mxu0 %v12150_v25  ;;  %v12187_v25 = vld [vmem:[%s14482_s3 + $0x128] sm:$0xff]  }
 0x143   : > { %10479 = vmatprep.subr.bf16.mxu0 %v12152_v28 }
 0x145   : > { %10766 = vmatpush3.bf16.msra.mxu1 %v12151_v11  ;;  %10464 = vmatmul.mubr.bf16.gmra.mrb[24].mxu0 %v12897_v34  ;;  %v12188_v11 = vld [vmem:[%s14482_s3 + $0x130] sm:$0xff]  }
 0x146   : > { %10767 = vmatprep.subr.bf16.mxu1 %v12153_v30  ;;  %10480 = vmatpush3.bf16.msra.mxu0 %v12152_v28  ;;  %v12189_v28 = vld [vmem:[%s14482_s3 + $0x130] sm:$0xff]  }
 0x147   : > { %10467 = vmatprep.mubr.bf16.mxu0 %v12927_v15  ;;  %10481 = vmatprep.subr.bf16.mxu0 %v12154_v32 }
 0x148   : > { %10752 = vmatmul.mubr.bf16.gmra.mrb[24].mxu1 %v12908_v10 }
 0x149   : > { %10768 = vmatpush3.bf16.msra.mxu1 %v12153_v30  ;;  %10755 = vmatprep.mubr.bf16.mxu1 %v12942_v6  ;;  %v12190_v30 = vld [vmem:[%s14482_s3 + $0x138] sm:$0xff]  }
 0x14a   : > { %10769 = vmatprep.subr.bf16.mxu1 %v12155_v35  ;;  %10482 = vmatpush3.bf16.msra.mxu0 %v12154_v32  ;;  %v12191_v32 = vld [vmem:[%s14482_s3 + $0x138] sm:$0xff]  }
 0x14b   : > { %10483 = vmatprep.subr.bf16.mxu0 %v12156_v22 }
 0x14d   : > { %10770 = vmatpush3.bf16.msra.mxu1 %v12155_v35  ;;  %10468 = vmatmul.mubr.bf16.gmra.mrb[28].mxu0 %v12931_v27  ;;  %v12401_v35 = vld [vmem:[#allocation2 + $0x20] sm:$0xff] }
 0x14e   : > { %10771 = vmatprep.subr.bf16.mxu1 %v12157_v47  ;;  %10484 = vmatpush3.bf16.msra.mxu0 %v12156_v22  ;;  %v12192_v22 = vld [vmem:[%s14482_s3 + $0x1c0] sm:$0xff]  }
 0x14f   : > { %10487 = vmatprep.mubr.bf16.mxu0 %v12779_v58  ;;  %10485 = vmatprep.subr.bf16.mxu0 %v12158_v19  ;;  %v12162_v58 = vld [vmem:[%s14482_s3 + $0x48] sm:$0xff]  }
 0x150   : > { %10756 = vmatmul.mubr.bf16.gmra.mrb[28].mxu1 %v12935_v31 }
 0x151   : > { %10772 = vmatpush3.bf16.msra.mxu1 %v12157_v47  ;;  %10775 = vmatprep.mubr.bf16.mxu1 %v12809_v3  ;;  %v12164_v3 = vld [vmem:[%s14482_s3 + $0x50] sm:$0xff]   ;;  %v12402_v47 = vld [vmem:[#allocation2 + $0xe0] sm:$0xff] }
 0x152   : > { %10773 = vmatprep.subr.bf16.mxu1 %v12159_v39  ;;  %10486 = vmatpush3.bf16.msra.mxu0 %v12158_v19  ;;  %v12193_v19 = vld [vmem:[%s14482_s3 + $0x1c0] sm:$0xff]  }
 0x153   : > { %10503 = vmatprep.subr.bf16.mxu0 %v12160_v46 }
 0x155   : > { %10774 = vmatpush3.bf16.msra.mxu1 %v12159_v39  ;;  %10488 = vmatmul.mubr.bf16.vlgmr.msra.gmra.mrb[16].mxu0 %v12832_v50  ;;  %v12165_v50 = vld [vmem:[%s14482_s3 + $0x50] sm:$0xff]   ;;  %v12194_v39 = vld [vmem:[%s14482_s3 + $0x1c8] sm:$0xff]  }
 0x156   : > { %10791 = vmatprep.subr.bf16.mxu1 %v12161_v48  ;;  %10504 = vmatpush3.bf16.msra.mxu0 %v12160_v46  ;;  %v12403_v46 = vld [vmem:[#allocation2 + $0x38] sm:$0xff] }
 0x157   : > { %10491 = vmatprep.mubr.bf16.mxu0 %v12874_v5  ;;  %10505 = vmatprep.subr.bf16.mxu0 %v12162_v58  ;;  %v12166_v5 = vld [vmem:[%s14482_s3 + $0x58] sm:$0xff]  }
 0x158   : > { %10776 = vmatmul.mubr.bf16.vlgmr.msra.gmra.mrb[16].mxu1 %v12837_v42  ;;  %v12167_v42 = vld [vmem:[%s14482_s3 + $0x58] sm:$0xff]  }
 0x159   : > { %10792 = vmatpush3.bf16.msra.mxu1 %v12161_v48  ;;  %10779 = vmatprep.mubr.bf16.mxu1 %v12887_v29  ;;  %v12168_v29 = vld [vmem:[%s14482_s3 + $0x60] sm:$0xff]   ;;  %v12195_v48 = vld [vmem:[%s14482_s3 + $0x1c8] sm:$0xff]  }
 0x15a   : > { %10793 = vmatprep.subr.bf16.mxu1 %v12163_v33  ;;  %10506 = vmatpush3.bf16.msra.mxu0 %v12162_v58  ;;  %v12404_v58 = vld [vmem:[#allocation2 + $0xf8] sm:$0xff] }
 0x15b   : > { %10507 = vmatprep.subr.bf16.mxu0 %v12164_v3 }
 0x15d   : > { %10794 = vmatpush3.bf16.msra.mxu1 %v12163_v33  ;;  %10492 = vmatmul.mubr.bf16.gmra.mrb[20].mxu0 %v12897_v34  ;;  %v12169_v34 = vld [vmem:[%s14482_s3 + $0x60] sm:$0xff]   ;;  %v12196_v33 = vld [vmem:[%s14482_s3 + $0x1d0] sm:$0xff]  }
 0x15e   : > { %10795 = vmatprep.subr.bf16.mxu1 %v12165_v50  ;;  %10508 = vmatpush3.bf16.msra.mxu0 %v12164_v3  ;;  %v12197_v3 = vld [vmem:[%s14482_s3 + $0x1d0] sm:$0xff]  }
 0x15f   : > { %10495 = vmatprep.mubr.bf16.mxu0 %v12927_v15  ;;  %10509 = vmatprep.subr.bf16.mxu0 %v12166_v5  ;;  %v1350_v15 = vshrl.u32 %v906_v57, 16  ;;  %v12209_v57 = vld [vmem:[%s14482_s3 + $0x80] sm:$0xff]  }
 0x160   : > { %10780 = vmatmul.mubr.bf16.gmra.mrb[20].mxu1 %v12908_v10  ;;  %v12170_v10 = vld [vmem:[%s14482_s3 + $0x68] sm:$0xff]  }
 0x161   : > { %10796 = vmatpush3.bf16.msra.mxu1 %v12165_v50  ;;  %10783 = vmatprep.mubr.bf16.mxu1 %v12942_v6  ;;  %v12171_v6 = vld [vmem:[%s14482_s3 + $0x68] sm:$0xff]   ;;  %v1352_v24 = vrot.slane %v1350_v15, 7  ;;  %v12199_v50 = vld [vmem:[%s14482_s3 + $0x1d8] sm:$0xff]  }
 0x162   : > { %10797 = vmatprep.subr.bf16.mxu1 %v12167_v42  ;;  %10510 = vmatpush3.bf16.msra.mxu0 %v12166_v5  ;;  %v12202_v5 = vld [vmem:[%s14482_s3 + $0x1e8] sm:$0xff]  }
 0x163   : > { %10511 = vmatprep.subr.bf16.mxu0 %v12168_v29  ;;  %v12211_v15 = vld [vmem:[%s14482_s3 + $0x88] sm:$0xff]  }
 0x165   : > { %10798 = vmatpush3.bf16.msra.mxu1 %v12167_v42  ;;  %10496 = vmatmul.mubr.bf16.gmra.mrb[24].mxu0 %v12931_v27  ;;  %v1359_v27 = vor.u32 %v1357_v26, %v1356_v4  ;;  %v12175_v26 = vld [vmem:[%s14482_s3 + $0x78] sm:$0xff]   ;;  %v12204_v42 = vld [vmem:[%s14482_s3 + $0x1f0] sm:$0xff]   ;;  %v12406_v4 = vld [vmem:[#allocation2 + $0x68] sm:$0xff] }
 0x166   : > { %10799 = vmatprep.subr.bf16.mxu1 %v12169_v34  ;;  %10512 = vmatpush3.bf16.msra.mxu0 %v12168_v29  ;;  %v12206_v29 = vld [vmem:[%s14482_s3 + $0x1f8] sm:$0xff]  }
 0x167   : > { %10499 = vmatprep.mubr.bf16.mxu0 %v12969_v14  ;;  %10513 = vmatprep.subr.bf16.mxu0 %v12170_v10  ;;  %v1360_v14 = vsel %vm908_vm0, %v1352_v24, %v1359_v27  ;;  %v12213_v24 = vld [vmem:[%s14482_s3 + $0x90] sm:$0xff]   ;;  %v12214_v27 = vld [vmem:[%s14482_s3 + $0x98] sm:$0xff]  }
 0x168   : > { %10784 = vmatmul.mubr.bf16.gmra.mrb[24].mxu1 %v12935_v31  ;;  %v12174_v31 = vld [vmem:[%s14482_s3 + $0x78] sm:$0xff]  }
 0x169   : > { %10800 = vmatpush3.bf16.msra.mxu1 %v12169_v34  ;;  %10787 = vmatprep.mubr.bf16.mxu1 %v12976_v53  ;;  %v12176_v53 = vld [vmem:[%s14482_s3 + $0x100] sm:$0xff]  }
 0x16a   : > { %10801 = vmatprep.subr.bf16.mxu1 %v12171_v6  ;;  %10514 = vmatpush3.bf16.msra.mxu0 %v12170_v10  ;;  %v12208_v34 = vld [vmem:[%s14482_s3 + $0x80] sm:$0xff]   ;;  %v12405_v10 = vld [vmem:[#allocation2 + $0x50] sm:$0xff] }
 0x16b   : > { %10515 = vmatprep.subr.bf16.mxu0 %v12172_v1 }
 0x16d   : > { %10802 = vmatpush3.bf16.msra.mxu1 %v12171_v6  ;;  %10500 = vmatmul.mubr.bf16.gmra.mrb[28].mxu0 %v1360_v14  ;;  %v12212_v6 = vld [vmem:[%s14482_s3 + $0x90] sm:$0xff]   ;;  %v12410_v14 = vld [vmem:[#allocation2 + $0x158] sm:$0xff] }
 0x16e   : > { %10803 = vmatprep.subr.bf16.mxu1 %v12173_v0  ;;  %10516 = vmatpush3.bf16.msra.mxu0 %v12172_v1  ;;  %v12408_v1 = vld [vmem:[#allocation2 + $0x128] sm:$0xff] }
 0x16f   : > { %10519 = vmatprep.mubr.bf16.mxu0 %v12877_v17  ;;  %10517 = vmatprep.subr.bf16.mxu0 %v12174_v31 }
 0x170   : > { %10788 = vmatmul.mubr.bf16.gmra.mrb[28].mxu1 %v3286_v36  ;;  %v3996_v36 = vld [vmem:[#allocation2 + $0xc8] sm:$0xff] }
 0x171   : > { %10804 = vmatpush3.bf16.msra.mxu1 %v12173_v0  ;;  %10807 = vmatprep.mubr.bf16.mxu1 %v12842_v18  ;;  %v12409_v0 = vld [vmem:[#allocation2 + $0x98] sm:$0xff] }
 0x172   : > { %10805 = vmatprep.subr.bf16.mxu1 %v12175_v26  ;;  %10518 = vmatpush3.bf16.msra.mxu0 %v12174_v31  ;;  %v12216_v31 = vld [vmem:[%s14482_s3 + $0xa0] sm:$0xff]  }
 0x173   : > { %10535 = vmatprep.subr.bf16.mxu0 %v12176_v53 }
 0x175   : > { %10806 = vmatpush3.bf16.msra.mxu1 %v12175_v26  ;;  %10520 = vmatmul.mubr.bf16.vlgmr.msra.gmra.mrb[16].mxu0 %v12723_v56  ;;  %v12181_v56 = vld [vmem:[%s14482_s3 + $0x110] sm:$0xff]  }
 0x176   : > { %10823 = vmatprep.subr.bf16.mxu1 %v12177_v41  ;;  %10536 = vmatpush3.bf16.msra.mxu0 %v12176_v53  ;;  %v2075_v26 = vld [vmem:[#allocation2 + $0x10] sm:$0x1]  ;;  %v4019_v53 = vshll.u32 %v3996_v36, 16 }
 0x177   : > { %10523 = vmatprep.mubr.bf16.mxu0 %v12718_v51  ;;  %10537 = vmatprep.subr.bf16.mxu0 %v12178_v21  ;;  %v12182_v51 = vld [vmem:[%s14482_s3 + $0x118] sm:$0xff]  }
 0x178   : > { %10808 = vmatmul.mubr.bf16.vlgmr.msra.gmra.mrb[16].mxu1 %v12727_v60  ;;  %v12183_v60 = vld [vmem:[%s14482_s3 + $0x118] sm:$0xff]  }
 0x179   : > { %10824 = vmatpush3.bf16.msra.mxu1 %v12177_v41  ;;  %10811 = vmatprep.mubr.bf16.mxu1 %v12721_v55  ;;  %v12184_v55 = vld [vmem:[%s14482_s3 + $0x120] sm:$0xff]   ;;  %v2100_v41 = vrot.slane %v917_v54, 1  ;;  %v12220_v54 = vld [vmem:[%s14482_s3 + $0xb0] sm:$0xff]  }
 0x17a   : > { %10825 = vmatprep.subr.bf16.mxu1 %v12179_v16  ;;  %10538 = vmatpush3.bf16.msra.mxu0 %v12178_v21  ;;  %v2103_v21 = vshll.u32 %v2075_v26, 16 }
 0x17b   : > { %10539 = vmatprep.subr.bf16.mxu0 %v12180_v37 }
 0x17d   : > { %10826 = vmatpush3.bf16.msra.mxu1 %v12179_v16  ;;  %10524 = vmatmul.mubr.bf16.gmra.mrb[20].mxu0 %v12750_v45  ;;  %v3997_v16 = vld [vmem:[#allocation2 + $0xd0] sm:$0x1] }
 0x17e   : > { %10827 = vmatprep.subr.bf16.mxu1 %v12181_v56  ;;  %10540 = vmatpush3.bf16.msra.mxu0 %v12180_v37  ;;  %v12219_v37 = vld [vmem:[%s14482_s3 + $0xa8] sm:$0xff]  }
 0x17f   : > { %10527 = vmatprep.mubr.bf16.mxu0 %v12746_v40  ;;  %10541 = vmatprep.subr.bf16.mxu0 %v12182_v51 }
 0x180   : > { %10812 = vmatmul.mubr.bf16.gmra.mrb[20].mxu1 %v12754_v52 }
 0x181   : > { %10828 = vmatpush3.bf16.msra.mxu1 %v12181_v56  ;;  %10815 = vmatprep.mubr.bf16.mxu1 %v12748_v44  ;;  %v2076_v56 = vld [vmem:[#allocation2 + $0x20] sm:$0xff] }
 0x182   : > { %10829 = vmatprep.subr.bf16.mxu1 %v12183_v60  ;;  %10542 = vmatpush3.bf16.msra.mxu0 %v12182_v51  ;;  %v2078_v51 = vld [vmem:[#allocation2 + $0x38] sm:$0xff] }
 0x183   : > { %10543 = vmatprep.subr.bf16.mxu0 %v12184_v55 }
 0x185   : > { %10830 = vmatpush3.bf16.msra.mxu1 %v12183_v60  ;;  %10528 = vmatmul.mubr.bf16.gmra.mrb[24].mxu0 %v12797_v43  ;;  %v4021_v60 = vrot.slane %v4019_v53, 1 }
 0x186   : > { %10831 = vmatprep.subr.bf16.mxu1 %v12185_v59  ;;  %10544 = vmatpush3.bf16.msra.mxu0 %v12184_v55  ;;  %v4024_v55 = vshll.u32 %v3997_v16, 16 }
 0x187   : > { %10531 = vmatprep.mubr.bf16.mxu0 %v12792_v38  ;;  %10545 = vmatprep.subr.bf16.mxu0 %v12186_v63 }
 0x188   : > { %10816 = vmatmul.mubr.bf16.gmra.mrb[24].mxu1 %v12804_v61 }
 0x189   : > { %10832 = vmatpush3.bf16.msra.mxu1 %v12185_v59  ;;  %10819 = vmatprep.mubr.bf16.mxu1 %v12795_v49  ;;  %v2105_v59 = vrot.slane %v2103_v21, 1 }
 0x18a   : > { %10833 = vmatprep.subr.bf16.mxu1 %v12187_v25  ;;  %10546 = vmatpush3.bf16.msra.mxu0 %v12186_v63  ;;  %v2110_v63 = vshll.u32 %v2076_v56, 16 }
 0x18b   : > { %10547 = vmatprep.subr.bf16.mxu0 %v12188_v11 }
 0x18d   : > { %10834 = vmatpush3.bf16.msra.mxu1 %v12187_v25  ;;  %10532 = vmatmul.mubr.bf16.gmra.mrb[28].mxu0 %v12849_v9  ;;  %v4017_v25 = vshrl.u32 %v3996_v36, 16 }
 0x18e   : > { %10835 = vmatprep.subr.bf16.mxu1 %v12189_v28  ;;  %10548 = vmatpush3.bf16.msra.mxu0 %v12188_v11  ;;  %v2077_v11 = vld [vmem:[#allocation2 + $0x28] sm:$0x1] }
 0x18f   : > { %10551 = vmatprep.mubr.bf16.mxu0 %v12401_v35  ;;  %10549 = vmatprep.subr.bf16.mxu0 %v12190_v30 }
 0x190   : > { %10820 = vmatmul.mubr.bf16.gmra.mrb[28].mxu1 %v12860_v7 }
 0x191   : > { %10836 = vmatpush3.bf16.msra.mxu1 %v12189_v28  ;;  %10839 = vmatprep.mubr.bf16.mxu1 %v12402_v47  ;;  %v2122_v28 = vshll.u32 %v2078_v51, 16 }
 0x192   : > { %10837 = vmatprep.subr.bf16.mxu1 %v12191_v32  ;;  %10550 = vmatpush3.bf16.msra.mxu0 %v12190_v30  ;;  %v2079_v30 = vld [vmem:[#allocation2 + $0x40] sm:$0x1] }
 0x193   : > { %10567 = vmatprep.subr.bf16.mxu0 %v12192_v22 }
 0x195   : > { %10838 = vmatpush3.bf16.msra.mxu1 %v12191_v32  ;;  %10552 = vmatmul.mubr.bf16.vlgmr.msra.gmra.mrb[16].mxu0 %v12403_v46  ;;  %v4026_v32 = vrot.slane %v4024_v55, 1  ;;  %v13336_v55 = vld [vmem:[#allocation2 + $0x98] sm:$0xff] }
 0x196   : > { %10855 = vmatprep.subr.bf16.mxu1 %v12193_v19  ;;  %10568 = vmatpush3.bf16.msra.mxu0 %v12192_v22  ;;  %v3999_v22 = vld [vmem:[#allocation2 + $0xe8] sm:$0x1] }
 0x197   : > { %10555 = vmatprep.mubr.bf16.mxu0 %v12750_v45  ;;  %10569 = vmatprep.subr.bf16.mxu0 %v12194_v39  ;;  %v12198_v45 = vld [vmem:[%s14482_s3 + $0x1d8] sm:$0xff]  }
 0x198   : > { %10840 = vmatmul.mubr.bf16.vlgmr.msra.gmra.mrb[16].mxu1 %v12404_v58 }
 0x199   : > { %10856 = vmatpush3.bf16.msra.mxu1 %v12193_v19  ;;  %10843 = vmatprep.mubr.bf16.mxu1 %v12754_v52  ;;  %v12200_v52 = vld [vmem:[%s14482_s3 + $0x1e0] sm:$0xff]   ;;  %v2112_v19 = vrot.slane %v2110_v63, 1  ;;  %v12228_v63 = vld [vmem:[%s14482_s3 + $0x150] sm:$0xff]  }
 0x19a   : > { %10857 = vmatprep.subr.bf16.mxu1 %v12195_v48  ;;  %10570 = vmatpush3.bf16.msra.mxu0 %v12194_v39  ;;  %v2115_v39 = vshll.u32 %v2077_v11, 16 }
 0x19b   : > { %10571 = vmatprep.subr.bf16.mxu0 %v12196_v33 }
 0x19d   : > { %10858 = vmatpush3.bf16.msra.mxu1 %v12195_v48  ;;  %10556 = vmatmul.mubr.bf16.gmra.mrb[20].mxu0 %v12746_v40  ;;  %v12201_v40 = vld [vmem:[%s14482_s3 + $0x1e0] sm:$0xff]   ;;  %v12223_v48 = vld [vmem:[%s14482_s3 + $0xb8] sm:$0xff]  }
 0x19e   : > { %10859 = vmatprep.subr.bf16.mxu1 %v12197_v3  ;;  %10572 = vmatpush3.bf16.msra.mxu0 %v12196_v33  ;;  %v2127_v33 = vshll.u32 %v2079_v30, 16 }
 0x19f   : > { %10559 = vmatprep.mubr.bf16.mxu0 %v12797_v43  ;;  %10573 = vmatprep.subr.bf16.mxu0 %v12198_v45 }
 0x1a0   : > { %10844 = vmatmul.mubr.bf16.gmra.mrb[20].mxu1 %v12748_v44  ;;  %v12203_v44 = vld [vmem:[%s14482_s3 + $0x1e8] sm:$0xff]  }
 0x1a1   : > { %10860 = vmatpush3.bf16.msra.mxu1 %v12197_v3  ;;  %10847 = vmatprep.mubr.bf16.mxu1 %v12804_v61  ;;  %v13294_v3 = vld [vmem:[#allocation2 + $0x50] sm:$0xff] }
 0x1a2   : > { %10861 = vmatprep.subr.bf16.mxu1 %v12199_v50  ;;  %10574 = vmatpush3.bf16.msra.mxu0 %v12198_v45  ;;  %v2108_v45 = vshrl.u32 %v2076_v56, 16 }
 0x1a3   : > { %10575 = vmatprep.subr.bf16.mxu0 %v12200_v52 }
 0x1a5   : > { %10862 = vmatpush3.bf16.msra.mxu1 %v12199_v50  ;;  %10560 = vmatmul.mubr.bf16.gmra.mrb[24].mxu0 %v12792_v38  ;;  %v12205_v38 = vld [vmem:[%s14482_s3 + $0x1f0] sm:$0xff]   ;;  %v4036_v50 = vshll.u32 %v3999_v22, 16 }
 0x1a6   : > { %10863 = vmatprep.subr.bf16.mxu1 %v12201_v40  ;;  %10576 = vmatpush3.bf16.msra.mxu0 %v12200_v52  ;;  %v13296_v52 = vld [vmem:[#allocation2 + $0x68] sm:$0xff] }
 0x1a7   : > { %10563 = vmatprep.mubr.bf16.mxu0 %v12849_v9  ;;  %10577 = vmatprep.subr.bf16.mxu0 %v12202_v5 }
 0x1a8   : > { %10848 = vmatmul.mubr.bf16.gmra.mrb[24].mxu1 %v12795_v49  ;;  %v12207_v49 = vld [vmem:[%s14482_s3 + $0x1f8] sm:$0xff]  }
 0x1a9   : > { %10864 = vmatpush3.bf16.msra.mxu1 %v12201_v40  ;;  %10851 = vmatprep.mubr.bf16.mxu1 %v12860_v7 }
 0x1aa   : > { %10865 = vmatprep.subr.bf16.mxu1 %v12203_v44  ;;  %10578 = vmatpush3.bf16.msra.mxu0 %v12202_v5  ;;  %v2120_v5 = vshrl.u32 %v2078_v51, 16  ;;  %v2132_v51 = vshrl.u32 %v13294_v3, 16 }
 0x1ab   : > { %10579 = vmatprep.subr.bf16.mxu0 %v12204_v42 }
 0x1ad   : > { %10866 = vmatpush3.bf16.msra.mxu1 %v12203_v44  ;;  %10564 = vmatmul.mubr.bf16.gmra.mrb[28].mxu0 %v12842_v18 }
 0x1ae   : > { %10867 = vmatprep.subr.bf16.mxu1 %v12205_v38  ;;  %10580 = vmatpush3.bf16.msra.mxu0 %v12204_v42 }
 0x1af   : > { %10583 = vmatprep.mubr.bf16.mxu0 %v12403_v46  ;;  %10581 = vmatprep.subr.bf16.mxu0 %v12206_v29  ;;  %v4001_v46 = vld [vmem:[#allocation2 + $0x100] sm:$0x1] }
 0x1b0   : > { %10852 = vmatmul.mubr.bf16.gmra.mrb[28].mxu1 %v12847_v62  ;;  %v4048_v42 = vshll.u32 %v4001_v46, 16  ;;  %v2170_v46 = vshll.u32 %v13336_v55, 16 }
 0x1b1   : > { %10868 = vmatpush3.bf16.msra.mxu1 %v12205_v38  ;;  %10871 = vmatprep.mubr.bf16.mxu1 %v12404_v58  ;;  %v2124_v58 = vrot.slane %v2122_v28, 1  ;;  %v13304_v38 = vld [vmem:[#allocation2 + $0x110] sm:$0xff] }
 0x1b2   : > { %10869 = vmatprep.subr.bf16.mxu1 %v12207_v49  ;;  %10582 = vmatpush3.bf16.msra.mxu0 %v12206_v29  ;;  %v2113_v29 = vor.u32 %v2112_v19, %v2108_v45  ;;  %v4053_v30 = vshrl.u32 %v13304_v38, 16 }
 0x1b3   : > { %10599 = vmatprep.subr.bf16.mxu0 %v12208_v34 }
 0x1b5   : > { %10870 = vmatpush3.bf16.msra.mxu1 %v12207_v49  ;;  %10584 = vmatmul.mubr.bf16.vlgmr.msra.gmra.mrb[16].mxu0 %v12405_v10  ;;  %v2117_v49 = vrot.slane %v2115_v39, 1  ;;  %v2129_v10 = vrot.slane %v2127_v33, 1  ;;  %v2085_v39 = vld [vmem:[#allocation2 + $0x88] sm:$0x1] }
 0x1b6   : > { %10887 = vmatprep.subr.bf16.mxu1 %v12209_v57  ;;  %10600 = vmatpush3.bf16.msra.mxu0 %v12208_v34  ;;  %v2134_v34 = vshll.u32 %v13294_v3, 16  ;;  %v2087_v3 = vld [vmem:[#allocation2 + $0xa0] sm:$0x1] }
 0x1b7   : > { %10587 = vmatprep.mubr.bf16.mxu0 %v12406_v4  ;;  %10601 = vmatprep.subr.bf16.mxu0 %v12210_v8  ;;  %v2081_v4 = vld [vmem:[#allocation2 + $0x58] sm:$0x1]  ;;  %v13319_v36 = vsel %vm2094_vm1, %v2113_v29, %v2117_v49 }
 0x1b8   : > { %10872 = vmatmul.mubr.bf16.vlgmr.msra.gmra.mrb[16].mxu1 %v12407_v12  ;;  %v2146_v12 = vshll.u32 %v13296_v52, 16  ;;  %v2136_v26 = vrot.slane %v2134_v34, 1  ;;  %v12231_v49 = vld [vmem:[%s14482_s3 + $0x158] sm:$0xff]   ;;  %v2172_v34 = vrot.slane %v2170_v46, 1 }
 0x1b9   : > { %10888 = vmatpush3.bf16.msra.mxu1 %v12209_v57  ;;  %10875 = vmatprep.mubr.bf16.mxu1 %v12408_v1  ;;  %v12225_v57 = vld [vmem:[%s14482_s3 + $0x140] sm:$0xff]   ;;  %v4055_v1 = vshll.u32 %v13304_v38, 16 }
 0x1ba   : > { %10889 = vmatprep.subr.bf16.mxu1 %v12211_v15  ;;  %10602 = vmatpush3.bf16.msra.mxu0 %v12210_v8  ;;  %v2125_v8 = vor.u32 %v2124_v58, %v2120_v5  ;;  %v2148_v21 = vrot.slane %v2146_v12, 1  ;;  %v2137_v11 = vor.u32 %v2136_v26, %v2132_v51  ;;  %v4009_v38 = vld [vmem:[#allocation2 + $0x160] sm:$0x1] }
 0x1bb   : > { %10603 = vmatprep.subr.bf16.mxu0 %v12212_v6 }
 0x1bc   : > { %v13323_v53 = vsel %vm2094_vm1, %v2125_v8, %v2129_v10 }
 0x1bd   : > { %10890 = vmatpush3.bf16.msra.mxu1 %v12211_v15  ;;  %10588 = vmatmul.mubr.bf16.gmra.mrb[20].mxu0 %v12797_v43  ;;  %v12217_v43 = vld [vmem:[%s14482_s3 + $0xa0] sm:$0xff]  }
 0x1be   : > { %10891 = vmatprep.subr.bf16.mxu1 %v12213_v24  ;;  %10604 = vmatpush3.bf16.msra.mxu0 %v12212_v6  ;;  %v4038_v6 = vrot.slane %v4036_v50, 1 }
 0x1bf   : > { %10591 = vmatprep.mubr.bf16.mxu0 %v12409_v0  ;;  %10605 = vmatprep.subr.bf16.mxu0 %v12214_v27  ;;  %v12226_v0 = vld [vmem:[%s14482_s3 + $0x148] sm:$0xff]  }
 0x1c0   : > { %10876 = vmatmul.mubr.bf16.gmra.mrb[20].mxu1 %v12804_v61  ;;  %v12218_v61 = vld [vmem:[%s14482_s3 + $0xa8] sm:$0xff]   ;;  %v13332_v56 = vsel %vm2094_vm1, %v12964_v2, %v4038_v6  ;;  %v2144_v2 = vshrl.u32 %v13296_v52, 16  ;;  %v12230_v52 = vld [vmem:[%s14482_s3 + $0x158] sm:$0xff]   ;;  %v12232_v6 = vld [vmem:[%s14482_s3 + $0x160] sm:$0xff]  }
 0x1c1   : > { %10892 = vmatpush3.bf16.msra.mxu1 %v12213_v24  ;;  %10879 = vmatprep.mubr.bf16.mxu1 %v12410_v14  ;;  %v2083_v24 = vld [vmem:[#allocation2 + $0x70] sm:$0x1] }
 0x1c2   : > { %10893 = vmatprep.subr.bf16.mxu1 %v12215_v13  ;;  %10606 = vmatpush3.bf16.msra.mxu0 %v12214_v27  ;;  %v2151_v16 = vshll.u32 %v2083_v24, 16  ;;  %v2149_v22 = vor.u32 %v2148_v21, %v2144_v2  ;;  %v4011_v2 = vld [vmem:[#allocation2 + $0x178] sm:$0x1] }
 0x1c3   : > { %10607 = vmatprep.subr.bf16.mxu0 %v12216_v31 }
 0x1c5   : > { %10894 = vmatpush3.bf16.msra.mxu1 %v12215_v13  ;;  %10592 = vmatmul.mubr.bf16.gmra.mrb[24].mxu0 %v12849_v9  ;;  %v13277_v9 = vor.u32 %v2100_v41, %v914_v23  ;;  %v13283_v23 = vor.u32 %v4021_v60, %v4017_v25  ;;  %v4050_v13 = vrot.slane %v4048_v42, 1  ;;  %v12227_v41 = vld [vmem:[%s14482_s3 + $0x148] sm:$0xff]   ;;  %v13346_v25 = vld [vmem:[#allocation2 + $0x140] sm:$0xff]  ;;  %v2163_v42 = vshll.u32 %v2085_v39, 16 }
 0x1c6   : > { %10895 = vmatprep.subr.bf16.mxu1 %v12217_v43  ;;  %10608 = vmatpush3.bf16.msra.mxu0 %v12216_v31  ;;  %v4003_v31 = vld [vmem:[#allocation2 + $0x118] sm:$0x1]  ;;  %v4079_v33 = vshll.u32 %v13346_v25, 16 }
 0x1c7   : > { %10595 = vmatprep.mubr.bf16.mxu0 %v12842_v18  ;;  %10609 = vmatprep.subr.bf16.mxu0 %v12218_v61  ;;  %v4000_v18 = vld [vmem:[#allocation2 + $0xf8] sm:$0xff]  ;;  %v2106_v35 = vsel %vm2094_vm1, %v13277_v9, %v2105_v59  ;;  %v4027_v40 = vsel %vm2094_vm1, %v13283_v23, %v4026_v32  ;;  %v4060_v60 = vshll.u32 %v4003_v31, 16  ;;  %v2165_v31 = vrot.slane %v2163_v42, 1  ;;  %v12245_v42 = vld [vmem:[%s14482_s3 + $0x210] sm:$0xff]  }
 0x1c8   : > { %10880 = vmatmul.mubr.bf16.gmra.mrb[24].mxu1 %v12860_v7  ;;  %v12221_v7 = vld [vmem:[%s14482_s3 + $0xb0] sm:$0xff]   ;;  %v4043_v47 = vshll.u32 %v4000_v18, 16  ;;  %v4041_v15 = vshrl.u32 %v4000_v18, 16 }
 0x1c9   : > { %10896 = vmatpush3.bf16.msra.mxu1 %v12217_v43  ;;  %10883 = vmatprep.mubr.bf16.mxu1 %v12847_v62  ;;  %v12222_v62 = vld [vmem:[%s14482_s3 + $0xb8] sm:$0xff]   ;;  %v2139_v43 = vshll.u32 %v2081_v4, 16  ;;  %v4062_v58 = vrot.slane %v4060_v60, 1 }
 0x1ca   : > { %10897 = vmatprep.subr.bf16.mxu1 %v12219_v37  ;;  %10610 = vmatpush3.bf16.msra.mxu0 %v12218_v61  ;;  %v4045_v44 = vrot.slane %v4043_v47, 1  ;;  %v4005_v61 = vld [vmem:[#allocation2 + $0x130] sm:$0x1]  ;;  %v2153_v47 = vrot.slane %v2151_v16, 1  ;;  %v2089_v16 = vld [vmem:[#allocation2 + $0xb8] sm:$0x1] }
 0x1cb   : > { %10611 = vmatprep.subr.bf16.mxu0 %v12220_v54  ;;  %v2141_v28 = vrot.slane %v2139_v43, 1  ;;  %v12233_v43 = vld [vmem:[%s14482_s3 + $0x160] sm:$0xff]  }
 0x1cc   : > { %v4046_v27 = vor.u32 %v4045_v44, %v4041_v15  ;;  %v13368_v29 = vsel %vm2094_vm1, %v2149_v22, %v2153_v47  ;;  %v4081_v15 = vrot.slane %v4079_v33, 1  ;;  %v12236_v47 = vld [vmem:[%s14482_s3 + $0x170] sm:$0xff]  }
 0x1cd   : > { %10898 = vmatpush3.bf16.msra.mxu1 %v12219_v37  ;;  %10596 = vmatmul.mubr.bf16.gmra.mrb[28].mxu0 %v12904_v20  ;;  %v12224_v20 = vld [vmem:[%s14482_s3 + $0x140] sm:$0xff]   ;;  %v13364_v5 = vsel %vm2094_vm1, %v2137_v11, %v2141_v28  ;;  %v12235_v28 = vld [vmem:[%s14482_s3 + $0x168] sm:$0xff]  }
 0x1ce   : > { %10899 = vmatprep.subr.bf16.mxu1 %v12221_v7  ;;  %10612 = vmatpush3.bf16.msra.mxu0 %v12220_v54  ;;  %v13328_v37 = vld [vmem:[#allocation2 + $0x80] sm:$0xff]  ;;  %v4057_v54 = vrot.slane %v4055_v1, 1  ;;  %v13340_v59 = vsel %vm2094_vm1, %v4046_v27, %v4050_v13  ;;  %v2168_v1 = vshrl.u32 %v13336_v55, 16  ;;  %v4096_v27 = vshll.u32 %v4009_v38, 16  ;;  %v4010_v13 = vld [vmem:[#allocation2 + $0x170] sm:$0xff]  ;;  %v12246_v38 = vld [vmem:[%s14482_s3 + $0x218] sm:$0xff]  }
 0x1cf   : > { %10615 = vmatprep.mubr.bf16.mxu0 %v2106_v35  ;;  %10613 = vmatprep.subr.bf16.mxu0 %v12222_v62  ;;  %v2158_v32 = vshll.u32 %v13328_v37, 16  ;;  %v12229_v35 = vld [vmem:[%s14482_s3 + $0x150] sm:$0xff]   ;;  %v2156_v10 = vshrl.u32 %v13328_v37, 16  ;;  %v4101_v46 = vshrl.u32 %v4010_v13, 16 }
 0x1d0   : > { %10884 = vmatmul.mubr.bf16.gmra.mrb[28].mxu1 %v12877_v17  ;;  %v13307_v17 = vld [vmem:[#allocation2 + $0x128] sm:$0xff]  ;;  %v4098_v55 = vrot.slane %v4096_v27, 1 }
 0x1d1   : > { %10900 = vmatpush3.bf16.msra.mxu1 %v12221_v7  ;;  %10903 = vmatprep.mubr.bf16.mxu1 %v4027_v40  ;;  %v4067_v14 = vshll.u32 %v13307_v17, 16  ;;  %v4072_v7 = vshll.u32 %v4005_v61, 16  ;;  %v4065_v19 = vshrl.u32 %v13307_v17, 16  ;;  %v4007_v40 = vld [vmem:[#allocation2 + $0x148] sm:$0x1]  ;;  %v2160_v44 = vrot.slane %v2158_v32, 1 }
 0x1d2   : > { %10901 = vmatprep.subr.bf16.mxu1 %v12223_v48  ;;  %10614 = vmatpush3.bf16.msra.mxu0 %v12222_v62  ;;  %v13351_v62 = vld [vmem:[#allocation2 + $0x158] sm:$0xff]  ;;  %v2175_v17 = vshll.u32 %v2087_v3, 16  ;;  %v4084_v4 = vshll.u32 %v4007_v40, 16  ;;  %v2173_v61 = vor.u32 %v2172_v34, %v2168_v1  ;;  %v12240_v40 = vld [vmem:[%s14482_s3 + $0x200] sm:$0xff]  }
 0x1d3   : > { %10631 = vmatprep.subr.bf16.mxu0 %v12224_v20  ;;  %v4069_v18 = vrot.slane %v4067_v14, 1  ;;  %v4074_v50 = vrot.slane %v4072_v7, 1  ;;  %v4077_v14 = vshrl.u32 %v13346_v25, 16  ;;  %v4089_v21 = vshrl.u32 %v13351_v62, 16  ;;  %v12238_v3 = vld [vmem:[%s14482_s3 + $0x178] sm:$0xff]   ;;  %v12248_v34 = vld [vmem:[%s14482_s3 + $0x220] sm:$0xff]  }
 0x1d4   : > { %v4086_v51 = vrot.slane %v4084_v4, 1  ;;  %v2187_v25 = vshll.u32 %v2089_v16, 16  ;;  %v12250_v4 = vld [vmem:[%s14482_s3 + $0x228] sm:$0xff]   ;;  %v12255_v16 = vld [vmem:[%s14482_s3 + $0x238] sm:$0xff]  }
 0x1d5   : > { %10902 = vmatpush3.bf16.msra.mxu1 %v12223_v48  ;;  %10616 = vmatmul.mubr.bf16.vlgmr.msra.gmra.mrb[16].mxu0 %v13319_v36  ;;  %v4058_v48 = vor.u32 %v4057_v54, %v4053_v30  ;;  %v4070_v45 = vor.u32 %v4069_v18, %v4065_v19  ;;  %v4082_v37 = vor.u32 %v4081_v15, %v4077_v14  ;;  %v4103_v54 = vshll.u32 %v4010_v13, 16 }
 0x1d6   : > { %10919 = vmatprep.subr.bf16.mxu1 %v12225_v57  ;;  %10632 = vmatpush3.bf16.msra.mxu0 %v12224_v20  ;;  %v4091_v20 = vshll.u32 %v13351_v62, 16  ;;  %v2189_v39 = vrot.slane %v2187_v25, 1 }
 0x1d7   : > { %10619 = vmatprep.mubr.bf16.mxu0 %v13323_v53  ;;  %10633 = vmatprep.subr.bf16.mxu0 %v12226_v0  ;;  %v13374_v8 = vsel %vm2094_vm1, %v4058_v48, %v4062_v58  ;;  %v13380_v12 = vsel %vm2094_vm1, %v4070_v45, %v4074_v50  ;;  %v13406_v30 = vsel %vm2094_vm1, %v4082_v37, %v4086_v51  ;;  %v4105_v62 = vrot.slane %v4103_v54, 1  ;;  %v12237_v48 = vld [vmem:[%s14482_s3 + $0x170] sm:$0xff]   ;;  %v12239_v50 = vld [vmem:[%s14482_s3 + $0x178] sm:$0xff]   ;;  %v12256_v51 = vld [vmem:[%s14484_s5 + $0xc0] sm:$0xff]  }
 0x1d8   : > { %10904 = vmatmul.mubr.bf16.vlgmr.msra.gmra.mrb[16].mxu1 %v13332_v56  ;;  %v4093_v24 = vrot.slane %v4091_v20, 1  ;;  %v12241_v20 = vld [vmem:[%s14482_s3 + $0x200] sm:$0xff]   ;;  %v12259_v54 = vld [vmem:[%s14484_s5 + $0xc8] sm:$0xff]  }
 0x1d9   : > { %10920 = vmatpush3.bf16.msra.mxu1 %v12225_v57  ;;  %10907 = vmatprep.mubr.bf16.mxu1 %v13340_v59  ;;  %v2088_v57 = vld [vmem:[#allocation2 + $0xb0] sm:$0xff]  ;;  %v4106_v58 = vor.u32 %v4105_v62, %v4101_v46  ;;  %v12264_v62 = vld [vmem:[%s14484_s5 + $0xe0] sm:$0xff]   ;;  %v12270_v46 = vld [vmem:[%s14484_s5 + $0xf8] sm:$0xff]  }
 0x1da   : > { %10921 = vmatprep.subr.bf16.mxu1 %v12227_v41  ;;  %10634 = vmatpush3.bf16.msra.mxu0 %v12226_v0  ;;  %v2161_v0 = vor.u32 %v2160_v44, %v2156_v10  ;;  %v2182_v26 = vshll.u32 %v2088_v57, 16  ;;  %v4094_v60 = vor.u32 %v4093_v24, %v4089_v21  ;;  %v2180_v32 = vshrl.u32 %v2088_v57, 16  ;;  %v12243_v44 = vld [vmem:[%s14482_s3 + $0x208] sm:$0xff]   ;;  %v12249_v57 = vld [vmem:[%s14482_s3 + $0x220] sm:$0xff]   ;;  %v2091_v10 = vld [vmem:[#allocation2 + $0xd0] sm:$0x1] }
 0x1db   : > { %10635 = vmatprep.subr.bf16.mxu0 %v12228_v63  ;;  %v2385_v1 = vshll.u32 %v2091_v10, 16  ;;  %v12251_v24 = vld [vmem:[%s14482_s3 + $0x228] sm:$0xff]   ;;  %v13577_v10 = vld [vmem:[%s14483_s4] ss:$0 sm:$0xff] }
 0x1dc   : > { %v13396_v18 = vsel %vm2094_vm1, %v2161_v0, %v2165_v31  ;;  %v2184_v7 = vrot.slane %v2182_v26, 1  ;;  %v13411_v22 = vsel %vm2094_vm1, %v4094_v60, %v4098_v55  ;;  %v12252_v0 = vld [vmem:[%s14482_s3 + $0x230] sm:$0xff]   ;;  %v4015_v60 = vld [vmem:[#allocation2 + $0x1a8] sm:$0x1] }
 0x1dd   : > { %10922 = vmatpush3.bf16.msra.mxu1 %v12227_v41  ;;  %10620 = vmatmul.mubr.bf16.gmra.mrb[20].mxu0 %v13364_v5  ;;  %v2177_v41 = vrot.slane %v2175_v17, 1  ;;  %v4012_v17 = vld [vmem:[#allocation2 + $0x188] sm:$0xff]  ;;  %v2387_v31 = vrot.slane %v2385_v1, 1  ;;  %v12253_v26 = vld [vmem:[%s14482_s3 + $0x230] sm:$0xff]  }
 0x1de   : > { %10923 = vmatprep.subr.bf16.mxu1 %v12229_v35  ;;  %10636 = vmatpush3.bf16.msra.mxu0 %v12228_v63  ;;  %v12234_v63 = vld [vmem:[%s14482_s3 + $0x168] sm:$0xff]   ;;  %v2185_v19 = vor.u32 %v2184_v7, %v2180_v32  ;;  %v4300_v15 = vshll.u32 %v4012_v17, 16  ;;  %v4298_v14 = vshrl.u32 %v4012_v17, 16  ;;  %v12262_v32 = vld [vmem:[%s14484_s5 + $0xd8] sm:$0xff]  }
 0x1df   : > { %10623 = vmatprep.mubr.bf16.mxu0 %v13368_v29  ;;  %10637 = vmatprep.subr.bf16.mxu0 %v12230_v52  ;;  %v13400_v11 = vsel %vm2094_vm1, %v2173_v61, %v2177_v41  ;;  %v12254_v41 = vld [vmem:[%s14482_s3 + $0x238] sm:$0xff]   ;;  %v2388_v21 = vsel %vm2094_vm1, %v13283_v23, %v2387_v31  ;;  %v12257_v23 = vld [vmem:[%s14484_s5 + $0xc0] sm:$0xff]  }
 0x1e0   : > { %10908 = vmatmul.mubr.bf16.gmra.mrb[20].mxu1 %v13374_v8  ;;  %v13424_v45 = vsel %vm2094_vm1, %v2185_v19, %v2189_v39  ;;  %v4302_v27 = vrot.slane %v4300_v15, 1  ;;  %v12268_v19 = vld [vmem:[%s14484_s5 + $0xf0] sm:$0xff]  }
 0x1e1   : > { %10924 = vmatpush3.bf16.msra.mxu1 %v12229_v35  ;;  %10911 = vmatprep.mubr.bf16.mxu1 %v13380_v12  ;;  %v4108_v35 = vshll.u32 %v4011_v2, 16  ;;  %v12269_v39 = vld [vmem:[%s14484_s5 + $0xf0] sm:$0xff]  }
 0x1e2   : > { %10925 = vmatprep.subr.bf16.mxu1 %v12231_v49  ;;  %10638 = vmatpush3.bf16.msra.mxu0 %v12230_v52 }
 0x1e3   : > { %10639 = vmatprep.subr.bf16.mxu0 %v12232_v6  ;;  %v4110_v33 = vrot.slane %v4108_v35, 1  ;;  %v12265_v35 = vld [vmem:[%s14484_s5 + $0xe0] sm:$0xff]  }
 0x1e5   : > { %10926 = vmatpush3.bf16.msra.mxu1 %v12231_v49  ;;  %10624 = vmatmul.mubr.bf16.gmra.mrb[24].mxu0 %v13396_v18  ;;  %v13431_v52 = vsel %vm2094_vm1, %v4106_v58, %v4110_v33  ;;  %v12247_v49 = vld [vmem:[%s14482_s3 + $0x218] sm:$0xff]   ;;  %v13565_v58 = vld [vmem:[%s14484_s5] sm:$0xff]  }
 0x1e6   : > { %10927 = vmatprep.subr.bf16.mxu1 %v12233_v43  ;;  %10640 = vmatpush3.bf16.msra.mxu0 %v12232_v6  ;;  %v4013_v6 = vld [vmem:[#allocation2 + $0x190] sm:$0x1]  ;;  %v13570_v33 = vld [vmem:[%s14484_s5] sm:$0xff]  }
 0x1e7   : > { %10627 = vmatprep.mubr.bf16.mxu0 %v13400_v11  ;;  %10641 = vmatprep.subr.bf16.mxu0 %v12234_v63  ;;  %v4305_v13 = vshll.u32 %v4013_v6, 16  ;;  %v4745_v6 = vld [vmem:[#allocation3 + $0x90] sm:$0x80] }
 0x1e8   : > { %10912 = vmatmul.mubr.bf16.gmra.mrb[24].mxu1 %v13406_v30 }
 0x1e9   : > { %10928 = vmatpush3.bf16.msra.mxu1 %v12233_v43  ;;  %10915 = vmatprep.mubr.bf16.mxu1 %v13411_v22  ;;  %v4303_v43 = vor.u32 %v4302_v27, %v4298_v14  ;;  %v4307_v61 = vrot.slane %v4305_v13, 1  ;;  %v6718_v27 = vld [vmem:[#allocation3 + $0x150] sm:$0x80] }
 0x1ea   : > { %10929 = vmatprep.subr.bf16.mxu1 %v12235_v28  ;;  %10642 = vmatpush3.bf16.msra.mxu0 %v12234_v63  ;;  %v4495_v63 = vshll.u32 %v4015_v60, 16 }
 0x1eb   : > { %10643 = vmatprep.subr.bf16.mxu0 %v12236_v47  ;;  %v4308_v37 = vsel %vm2094_vm1, %v4303_v43, %v4307_v61 }
 0x1ec   : > { %v4497_v7 = vrot.slane %v4495_v63, 1 }
 0x1ed   : > { %10930 = vmatpush3.bf16.msra.mxu1 %v12235_v28  ;;  %10628 = vmatmul.mubr.bf16.gmra.mrb[28].mxu0 %v13424_v45  ;;  %v12260_v28 = vld [vmem:[%s14484_s5 + $0xd0] sm:$0xff]  }
 0x1ee   : > { %10931 = vmatprep.subr.bf16.mxu1 %v12237_v48  ;;  %10644 = vmatpush3.bf16.msra.mxu0 %v12236_v47  ;;  %v12267_v47 = vld [vmem:[%s14484_s5 + $0xe8] sm:$0xff]  }
 0x1ef   : > { %10647 = vmatprep.mubr.bf16.mxu0 %v13319_v36  ;;  %10645 = vmatprep.subr.bf16.mxu0 %v12238_v3  ;;  %v12242_v36 = vld [vmem:[%s14482_s3 + $0x208] sm:$0xff]  }
 0x1f0   : > { %10916 = vmatmul.mubr.bf16.gmra.mrb[28].mxu1 %v13431_v52 }
 0x1f1   : > { %10932 = vmatpush3.bf16.msra.mxu1 %v12237_v48  ;;  %10935 = vmatprep.mubr.bf16.mxu1 %v13332_v56  ;;  %v12244_v56 = vld [vmem:[%s14482_s3 + $0x210] sm:$0xff]   ;;  %v12271_v48 = vld [vmem:[%s14484_s5 + $0xf8] sm:$0xff]  }
 0x1f2   : > { %10933 = vmatprep.subr.bf16.mxu1 %v12239_v50  ;;  %10646 = vmatpush3.bf16.msra.mxu0 %v12238_v3  ;;  %v4735_v3 = vld [vmem:[#allocation3 + $0x18] sm:$0x80] }
 0x1f3   : > { %10663 = vmatprep.subr.bf16.mxu0 %v12240_v40 }
 0x1f5   : > { %10934 = vmatpush3.bf16.msra.mxu1 %v12239_v50  ;;  %10648 = vmatmul.mubr.bf16.vlgmr.msra.gmra.mrb[16].mxu0 %v13323_v53  ;;  %v4737_v50 = vld [vmem:[#allocation3 + $0x30] sm:$0x80] }
 0x1f6   : > { %10951 = vmatprep.subr.bf16.mxu1 %v12241_v20  ;;  %10664 = vmatpush3.bf16.msra.mxu0 %v12240_v40  ;;  %v4739_v40 = vld [vmem:[#allocation3 + $0x48] sm:$0x80] }
 0x1f7   : > { %10651 = vmatprep.mubr.bf16.mxu0 %v13364_v5  ;;  %10665 = vmatprep.subr.bf16.mxu0 %v12242_v36  ;;  %v4790_v17 = vshrl.u32 %v4739_v40, 16 }
 0x1f8   : > { %10936 = vmatmul.mubr.bf16.vlgmr.msra.gmra.mrb[16].mxu1 %v13340_v59 }
 0x1f9   : > { %10952 = vmatpush3.bf16.msra.mxu1 %v12241_v20  ;;  %10939 = vmatprep.mubr.bf16.mxu1 %v13374_v8  ;;  %v4766_v20 = vshrl.u32 %v4735_v3, 16 }
 0x1fa   : > { %10953 = vmatprep.subr.bf16.mxu1 %v12243_v44  ;;  %10666 = vmatpush3.bf16.msra.mxu0 %v12242_v36  ;;  %v6712_v36 = vld [vmem:[#allocation3 + $0x108] sm:$0x80] }
 0x1fb   : > { %10667 = vmatprep.subr.bf16.mxu0 %v12244_v56  ;;  %v6763_v15 = vshrl.u32 %v6712_v36, 16 }
 0x1fd   : > { %10954 = vmatpush3.bf16.msra.mxu1 %v12243_v44  ;;  %10652 = vmatmul.mubr.bf16.gmra.mrb[20].mxu0 %v13368_v29  ;;  %v4741_v44 = vld [vmem:[#allocation3 + $0x60] sm:$0x80] }
 0x1fe   : > { %10955 = vmatprep.subr.bf16.mxu1 %v12245_v42  ;;  %10668 = vmatpush3.bf16.msra.mxu0 %v12244_v56 }
 0x1ff   : > { %10655 = vmatprep.mubr.bf16.mxu0 %v13396_v18  ;;  %10669 = vmatprep.subr.bf16.mxu0 %v12246_v38 }
 0x200   : > { %10940 = vmatmul.mubr.bf16.gmra.mrb[20].mxu1 %v13380_v12 }
 0x201   : > { %10956 = vmatpush3.bf16.msra.mxu1 %v12245_v42  ;;  %10943 = vmatprep.mubr.bf16.mxu1 %v13406_v30  ;;  %v4778_v42 = vshrl.u32 %v4737_v50, 16 }
 0x202   : > { %10957 = vmatprep.subr.bf16.mxu1 %v12247_v49  ;;  %10670 = vmatpush3.bf16.msra.mxu0 %v12246_v38  ;;  %v6714_v38 = vld [vmem:[#allocation3 + $0x120] sm:$0x80] }
 0x203   : > { %10671 = vmatprep.subr.bf16.mxu0 %v12248_v34  ;;  %v6775_v1 = vshrl.u32 %v6714_v38, 16  ;;  %v13583_v14 = vrot.slane %v4778_v42, 7 }
 0x205   : > { %10958 = vmatpush3.bf16.msra.mxu1 %v12247_v49  ;;  %10656 = vmatmul.mubr.bf16.gmra.mrb[24].mxu0 %v13400_v11  ;;  %v4743_v49 = vld [vmem:[#allocation3 + $0x78] sm:$0x80]  ;;  %v13597_v63 = vrot.slane %v6775_v1, 7 }
 0x206   : > { %10959 = vmatprep.subr.bf16.mxu1 %v12249_v57  ;;  %10672 = vmatpush3.bf16.msra.mxu0 %v12248_v34 }
 0x207   : > { %10659 = vmatprep.mubr.bf16.mxu0 %v13424_v45  ;;  %10673 = vmatprep.subr.bf16.mxu0 %v12250_v4 }
 0x208   : > { %10944 = vmatmul.mubr.bf16.gmra.mrb[24].mxu1 %v13411_v22 }
 0x209   : > { %10960 = vmatpush3.bf16.msra.mxu1 %v12249_v57  ;;  %10947 = vmatprep.mubr.bf16.mxu1 %v13431_v52  ;;  %v6716_v57 = vld [vmem:[#allocation3 + $0x138] sm:$0x80] }
 0x20a   : > { %10961 = vmatprep.subr.bf16.mxu1 %v12251_v24  ;;  %10674 = vmatpush3.bf16.msra.mxu0 %v12250_v4  ;;  %v4802_v4 = vshrl.u32 %v4741_v44, 16 }
 0x20b   : > { %10675 = vmatprep.subr.bf16.mxu0 %v12252_v0 }
 0x20d   : > { %10962 = vmatpush3.bf16.msra.mxu1 %v12251_v24  ;;  %10660 = vmatmul.mubr.bf16.gmra.mrb[28].mxu0 %v2388_v21  ;;  %v4814_v24 = vshrl.u32 %v4743_v49, 16 }
 0x20e   : > { %10963 = vmatprep.subr.bf16.mxu1 %v12253_v26  ;;  %10676 = vmatpush3.bf16.msra.mxu0 %v12252_v0  ;;  %v13579_v0 = vrot.slane %v4766_v20, 7 }
 0x20f   : > { %10679 = vmatprep.mubr.bf16.mxu0 %v13323_v53  ;;  %10677 = vmatprep.subr.bf16.mxu0 %v12254_v41  ;;  %v12258_v53 = vld [vmem:[%s14484_s5 + $0xc8] sm:$0xff]  }
 0x210   : > { %10948 = vmatmul.mubr.bf16.gmra.mrb[28].mxu1 %v4308_v37 }
 0x211   : > { %10964 = vmatpush3.bf16.msra.mxu1 %v12253_v26  ;;  %10967 = vmatprep.mubr.bf16.mxu1 %v13340_v59  ;;  %v2092_v59 = vld [vmem:[#allocation2 + $0xe0] sm:$0xff]  ;;  %v6787_v26 = vshrl.u32 %v6716_v57, 16 }
 0x212   : > { %10965 = vmatprep.subr.bf16.mxu1 %v12255_v16  ;;  %10678 = vmatpush3.bf16.msra.mxu0 %v12254_v41 }
 0x213   : > { %10983 = vmatprep.subr.bf16.mxu0 %v12256_v51 }
 0x215   : > { %10966 = vmatpush3.bf16.msra.mxu1 %v12255_v16  ;;  %10680 = vmatmul.mubr.bf16.vlgmr.msra.gmra.mrb[16].mxu0 %v13364_v5  ;;  %v2571_v5 = vshll.u32 %v2092_v59, 16  ;;  %v4826_v16 = vshrl.u32 %v4745_v6, 16 }
 0x216   : > { %11271 = vmatprep.subr.bf16.mxu1 %v12257_v23  ;;  %10683 = vmatprep.mubr.bf16.mxu0 %v13368_v29  ;;  %v2093_v29 = vld [vmem:[#allocation2 + $0xe8] sm:$0x1] }
 0x217   : > { %10984 = vmatpush3.bf16.msra.mxu0 %v12256_v51  ;;  %v2576_v55 = vshll.u32 %v2093_v29, 16 }
 0x218   : > { %10968 = vmatmul.mubr.bf16.vlgmr.msra.gmra.mrb[16].mxu1 %v13374_v8  ;;  %10985 = vmatprep.subr.bf16.mxu0 %v12258_v53  ;;  %v2573_v8 = vrot.slane %v2571_v5, 1  ;;  %v6799_v5 = vshrl.u32 %v6718_v27, 16 }
 0x219   : > { %10971 = vmatprep.mubr.bf16.mxu1 %v13380_v12  ;;  %11272 = vmatpush3.bf16.msra.mxu1 %v12257_v23  ;;  %v2569_v12 = vshrl.u32 %v2092_v59, 16  ;;  %v13593_v59 = vrot.slane %v4802_v4, 7 }
 0x21a   : > { %11273 = vmatprep.subr.bf16.mxu1 %v12259_v54 }
 0x21b   : > { %10986 = vmatpush3.bf16.msra.mxu0 %v12258_v53  ;;  %v2574_v2 = vor.u32 %v2573_v8, %v2569_v12  ;;  %v13599_v12 = vrot.slane %v4814_v24, 7 }
 0x21c   : > { %10987 = vmatprep.subr.bf16.mxu0 %v12260_v28 }
 0x21d   : > { %11274 = vmatpush3.bf16.msra.mxu1 %v12259_v54  ;;  %10684 = vmatmul.mubr.bf16.gmra.mrb[20].mxu0 %v13396_v18  ;;  %v2578_v18 = vrot.slane %v2576_v55, 1  ;;  %v13591_v54 = vrot.slane %v6763_v15, 7 }
 0x21e   : > { %10687 = vmatprep.mubr.bf16.mxu0 %v13400_v11  ;;  %v4498_v11 = vsel %vm2094_vm1, %v13277_v9, %v4497_v7  ;;  %v12263_v9 = vld [vmem:[%s14484_s5 + $0xd8] sm:$0xff]  }
 0x21f   : > { %v2579_v25 = vsel %vm2094_vm1, %v2574_v2, %v2578_v18  ;;  %10988 = vmatpush3.bf16.msra.mxu0 %v12260_v28  ;;  %v13605_v28 = vld [vmem:[#allocation3 + $0x168] sm:$0x80] }
 0x220   : > { %10972 = vmatmul.mubr.bf16.gmra.mrb[20].mxu1 %v13406_v30  ;;  %v12261_v30 = vld [vmem:[%s14484_s5 + $0xd0] sm:$0xff]   ;;  %10989 = vmatprep.subr.bf16.mxu0 %v12262_v32 }
 0x221   : > { %10975 = vmatprep.mubr.bf16.mxu1 %v13411_v22  ;;  %11275 = vmatprep.subr.bf16.mxu1 %v12261_v30  ;;  %v12266_v22 = vld [vmem:[%s14484_s5 + $0xe8] sm:$0xff]  }
 0x222   : > { %11276 = vmatpush3.bf16.msra.mxu1 %v12261_v30 }
 0x223   : > { %11277 = vmatprep.subr.bf16.mxu1 %v12263_v9  ;;  %10990 = vmatpush3.bf16.msra.mxu0 %v12262_v32 }
 0x224   : > { %10991 = vmatprep.subr.bf16.mxu0 %v12264_v62 }
 0x225   : > { %10688 = vmatmul.mubr.bf16.gmra.mrb[24].mxu0 %v13424_v45  ;;  %v6708_v45 = vld [vmem:[#allocation3 + $0xd8] sm:$0x80] }
 0x226   : > { %10691 = vmatprep.mubr.bf16.mxu0 %v2388_v21  ;;  %11278 = vmatpush3.bf16.msra.mxu1 %v12263_v9  ;;  %v6739_v56 = vshrl.u32 %v6708_v45, 16  ;;  %v13588_v21 = vrot.slane %v4790_v17, 7  ;;  %v6811_v45 = vshrl.u32 %v13605_v28, 16  ;;  %v12286_v28 = vld [vmem:[%s14484_s5 + $0x38] sm:$0xff]  }
 0x227   : > { %11279 = vmatprep.subr.bf16.mxu1 %v12265_v35  ;;  %10992 = vmatpush3.bf16.msra.mxu0 %v12264_v62 }
 0x228   : > { %10976 = vmatmul.mubr.bf16.gmra.mrb[24].mxu1 %v13431_v52  ;;  %10993 = vmatprep.subr.bf16.mxu0 %v12266_v22  ;;  %v6710_v52 = vld [vmem:[#allocation3 + $0xf0] sm:$0x80]  ;;  %v13581_v31 = vrot.slane %v6739_v56, 7 }
 0x229   : > { %10979 = vmatprep.mubr.bf16.mxu1 %v4308_v37  ;;  %v6751_v34 = vshrl.u32 %v6710_v52, 16  ;;  %v4747_v37 = vld [vmem:[#allocation3 + $0xa8] sm:$0x80] }
 0x22a   : > { %11280 = vmatpush3.bf16.msra.mxu1 %v12265_v35  ;;  %v13608_v35 = vrot.slane %v4826_v16, 7 }
 0x22b   : > { %11281 = vmatprep.subr.bf16.mxu1 %v12267_v47  ;;  %10994 = vmatpush3.bf16.msra.mxu0 %v12266_v22  ;;  %v13586_v41 = vrot.slane %v6751_v34, 7 }
 0x22c   : > { %10995 = vmatprep.subr.bf16.mxu0 %v12268_v19 }
 0x22d   : > { %10692 = vmatmul.mubr.bf16.gmra.mrb[28].mxu0 %v2579_v25  ;;  %v13603_v25 = vrot.slane %v6787_v26, 7 }
 0x22e   : > { %11282 = vmatpush3.bf16.msra.mxu1 %v12267_v47 }
 0x22f   : > { %11283 = vmatprep.subr.bf16.mxu1 %v12269_v39  ;;  %10996 = vmatpush3.bf16.msra.mxu0 %v12268_v19 }
 0x230   : > { %10980 = vmatmul.mubr.bf16.gmra.mrb[28].mxu1 %v4498_v11  ;;  %10997 = vmatprep.subr.bf16.mxu0 %v12270_v46  ;;  %v4838_v11 = vshrl.u32 %v4747_v37, 16 }
 0x232   : > { %11284 = vmatpush3.bf16.msra.mxu1 %v12269_v39  ;;  %v13611_v39 = vrot.slane %v6799_v5, 7  ;;  %v13618_v36 = vrot.slane %v4838_v11, 7 }
 0x233   : > { %11285 = vmatprep.subr.bf16.mxu1 %v12271_v48  ;;  %10998 = vmatpush3.bf16.msra.mxu0 %v12270_v46 }
 0x234   : > { %11015 = vmatprep.subr.bf16.mxu0 %v13565_v58 }
 0x236   : > { %11286 = vmatpush3.bf16.msra.mxu1 %v12271_v48 }
 0x237   : > { %11303 = vmatprep.subr.bf16.mxu1 %v13570_v33 }
 0x2e8   : > { %v10681_v13 = vpop.f32.mrb[16].mxu0 }
 0x2e9   : > { %v2768_v43 = vadd.f32 %v10681_v13, %v13577_v10  ;;  %v2680_v61 = vpop.f32.mrb[17].mxu0 }
 0x2ea   : > { %v2766_v23 = vadd.f32 %v13577_v10, %v2680_v61  ;;  %v10682_v53 = vpop.f32.mrb[18].mxu0 }
 0x2eb   : > { %v10969_v51 = vpop.f32.mrb[16].mxu1  ;;  %v2769_v8 = vadd.f32 %v10682_v53, %v13577_v10  ;;  %v2683_v55 = vpop.f32.mrb[19].mxu0  ;;  %v2784_v30 = vmax.f32 %v2768_v43, 0.0 }
 0x2ec   : > { %v4686_v29 = vadd.f32 %v10969_v51, %v13577_v10  ;;  %v4598_v60 = vpop.f32.mrb[17].mxu1  ;;  %v2767_v7 = vadd.f32 %v13577_v10, %v2683_v55  ;;  %v2782_v22 = vmax.f32 %v2766_v23, 0.0 }
 0x2ed   : > { %v4684_v2 = vadd.f32 %v13577_v10, %v4598_v60  ;;  %v10970_v18 = vpop.f32.mrb[18].mxu1  ;;  %v2785_v32 = vmax.f32 %v2769_v8, 0.0 }
 0x2ee   : > { %v4687_v9 = vadd.f32 %v10970_v18, %v13577_v10  ;;  %v4601_v62 = vpop.f32.mrb[19].mxu1  ;;  %v2783_v47 = vmax.f32 %v2767_v7, 0.0  ;;  %v4702_v46 = vmax.f32 %v4686_v29, 0.0 }
 0x2ef   : > { %v4685_v19 = vadd.f32 %v13577_v10, %v4601_v62  ;;  %v13613_v48 = vpack.c.bf16 %v2785_v32, %v2784_v30  ;;  %v4700_v50 = vmax.f32 %v4684_v2, 0.0 }
 0x2f0   : > { %v4703_v3 = vmax.f32 %v4687_v9, 0.0  ;;  %v13616_v52 = vpack.c.bf16 %v2783_v47, %v2782_v22  ;;  %v10685_v20 = vpop.f32.mrb[20].mxu0 }
 0x2f1   : > { %v4701_v40 = vmax.f32 %v4685_v19, 0.0  ;;  %2808 = vst [vmem:[#allocation3 + $0x38] sm:$0xff] %v13613_v48  ;;  %v2772_v56 = vadd.f32 %v10685_v20, %v13577_v10  ;;  %v2696_v42 = vpop.f32.mrb[21].mxu0  ;;  %v4782_v38 = vshrl.u32 %v13613_v48, 16  ;;  %v4785_v49 = vshll.u32 %v13613_v48, 16 }
 0x2f2   : > { %v13621_v44 = vpack.c.bf16 %v4703_v3, %v4702_v46  ;;  %2807 = vst [vmem:[#allocation3 + $0x20] sm:$0xff] %v13616_v52  ;;  %v2770_v57 = vadd.f32 %v13577_v10, %v2696_v42  ;;  %v10686_v15 = vpop.f32.mrb[22].mxu0  ;;  %v4770_v4 = vshrl.u32 %v13616_v52, 16  ;;  %v4773_v6 = vshll.u32 %v13616_v52, 16  ;;  %v12274_v42 = vld [vmem:[%s14484_s5 + $0x8] sm:$0xff]  }
 0x2f3   : > { %v13627_v34 = vpack.c.bf16 %v4701_v40, %v4700_v50  ;;  %v10973_v17 = vpop.f32.mrb[20].mxu1  ;;  %v2788_v1 = vmax.f32 %v2772_v56, 0.0  ;;  %v2773_v13 = vadd.f32 %v10686_v15, %v13577_v10  ;;  %v2699_v26 = vpop.f32.mrb[23].mxu0  ;;  %v4784_v43 = vrot.slane %v4782_v38, 7 }
 0x2f4   : > { %4726 = vst [vmem:[#allocation3 + $0xf8] sm:$0xff] %v13621_v44  ;;  %v4690_v24 = vadd.f32 %v10973_v17, %v13577_v10  ;;  %v4614_v27 = vpop.f32.mrb[21].mxu1  ;;  %v2786_v61 = vmax.f32 %v2770_v57, 0.0  ;;  %v2771_v51 = vadd.f32 %v13577_v10, %v2699_v26  ;;  %v4772_v23 = vrot.slane %v4770_v4, 7 }
 0x2f5   : > { %4725 = vst [vmem:[#allocation3 + $0xe0] sm:$0xff] %v13627_v34  ;;  %v4688_v16 = vadd.f32 %v13577_v10, %v4614_v27  ;;  %v10974_v37 = vpop.f32.mrb[22].mxu1  ;;  %v2789_v5 = vmax.f32 %v2773_v13, 0.0  ;;  %v6743_v8 = vshrl.u32 %v13627_v34, 16  ;;  %v6746_v9 = vshll.u32 %v13627_v34, 16 }
 0x2f6   : > { %v4706_v53 = vmax.f32 %v4690_v24, 0.0  ;;  %v4691_v29 = vadd.f32 %v10974_v37, %v13577_v10  ;;  %v4617_v60 = vpop.f32.mrb[23].mxu1  ;;  %v2787_v2 = vmax.f32 %v2771_v51, 0.0  ;;  %v4775_v7 = vor.u32 %v4773_v6, %v4772_v23 }
 0x2f7   : > { %v4704_v55 = vmax.f32 %v4688_v16, 0.0  ;;  %v4689_v18 = vadd.f32 %v13577_v10, %v4617_v60  ;;  %v13641_v11 = vpack.c.bf16 %v2789_v5, %v2788_v1  ;;  %v6745_v32 = vrot.slane %v6743_v8, 7  ;;  %v12276_v5 = vld [vmem:[%s14484_s5 + $0x10] sm:$0xff]  }
 0x2f8   : > { %v4707_v30 = vmax.f32 %v4691_v29, 0.0  ;;  %v13644_v62 = vpack.c.bf16 %v2787_v2, %v2786_v61  ;;  %v10689_v47 = vpop.f32.mrb[24].mxu0  ;;  %v13648_v19 = vsel %vm908_vm0, %v13579_v0, %v4775_v7  ;;  %v4787_v46 = vor.u32 %v4785_v49, %v4784_v43 }
 0x2f9   : > { %v4705_v22 = vmax.f32 %v4689_v18, 0.0  ;;  %2810 = vst [vmem:[#allocation3 + $0x68] sm:$0xff] %v13641_v11  ;;  %v2776_v50 = vadd.f32 %v10689_v47, %v13577_v10  ;;  %v2712_v40 = vpop.f32.mrb[25].mxu0  ;;  %10999 = vmatprep.mubr.bf16.mxu0 %v13648_v19  ;;  %v6748_v20 = vor.u32 %v6746_v9, %v6745_v32  ;;  %v6755_v56 = vshrl.u32 %v13621_v44, 16  ;;  %v12275_v18 = vld [vmem:[%s14484_s5 + $0x8] sm:$0xff]  }
 0x2fa   : > { %v13651_v3 = vpack.c.bf16 %v4707_v30, %v4706_v53  ;;  %2809 = vst [vmem:[#allocation3 + $0x50] sm:$0xff] %v13644_v62  ;;  %v2774_v49 = vadd.f32 %v13577_v10, %v2712_v40  ;;  %v10690_v17 = vpop.f32.mrb[26].mxu0  ;;  %v13665_v57 = vsel %vm908_vm0, %v13583_v14, %v4787_v46  ;;  %v6758_v15 = vshll.u32 %v13621_v44, 16 }
 0x2fb   : > { %v13660_v0 = vpack.c.bf16 %v4705_v22, %v4704_v55  ;;  %v10977_v38 = vpop.f32.mrb[24].mxu1  ;;  %v2792_v4 = vmax.f32 %v2776_v50, 0.0  ;;  %v2777_v24 = vadd.f32 %v10690_v17, %v13577_v10  ;;  %v2715_v27 = vpop.f32.mrb[27].mxu0  ;;  %v13673_v13 = vsel %vm908_vm0, %v13581_v31, %v6748_v20  ;;  %11000 = vmatmul.mubr.bf16.vlgmr.msra.gmra.mrb[32].mxu0 %v13665_v57 }
 0x2fc   : > { %4728 = vst [vmem:[#allocation3 + $0x128] sm:$0xff] %v13651_v3  ;;  %v4694_v6 = vadd.f32 %v10977_v38, %v13577_v10  ;;  %v4630_v1 = vpop.f32.mrb[25].mxu1  ;;  %v2790_v14 = vmax.f32 %v2774_v49, 0.0  ;;  %v2775_v61 = vadd.f32 %v13577_v10, %v2715_v27  ;;  %11287 = vmatprep.mubr.bf16.mxu1 %v13673_v13  ;;  %11016 = vmatpush3.bf16.msra.mxu0 %v13565_v58  ;;  %v6757_v16 = vrot.slane %v6755_v56, 7 }
 0x2fd   : > { %4727 = vst [vmem:[#allocation3 + $0x110] sm:$0xff] %v13660_v0  ;;  %v4692_v26 = vadd.f32 %v13577_v10, %v4630_v1  ;;  %v10978_v43 = vpop.f32.mrb[26].mxu1  ;;  %v2793_v51 = vmax.f32 %v2777_v24, 0.0  ;;  %11017 = vmatprep.subr.bf16.mxu0 %v12274_v42  ;;  %v4794_v53 = vshrl.u32 %v13644_v62, 16  ;;  %v4797_v30 = vshll.u32 %v13644_v62, 16 }
 0x2fe   : > { %v4710_v37 = vmax.f32 %v4694_v6, 0.0  ;;  %v4695_v31 = vadd.f32 %v10978_v43, %v13577_v10  ;;  %v4633_v23 = vpop.f32.mrb[27].mxu1  ;;  %v2791_v60 = vmax.f32 %v2775_v61, 0.0  ;;  %v6760_v55 = vor.u32 %v6758_v15, %v6757_v16  ;;  %v13725_v43 = vld [vmem:[#allocation2 + $0x18] sm:$0xff] }
 0x2ff   : > { %v4708_v29 = vmax.f32 %v4692_v26, 0.0  ;;  %v4693_v8 = vadd.f32 %v13577_v10, %v4633_v23  ;;  %v13687_v2 = vpack.c.bf16 %v2793_v51, %v2792_v4  ;;  %v4796_v7 = vrot.slane %v4794_v53, 7 }
 0x300   : > { %v4711_v58 = vmax.f32 %v4695_v31, 0.0  ;;  %v13693_v32 = vpack.c.bf16 %v2791_v60, %v2790_v14  ;;  %v10693_v22 = vpop.f32.mrb[28].mxu0  ;;  %v13697_v47 = vsel %vm908_vm0, %v13586_v41, %v6760_v55  ;;  %11018 = vmatpush3.bf16.msra.mxu0 %v12274_v42  ;;  %v6767_v46 = vshrl.u32 %v13660_v0, 16  ;;  %v12278_v41 = vld [vmem:[%s14484_s5 + $0x18] sm:$0xff]   ;;  %v12280_v55 = vld [vmem:[%s14484_s5 + $0x20] sm:$0xff]  }
 0x301   : > { %v4709_v9 = vmax.f32 %v4693_v8, 0.0  ;;  %2812 = vst [vmem:[#allocation3 + $0x98] sm:$0xff] %v13687_v2  ;;  %v2780_v40 = vadd.f32 %v10693_v22, %v13577_v10  ;;  %v2728_v20 = vpop.f32.mrb[29].mxu0  ;;  %11288 = vmatmul.mubr.bf16.vlgmr.msra.gmra.mrb[32].mxu1 %v13697_v47  ;;  %v4799_v56 = vor.u32 %v4797_v30, %v4796_v7  ;;  %11019 = vmatprep.subr.bf16.mxu0 %v12276_v5  ;;  %v6770_v38 = vshll.u32 %v13660_v0, 16 }
 0x302   : > { %v13701_v50 = vpack.c.bf16 %v4711_v58, %v4710_v37  ;;  %2811 = vst [vmem:[#allocation3 + $0x80] sm:$0xff] %v13693_v32  ;;  %v2778_v17 = vadd.f32 %v13577_v10, %v2728_v20  ;;  %v10694_v15 = vpop.f32.mrb[30].mxu0  ;;  %11304 = vmatpush3.bf16.msra.mxu1 %v13570_v33  ;;  %v6769_v4 = vrot.slane %v6767_v46, 7  ;;  %v4806_v6 = vshrl.u32 %v13641_v11, 16  ;;  %v12277_v33 = vld [vmem:[%s14484_s5 + $0x10] sm:$0xff]   ;;  %v12279_v20 = vld [vmem:[%s14484_s5 + $0x18] sm:$0xff]  }
 0x303   : > { %v13710_v42 = vpack.c.bf16 %v4709_v9, %v4708_v29  ;;  %v10981_v49 = vpop.f32.mrb[28].mxu1  ;;  %v2781_v27 = vadd.f32 %v10694_v15, %v13577_v10  ;;  %v2731_v14 = vpop.f32.mrb[31].mxu0  ;;  %11305 = vmatprep.subr.bf16.mxu1 %v12275_v18  ;;  %v13720_v26 = vsel %vm908_vm0, %v13588_v21, %v4799_v56  ;;  %v4758_v61 = vshrl.u32 %v13725_v43, 16 }
 0x304   : > { %4730 = vst [vmem:[#allocation3 + $0x158] sm:$0xff] %v13701_v50  ;;  %v4698_v1 = vadd.f32 %v10981_v49, %v13577_v10  ;;  %v4646_v24 = vpop.f32.mrb[29].mxu1  ;;  %v2796_v16 = vmax.f32 %v2780_v40, 0.0  ;;  %v2779_v31 = vadd.f32 %v13577_v10, %v2731_v14  ;;  %11003 = vmatprep.mubr.bf16.mxu0 %v13720_v26  ;;  %v6772_v21 = vor.u32 %v6770_v38, %v6769_v4 }
 0x305   : > { %4729 = vst [vmem:[#allocation3 + $0x140] sm:$0xff] %v13710_v42  ;;  %v4696_v37 = vadd.f32 %v13577_v10, %v4646_v24  ;;  %v10982_v51 = vpop.f32.mrb[30].mxu1  ;;  %11020 = vmatpush3.bf16.msra.mxu0 %v12276_v5  ;;  %v2794_v23 = vmax.f32 %v2778_v17, 0.0  ;;  %v2797_v53 = vmax.f32 %v2781_v27, 0.0  ;;  %v4808_v8 = vrot.slane %v4806_v6, 7  ;;  %v12282_v24 = vld [vmem:[%s14484_s5 + $0x28] sm:$0xff]  }
 0x306   : > { %v4699_v29 = vadd.f32 %v10982_v51, %v13577_v10  ;;  %v4649_v60 = vpop.f32.mrb[31].mxu1  ;;  %11021 = vmatprep.subr.bf16.mxu0 %v12278_v41  ;;  %v4714_v58 = vmax.f32 %v4698_v1, 0.0  ;;  %v2795_v7 = vmax.f32 %v2779_v31, 0.0  ;;  %11306 = vmatpush3.bf16.msra.mxu1 %v12275_v18  ;;  %v13739_v9 = vsel %vm908_vm0, %v13591_v54, %v6772_v21  ;;  %v12281_v31 = vld [vmem:[%s14484_s5 + $0x20] sm:$0xff]  }
 0x307   : > { %v4697_v30 = vadd.f32 %v13577_v10, %v4649_v60  ;;  %v13741_v5 = vpack.c.bf16 %v2797_v53, %v2796_v16  ;;  %11291 = vmatprep.mubr.bf16.mxu1 %v13739_v9  ;;  %11307 = vmatprep.subr.bf16.mxu1 %v12277_v33  ;;  %v4809_v46 = vshll.u32 %v13641_v11, 16  ;;  %v6779_v40 = vshrl.u32 %v13651_v3, 16 }
 0x308   : > { %v4715_v22 = vmax.f32 %v4699_v29, 0.0  ;;  %v4712_v10 = vmax.f32 %v4696_v37, 0.0  ;;  %v13749_v18 = vpack.c.bf16 %v2795_v7, %v2794_v23  ;;  %v4818_v54 = vshrl.u32 %v13693_v32, 16 }
 0x309   : > { %v4713_v56 = vmax.f32 %v4697_v30, 0.0  ;;  %11022 = vmatpush3.bf16.msra.mxu0 %v12278_v41  ;;  %2814 = vst [vmem:[#allocation3 + $0xc8] sm:$0xff] %v13741_v5  ;;  %v4811_v49 = vor.u32 %v4809_v46, %v4808_v8  ;;  %v6781_v17 = vrot.slane %v6779_v40, 7  ;;  %v6782_v15 = vshll.u32 %v13651_v3, 16 }
 0x30a   : > { %v13753_v38 = vpack.c.bf16 %v4715_v22, %v4714_v58  ;;  %11023 = vmatprep.subr.bf16.mxu0 %v12280_v55  ;;  %2813 = vst [vmem:[#allocation3 + $0xb0] sm:$0xff] %v13749_v18  ;;  %11308 = vmatpush3.bf16.msra.mxu1 %v12277_v33  ;;  %v4820_v6 = vrot.slane %v4818_v54, 7  ;;  %v4821_v1 = vshll.u32 %v13693_v32, 16  ;;  %v6791_v41 = vshrl.u32 %v13710_v42, 16  ;;  %v12283_v54 = vld [vmem:[%s14484_s5 + $0x28] sm:$0xff]  }
 0x30b   : > { %v13757_v4 = vpack.c.bf16 %v4713_v56, %v4712_v10  ;;  %v13767_v27 = vsel %vm908_vm0, %v13593_v59, %v4811_v49  ;;  %v6784_v14 = vor.u32 %v6782_v15, %v6781_v17  ;;  %11309 = vmatprep.subr.bf16.mxu1 %v12279_v20  ;;  %v6794_v16 = vshll.u32 %v13710_v42, 16  ;;  %v4733_v10 = vld [vmem:[#allocation3] sm:$0x80] }
 0x30c   : > { %4732 = vst [vmem:[#allocation3 + $0x188] sm:$0xff] %v13753_v38  ;;  %v4830_v33 = vshrl.u32 %v13687_v2, 16  ;;  %11004 = vmatmul.mubr.bf16.gmra.mrb[36].mxu0 %v13767_v27  ;;  %v4823_v37 = vor.u32 %v4821_v1, %v4820_v6  ;;  %v6793_v51 = vrot.slane %v6791_v41, 7  ;;  %v4833_v21 = vshll.u32 %v13687_v2, 16  ;;  %v13806_v15 = vld [vmem:[#allocation3 + $0xe0] sm:$0xff] }
 0x30d   : > { %4731 = vst [vmem:[#allocation3 + $0x170] sm:$0xff] %v13757_v4  ;;  %v6803_v59 = vshrl.u32 %v13701_v50, 16  ;;  %v13780_v23 = vsel %vm908_vm0, %v13597_v63, %v6784_v14  ;;  %11024 = vmatpush3.bf16.msra.mxu0 %v12280_v55  ;;  %v6806_v29 = vshll.u32 %v13701_v50, 16  ;;  %v4842_v60 = vshrl.u32 %v13749_v18, 16  ;;  %v12284_v63 = vld [vmem:[%s14484_s5 + $0x30] sm:$0xff]  }
 0x30e   : > { %v4832_v53 = vrot.slane %v4830_v33, 7  ;;  %11292 = vmatmul.mubr.bf16.gmra.mrb[36].mxu1 %v13780_v23  ;;  %v13787_v8 = vsel %vm908_vm0, %v13599_v12, %v4823_v37  ;;  %v6796_v58 = vor.u32 %v6794_v16, %v6793_v51  ;;  %11025 = vmatprep.subr.bf16.mxu0 %v12282_v24  ;;  %v6815_v30 = vshrl.u32 %v13757_v4, 16  ;;  %v4749_v55 = vld [vmem:[#allocation3 + $0xc0] sm:$0x80] }
 0x30f   : > { %v6805_v7 = vrot.slane %v6803_v59, 7  ;;  %11310 = vmatpush3.bf16.msra.mxu1 %v12279_v20  ;;  %11007 = vmatprep.mubr.bf16.mxu0 %v13787_v8  ;;  %v4844_v46 = vrot.slane %v4842_v60, 7  ;;  %v4845_v40 = vshll.u32 %v13749_v18, 16  ;;  %v4878_v12 = vshrl.u32 %v13741_v5, 16  ;;  %v6722_v41 = vld [vmem:[#allocation3 + $0x180] sm:$0x80] }
 0x310   : > { %v4835_v22 = vor.u32 %v4833_v21, %v4832_v53  ;;  %v13798_v56 = vsel %vm908_vm0, %v13603_v25, %v6796_v58  ;;  %11311 = vmatprep.subr.bf16.mxu1 %v12281_v31  ;;  %v6813_v20 = vrot.slane %v6811_v45, 7  ;;  %v6817_v49 = vrot.slane %v6815_v30, 7  ;;  %v6706_v33 = vld [vmem:[#allocation3 + $0xc0] sm:$0x80] }
 0x311   : > { %v6818_v17 = vshll.u32 %v13757_v4, 16  ;;  %11295 = vmatprep.mubr.bf16.mxu1 %v13798_v56  ;;  %v6808_v6 = vor.u32 %v6806_v29, %v6805_v7  ;;  %11026 = vmatpush3.bf16.msra.mxu0 %v12282_v24  ;;  %v4847_v1 = vor.u32 %v4845_v40, %v4844_v46  ;;  %v4874_v25 = vshrl.u32 %v4749_v55, 16  ;;  %v12285_v60 = vld [vmem:[%s14484_s5 + $0x30] sm:$0xff]  }
 0x312   : > { %v6851_v14 = vshrl.u32 %v13753_v38, 16  ;;  %11027 = vmatprep.subr.bf16.mxu0 %v12284_v63  ;;  %v4754_v45 = vshrl.u32 %v4733_v10, 16  ;;  %v4760_v37 = vrot.slane %v4758_v61, 7  ;;  %v4761_v51 = vshll.u32 %v13725_v43, 16  ;;  %v12287_v10 = vld [vmem:[%s14484_s5 + $0x38] sm:$0xff]  }
 0x313   : > { %v6820_v16 = vor.u32 %v6818_v17, %v6817_v49  ;;  %v13818_v24 = vsel %vm908_vm0, %v13608_v35, %v4835_v22  ;;  %11312 = vmatpush3.bf16.msra.mxu1 %v12281_v31  ;;  %v13822_v21 = vsel %vm908_vm0, %v13618_v36, %v4847_v1  ;;  %v4880_v59 = vrot.slane %v4878_v12, 7 }
 0x314   : > { %v5201_v53 = vshll.u32 %v13806_v15, 16  ;;  %11008 = vmatmul.mubr.bf16.gmra.mrb[40].mxu0 %v13818_v24  ;;  %11313 = vmatprep.subr.bf16.mxu1 %v12283_v54  ;;  %v6847_v35 = vshrl.u32 %v6722_v41, 16  ;;  %v13834_v31 = vsel %vm908_vm0, %v13611_v39, %v6808_v6  ;;  %v4881_v36 = vshll.u32 %v13741_v5, 16  ;;  %v12288_v39 = vld [vmem:[%s14484_s5 + $0x180] sm:$0xff]  }
 0x315   : > { %v13827_v29 = vsel %vm908_vm0, %v6813_v20, %v6820_v16  ;;  %11011 = vmatprep.mubr.bf16.mxu0 %v13822_v21  ;;  %11028 = vmatpush3.bf16.msra.mxu0 %v12284_v63  ;;  %v6853_v58 = vrot.slane %v6851_v14, 7  ;;  %v6727_v7 = vshrl.u32 %v6706_v33, 16  ;;  %v4756_v30 = vrot.slane %v4754_v45, 7  ;;  %v12290_v16 = vld [vmem:[%s14484_s5 + $0x188] sm:$0xff]   ;;  %v12294_v45 = vld [vmem:[%s14484_s5 + $0x198] sm:$0xff]  }
 0x316   : > { %11296 = vmatmul.mubr.bf16.gmra.mrb[40].mxu1 %v13834_v31  ;;  %11029 = vmatprep.subr.bf16.mxu0 %v12286_v28  ;;  %v13841_v55 = vor.u32 %v4761_v51, %v4760_v37  ;;  %v5198_v22 = vshrl.u32 %v13806_v15, 16  ;;  %v7923_v46 = vrot.slane %v5201_v53, 1  ;;  %v4876_v63 = vrot.slane %v4874_v25, 7  ;;  %v12289_v25 = vld [vmem:[%s14484_s5 + $0x180] sm:$0xff]   ;;  %v12291_v33 = vld [vmem:[%s14484_s5 + $0x188] sm:$0xff]  }
 0x317   : > { %11314 = vmatpush3.bf16.msra.mxu1 %v12283_v54  ;;  %11299 = vmatprep.mubr.bf16.mxu1 %v13827_v29  ;;  %v4883_v40 = vor.u32 %v4881_v36, %v4880_v59  ;;  %v6854_v12 = vshll.u32 %v13753_v38, 16  ;;  %v6849_v49 = vrot.slane %v6847_v35, 7  ;;  %v6729_v6 = vrot.slane %v6727_v7, 7  ;;  %v12296_v37 = vld [vmem:[%s14484_s5 + $0x1a0] sm:$0xff]   ;;  %v12299_v35 = vld [vmem:[%s14484_s5 + $0x1a8] sm:$0xff]   ;;  %v12300_v36 = vld [vmem:[%s14484_s5 + $0x1b0] sm:$0xff]  }
 0x318   : > { %11315 = vmatprep.subr.bf16.mxu1 %v12285_v60  ;;  %v13856_v20 = vor.u32 %v7923_v46, %v5198_v22  ;;  %v4764_v54 = vsel %vm908_vm0, %v4756_v30, %v13841_v55  ;;  %v12297_v59 = vld [vmem:[%s14484_s5 + $0x1a0] sm:$0xff]   ;;  %v12302_v7 = vld [vmem:[%s14484_s5 + $0x1b8] sm:$0xff]  }
 0x319   : > { %v6856_v17 = vor.u32 %v6854_v12, %v6853_v58  ;;  %11030 = vmatpush3.bf16.msra.mxu0 %v12286_v28  ;;  %v13861_v1 = vsel %vm908_vm0, %v4876_v63, %v4883_v40  ;;  %v6737_v14 = vsel %vm908_vm0, %v6729_v6, %v4883_v40  ;;  %v12292_v28 = vld [vmem:[%s14484_s5 + $0x190] sm:$0xff]   ;;  %v12303_v30 = vld [vmem:[%s14484_s5 + $0x1b8] sm:$0xff]   ;;  %v12305_v46 = vld [vmem:[%s14484_s5 + $0x40] sm:$0xff]  }
 0x31a   : > { %11047 = vmatprep.subr.bf16.mxu0 %v12288_v39  ;;  %v12301_v58 = vld [vmem:[%s14484_s5 + $0x1b0] sm:$0xff]   ;;  %v12307_v63 = vld [vmem:[%s14484_s5 + $0x48] sm:$0xff]  }
 0x31b   : > { %11316 = vmatpush3.bf16.msra.mxu1 %v12285_v60  ;;  %v13868_v41 = vsel %vm908_vm0, %v6849_v49, %v6856_v17  ;;  %v12298_v60 = vld [vmem:[%s14484_s5 + $0x1a8] sm:$0xff]   ;;  %v12316_v17 = vld [vmem:[%s14484_s5 + $0x70] sm:$0xff]  }
 0x31c   : > { %11012 = vmatmul.mubr.bf16.gmra.mrb[44].mxu0 %v13861_v1  ;;  %11317 = vmatprep.subr.bf16.mxu1 %v12287_v10  ;;  %v4751_v40 = vld [vmem:[#allocation3 + $0xd8] sm:$0x80] }
 0x31d   : > { %11031 = vmatprep.mubr.bf16.mxu0 %v4764_v54  ;;  %v6724_v12 = vld [vmem:[#allocation3 + $0x198] sm:$0x80]  ;;  %v12317_v54 = vld [vmem:[%s14484_s5 + $0x70] sm:$0xff]  }
 0x31e   : > { %11300 = vmatmul.mubr.bf16.gmra.mrb[44].mxu1 %v13868_v41  ;;  %v7166_v49 = vshrl.u32 %v6724_v12, 16  ;;  %v12412_v12 = vld [vmem:[#allocation3 + $0x38] sm:$0xff] }
 0x31f   : > { %11319 = vmatprep.mubr.bf16.mxu1 %v6737_v14  ;;  %11318 = vmatpush3.bf16.msra.mxu1 %v12287_v10  ;;  %v5200_v10 = vrot.slane %v5198_v22, 7  ;;  %v12322_v14 = vld [vmem:[%s14484_s5 + $0x108] sm:$0xff]  }
 0x320   : > { %11335 = vmatprep.subr.bf16.mxu1 %v12289_v25  ;;  %v7168_v6 = vrot.slane %v7166_v49, 7  ;;  %v12354_v49 = vld [vmem:[%s14484_s5 + $0x88] sm:$0xff]  }
 0x324   : > { %11032 = vmatmul.mubr.bf16.vlgmr.msra.gmra.mrb[32].mxu0 %v13648_v19  ;;  %v12293_v19 = vld [vmem:[%s14484_s5 + $0x190] sm:$0xff]  }
 0x325   : > { %11048 = vmatpush3.bf16.msra.mxu0 %v12288_v39  ;;  %11035 = vmatprep.mubr.bf16.mxu0 %v13665_v57  ;;  %v12304_v39 = vld [vmem:[%s14484_s5 + $0x40] sm:$0xff]  }
 0x326   : > { %11320 = vmatmul.mubr.bf16.vlgmr.msra.gmra.mrb[32].mxu1 %v13673_v13  ;;  %11049 = vmatprep.subr.bf16.mxu0 %v12290_v16  ;;  %v12295_v13 = vld [vmem:[%s14484_s5 + $0x198] sm:$0xff]  }
 0x327   : > { %11336 = vmatpush3.bf16.msra.mxu1 %v12289_v25  ;;  %11323 = vmatprep.mubr.bf16.mxu1 %v13697_v47  ;;  %v7176_v25 = vsel %vm908_vm0, %v7168_v6, %v13841_v55  ;;  %v12321_v55 = vld [vmem:[%s14484_s5 + $0x100] sm:$0xff]   ;;  %v5943_v6 = vrot.slane %v4761_v51, 1  ;;  %v12364_v51 = vld [vmem:[%s14484_s5 + $0xb0] sm:$0xff]  }
 0x328   : > { %11337 = vmatprep.subr.bf16.mxu1 %v12291_v33 }
 0x329   : > { %11050 = vmatpush3.bf16.msra.mxu0 %v12290_v16  ;;  %v12323_v16 = vld [vmem:[%s14484_s5 + $0x108] sm:$0xff]  }
 0x32a   : > { %11051 = vmatprep.subr.bf16.mxu0 %v12292_v28 }
 0x32b   : > { %11338 = vmatpush3.bf16.msra.mxu1 %v12291_v33  ;;  %v12324_v33 = vld [vmem:[%s14484_s5 + $0x110] sm:$0xff]  }
 0x32c   : > { %11339 = vmatprep.subr.bf16.mxu1 %v12293_v19  ;;  %11036 = vmatmul.mubr.bf16.gmra.mrb[36].mxu0 %v13720_v26 }
 0x32d   : > { %11052 = vmatpush3.bf16.msra.mxu0 %v12292_v28  ;;  %11039 = vmatprep.mubr.bf16.mxu0 %v13767_v27  ;;  %v12325_v28 = vld [vmem:[%s14484_s5 + $0x110] sm:$0xff]  }
 0x32e   : > { %11324 = vmatmul.mubr.bf16.gmra.mrb[36].mxu1 %v13739_v9  ;;  %11053 = vmatprep.subr.bf16.mxu0 %v12294_v45 }
 0x32f   : > { %11340 = vmatpush3.bf16.msra.mxu1 %v12293_v19  ;;  %11327 = vmatprep.mubr.bf16.mxu1 %v13780_v23  ;;  %v12326_v19 = vld [vmem:[%s14484_s5 + $0x118] sm:$0xff]  }
 0x330   : > { %11341 = vmatprep.subr.bf16.mxu1 %v12295_v13 }
 0x331   : > { %11054 = vmatpush3.bf16.msra.mxu0 %v12294_v45  ;;  %v12327_v45 = vld [vmem:[%s14484_s5 + $0x118] sm:$0xff]  }
 0x332   : > { %11055 = vmatprep.subr.bf16.mxu0 %v12296_v37 }
 0x333   : > { %11342 = vmatpush3.bf16.msra.mxu1 %v12295_v13  ;;  %v12328_v13 = vld [vmem:[%s14484_s5 + $0x120] sm:$0xff]  }
 0x334   : > { %11343 = vmatprep.subr.bf16.mxu1 %v12297_v59  ;;  %11040 = vmatmul.mubr.bf16.gmra.mrb[40].mxu0 %v13787_v8 }
 0x335   : > { %11056 = vmatpush3.bf16.msra.mxu0 %v12296_v37  ;;  %11043 = vmatprep.mubr.bf16.mxu0 %v13818_v24  ;;  %v12329_v37 = vld [vmem:[%s14484_s5 + $0x120] sm:$0xff]  }
 0x336   : > { %11328 = vmatmul.mubr.bf16.gmra.mrb[40].mxu1 %v13798_v56  ;;  %11057 = vmatprep.subr.bf16.mxu0 %v12298_v60 }
 0x337   : > { %11344 = vmatpush3.bf16.msra.mxu1 %v12297_v59  ;;  %11331 = vmatprep.mubr.bf16.mxu1 %v13834_v31  ;;  %v12330_v59 = vld [vmem:[%s14484_s5 + $0x128] sm:$0xff]  }
 0x338   : > { %11345 = vmatprep.subr.bf16.mxu1 %v12299_v35 }
 0x339   : > { %11058 = vmatpush3.bf16.msra.mxu0 %v12298_v60  ;;  %v12331_v60 = vld [vmem:[%s14484_s5 + $0x128] sm:$0xff]  }
 0x33a   : > { %11059 = vmatprep.subr.bf16.mxu0 %v12300_v36 }
 0x33b   : > { %11346 = vmatpush3.bf16.msra.mxu1 %v12299_v35  ;;  %v12332_v35 = vld [vmem:[%s14484_s5 + $0x130] sm:$0xff]  }
 0x33c   : > { %11347 = vmatprep.subr.bf16.mxu1 %v12301_v58  ;;  %11044 = vmatmul.mubr.bf16.gmra.mrb[44].mxu0 %v13822_v21 }
 0x33d   : > { %11060 = vmatpush3.bf16.msra.mxu0 %v12300_v36  ;;  %11063 = vmatprep.mubr.bf16.mxu0 %v13665_v57  ;;  %v12306_v57 = vld [vmem:[%s14484_s5 + $0x48] sm:$0xff]   ;;  %v12333_v36 = vld [vmem:[%s14484_s5 + $0x130] sm:$0xff]  }
 0x33e   : > { %11332 = vmatmul.mubr.bf16.gmra.mrb[44].mxu1 %v13827_v29  ;;  %11061 = vmatprep.subr.bf16.mxu0 %v12302_v7 }
 0x33f   : > { %11348 = vmatpush3.bf16.msra.mxu1 %v12301_v58  ;;  %11351 = vmatprep.mubr.bf16.mxu1 %v13697_v47  ;;  %v12308_v47 = vld [vmem:[%s14484_s5 + $0x50] sm:$0xff]   ;;  %v12334_v58 = vld [vmem:[%s14484_s5 + $0x138] sm:$0xff]  }
 0x340   : > { %11349 = vmatprep.subr.bf16.mxu1 %v12303_v30 }
 0x341   : > { %11062 = vmatpush3.bf16.msra.mxu0 %v12302_v7  ;;  %v12335_v7 = vld [vmem:[%s14484_s5 + $0x138] sm:$0xff]  }
 0x342   : > { %11079 = vmatprep.subr.bf16.mxu0 %v12304_v39 }
 0x343   : > { %11350 = vmatpush3.bf16.msra.mxu1 %v12303_v30  ;;  %v12336_v30 = vld [vmem:[%s14484_s5 + $0x1c0] sm:$0xff]  }
 0x344   : > { %11367 = vmatprep.subr.bf16.mxu1 %v12305_v46  ;;  %11064 = vmatmul.mubr.bf16.vlgmr.msra.gmra.mrb[32].mxu0 %v13720_v26  ;;  %v12309_v26 = vld [vmem:[%s14484_s5 + $0x50] sm:$0xff]  }
 0x345   : > { %11080 = vmatpush3.bf16.msra.mxu0 %v12304_v39  ;;  %11067 = vmatprep.mubr.bf16.mxu0 %v13767_v27  ;;  %v12310_v27 = vld [vmem:[%s14484_s5 + $0x58] sm:$0xff]   ;;  %v12337_v39 = vld [vmem:[%s14484_s5 + $0x1c0] sm:$0xff]  }
 0x346   : > { %11352 = vmatmul.mubr.bf16.vlgmr.msra.gmra.mrb[32].mxu1 %v13739_v9  ;;  %11081 = vmatprep.subr.bf16.mxu0 %v12306_v57  ;;  %v12311_v9 = vld [vmem:[%s14484_s5 + $0x58] sm:$0xff]  }
 0x347   : > { %11368 = vmatpush3.bf16.msra.mxu1 %v12305_v46  ;;  %11355 = vmatprep.mubr.bf16.mxu1 %v13780_v23  ;;  %v12312_v23 = vld [vmem:[%s14484_s5 + $0x60] sm:$0xff]   ;;  %v12339_v46 = vld [vmem:[%s14484_s5 + $0x1c8] sm:$0xff]  }
 0x348   : > { %11369 = vmatprep.subr.bf16.mxu1 %v12307_v63 }
 0x349   : > { %11082 = vmatpush3.bf16.msra.mxu0 %v12306_v57  ;;  %v12342_v57 = vld [vmem:[%s14484_s5 + $0x1d8] sm:$0xff]  }
 0x34a   : > { %11083 = vmatprep.subr.bf16.mxu0 %v12308_v47 }
 0x34b   : > { %11370 = vmatpush3.bf16.msra.mxu1 %v12307_v63  ;;  %v12344_v63 = vld [vmem:[%s14484_s5 + $0x1e0] sm:$0xff]  }
 0x34c   : > { %11371 = vmatprep.subr.bf16.mxu1 %v12309_v26  ;;  %11068 = vmatmul.mubr.bf16.gmra.mrb[36].mxu0 %v13787_v8  ;;  %v12313_v8 = vld [vmem:[%s14484_s5 + $0x60] sm:$0xff]  }
 0x34d   : > { %11084 = vmatpush3.bf16.msra.mxu0 %v12308_v47  ;;  %11071 = vmatprep.mubr.bf16.mxu0 %v13818_v24  ;;  %v5194_v24 = vshrl.u32 %v4751_v40, 16  ;;  %v12345_v47 = vld [vmem:[%s14484_s5 + $0x1e0] sm:$0xff]   ;;  %v12351_v40 = vld [vmem:[%s14484_s5 + $0x1f8] sm:$0xff]  }
 0x34e   : > { %11356 = vmatmul.mubr.bf16.gmra.mrb[36].mxu1 %v13798_v56  ;;  %11085 = vmatprep.subr.bf16.mxu0 %v12310_v27  ;;  %v12314_v56 = vld [vmem:[%s14484_s5 + $0x68] sm:$0xff]  }
 0x34f   : > { %11372 = vmatpush3.bf16.msra.mxu1 %v12309_v26  ;;  %11359 = vmatprep.mubr.bf16.mxu1 %v13834_v31  ;;  %v12315_v31 = vld [vmem:[%s14484_s5 + $0x68] sm:$0xff]   ;;  %v5196_v22 = vrot.slane %v5194_v24, 7 }
 0x350   : > { %11373 = vmatprep.subr.bf16.mxu1 %v12311_v9  ;;  %v12346_v26 = vld [vmem:[%s14484_s5 + $0x1e8] sm:$0xff]  }
 0x351   : > { %11086 = vmatpush3.bf16.msra.mxu0 %v12310_v27  ;;  %v12347_v27 = vld [vmem:[%s14484_s5 + $0x1e8] sm:$0xff]  }
 0x352   : > { %11087 = vmatprep.subr.bf16.mxu0 %v12312_v23  ;;  %v12413_v24 = vld [vmem:[#allocation3 + $0xf8] sm:$0xff] }
 0x353   : > { %11374 = vmatpush3.bf16.msra.mxu1 %v12311_v9  ;;  %v12348_v9 = vld [vmem:[%s14484_s5 + $0x1f0] sm:$0xff]  }
 0x354   : > { %11375 = vmatprep.subr.bf16.mxu1 %v12313_v8  ;;  %11072 = vmatmul.mubr.bf16.gmra.mrb[40].mxu0 %v13822_v21  ;;  %v5203_v21 = vor.u32 %v5201_v53, %v5200_v10  ;;  %v12319_v53 = vld [vmem:[%s14484_s5 + $0x78] sm:$0xff]   ;;  %v12353_v10 = vld [vmem:[%s14484_s5 + $0x80] sm:$0xff]  }
 0x355   : > { %11088 = vmatpush3.bf16.msra.mxu0 %v12312_v23  ;;  %11075 = vmatprep.mubr.bf16.mxu0 %v13861_v1  ;;  %v12349_v23 = vld [vmem:[%s14484_s5 + $0x1f0] sm:$0xff]  }
 0x356   : > { %11360 = vmatmul.mubr.bf16.gmra.mrb[40].mxu1 %v13827_v29  ;;  %11089 = vmatprep.subr.bf16.mxu0 %v12314_v56  ;;  %v12318_v29 = vld [vmem:[%s14484_s5 + $0x78] sm:$0xff]   ;;  %v5204_v1 = vsel %vm908_vm0, %v5196_v22, %v5203_v21  ;;  %v5919_v21 = vld [vmem:[#allocation3 + $0x10] sm:$0x1] }
 0x357   : > { %11376 = vmatpush3.bf16.msra.mxu1 %v12313_v8  ;;  %11363 = vmatprep.mubr.bf16.mxu1 %v13868_v41  ;;  %v12320_v41 = vld [vmem:[%s14484_s5 + $0x100] sm:$0xff]   ;;  %v12350_v8 = vld [vmem:[%s14484_s5 + $0x1f8] sm:$0xff]  }
 0x358   : > { %11377 = vmatprep.subr.bf16.mxu1 %v12315_v31  ;;  %v7886_v22 = vld [vmem:[#allocation3 + $0xc8] sm:$0xff] }
 0x359   : > { %11090 = vmatpush3.bf16.msra.mxu0 %v12314_v56  ;;  %v12352_v56 = vld [vmem:[%s14484_s5 + $0x80] sm:$0xff]  }
 0x35a   : > { %11091 = vmatprep.subr.bf16.mxu0 %v12316_v17 }
 0x35b   : > { %11378 = vmatpush3.bf16.msra.mxu1 %v12315_v31  ;;  %v12355_v31 = vld [vmem:[%s14484_s5 + $0x88] sm:$0xff]  }
 0x35c   : > { %11379 = vmatprep.subr.bf16.mxu1 %v12317_v54  ;;  %11076 = vmatmul.mubr.bf16.gmra.mrb[44].mxu0 %v5204_v1  ;;  %v5920_v1 = vld [vmem:[#allocation3 + $0x20] sm:$0xff] }
 0x35d   : > { %11092 = vmatpush3.bf16.msra.mxu0 %v12316_v17  ;;  %11095 = vmatprep.mubr.bf16.mxu0 %v13725_v43  ;;  %v12356_v17 = vld [vmem:[%s14484_s5 + $0x90] sm:$0xff]  }
 0x35e   : > { %11364 = vmatmul.mubr.bf16.gmra.mrb[44].mxu1 %v7176_v25  ;;  %11093 = vmatprep.subr.bf16.mxu0 %v12318_v29  ;;  %v5922_v25 = vld [vmem:[#allocation3 + $0x38] sm:$0xff] }
 0x35f   : > { %11380 = vmatpush3.bf16.msra.mxu1 %v12317_v54  ;;  %11383 = vmatprep.mubr.bf16.mxu1 %v13741_v5  ;;  %v5946_v54 = vshll.u32 %v5919_v21, 16 }
 0x360   : > { %11381 = vmatprep.subr.bf16.mxu1 %v12319_v53 }
 0x361   : > { %11094 = vmatpush3.bf16.msra.mxu0 %v12318_v29  ;;  %v12363_v29 = vld [vmem:[%s14484_s5 + $0xa8] sm:$0xff]  }
 0x362   : > { %11111 = vmatprep.subr.bf16.mxu0 %v12320_v41 }
 0x363   : > { %11382 = vmatpush3.bf16.msra.mxu1 %v12319_v53 }
 0x364   : > { %11399 = vmatprep.subr.bf16.mxu1 %v12321_v55  ;;  %11096 = vmatmul.mubr.bf16.vlgmr.msra.gmra.mrb[32].mxu0 %v13616_v52 }
 0x365   : > { %11112 = vmatpush3.bf16.msra.mxu0 %v12320_v41  ;;  %11099 = vmatprep.mubr.bf16.mxu0 %v13613_v48 }
 0x366   : > { %11384 = vmatmul.mubr.bf16.vlgmr.msra.gmra.mrb[32].mxu1 %v13627_v34  ;;  %11113 = vmatprep.subr.bf16.mxu0 %v12322_v14 }
 0x367   : > { %11400 = vmatpush3.bf16.msra.mxu1 %v12321_v55  ;;  %11387 = vmatprep.mubr.bf16.mxu1 %v13621_v44  ;;  %v5948_v55 = vrot.slane %v5946_v54, 1 }
 0x368   : > { %11401 = vmatprep.subr.bf16.mxu1 %v12323_v16 }
 0x369   : > { %11114 = vmatpush3.bf16.msra.mxu0 %v12322_v14  ;;  %v5953_v14 = vshll.u32 %v5920_v1, 16 }
 0x36a   : > { %11115 = vmatprep.subr.bf16.mxu0 %v12324_v33 }
 0x36b   : > { %11402 = vmatpush3.bf16.msra.mxu1 %v12323_v16  ;;  %v7907_v16 = vshrl.u32 %v7886_v22, 16 }
 0x36c   : > { %11403 = vmatprep.subr.bf16.mxu1 %v12325_v28  ;;  %11100 = vmatmul.mubr.bf16.gmra.mrb[36].mxu0 %v13644_v62 }
 0x36d   : > { %11116 = vmatpush3.bf16.msra.mxu0 %v12324_v33  ;;  %11103 = vmatprep.mubr.bf16.mxu0 %v13641_v11  ;;  %v5921_v33 = vld [vmem:[#allocation3 + $0x28] sm:$0x1] }
 0x36e   : > { %11388 = vmatmul.mubr.bf16.gmra.mrb[36].mxu1 %v13660_v0  ;;  %11117 = vmatprep.subr.bf16.mxu0 %v12326_v19 }
 0x36f   : > { %11404 = vmatpush3.bf16.msra.mxu1 %v12325_v28  ;;  %11391 = vmatprep.mubr.bf16.mxu1 %v13651_v3  ;;  %v5965_v28 = vshll.u32 %v5922_v25, 16 }
 0x370   : > { %11405 = vmatprep.subr.bf16.mxu1 %v12327_v45 }
 0x371   : > { %11118 = vmatpush3.bf16.msra.mxu0 %v12326_v19  ;;  %v5923_v19 = vld [vmem:[#allocation3 + $0x40] sm:$0x1] }
 0x372   : > { %11119 = vmatprep.subr.bf16.mxu0 %v12328_v13 }
 0x373   : > { %11406 = vmatpush3.bf16.msra.mxu1 %v12327_v45 }
 0x374   : > { %11407 = vmatprep.subr.bf16.mxu1 %v12329_v37  ;;  %11104 = vmatmul.mubr.bf16.gmra.mrb[40].mxu0 %v13693_v32 }
 0x375   : > { %11120 = vmatpush3.bf16.msra.mxu0 %v12328_v13  ;;  %11107 = vmatprep.mubr.bf16.mxu0 %v13687_v2 }
 0x376   : > { %11392 = vmatmul.mubr.bf16.gmra.mrb[40].mxu1 %v13710_v42  ;;  %11121 = vmatprep.subr.bf16.mxu0 %v12330_v59 }
 0x377   : > { %11408 = vmatpush3.bf16.msra.mxu1 %v12329_v37  ;;  %11395 = vmatprep.mubr.bf16.mxu1 %v13701_v50  ;;  %v7889_v37 = vld [vmem:[#allocation3 + $0xe8] sm:$0x1] }
 0x378   : > { %11409 = vmatprep.subr.bf16.mxu1 %v12331_v60 }
 0x379   : > { %11122 = vmatpush3.bf16.msra.mxu0 %v12330_v59 }
 0x37a   : > { %11123 = vmatprep.subr.bf16.mxu0 %v12332_v35 }
 0x37b   : > { %11410 = vmatpush3.bf16.msra.mxu1 %v12331_v60  ;;  %v5955_v60 = vrot.slane %v5953_v14, 1  ;;  %v12372_v14 = vld [vmem:[%s14484_s5 + $0x150] sm:$0xff]  }
 0x37c   : > { %11411 = vmatprep.subr.bf16.mxu1 %v12333_v36  ;;  %11108 = vmatmul.mubr.bf16.gmra.mrb[44].mxu0 %v13749_v18 }
 0x37d   : > { %11124 = vmatpush3.bf16.msra.mxu0 %v12332_v35  ;;  %11127 = vmatprep.mubr.bf16.mxu0 %v13616_v52  ;;  %v12338_v52 = vld [vmem:[%s14484_s5 + $0x1c8] sm:$0xff]   ;;  %v5958_v35 = vshll.u32 %v5921_v33, 16 }
 0x37e   : > { %11396 = vmatmul.mubr.bf16.gmra.mrb[44].mxu1 %v13757_v4  ;;  %11125 = vmatprep.subr.bf16.mxu0 %v12334_v58 }
 0x37f   : > { %11412 = vmatpush3.bf16.msra.mxu1 %v12333_v36  ;;  %11415 = vmatprep.mubr.bf16.mxu1 %v13627_v34  ;;  %v12340_v34 = vld [vmem:[%s14484_s5 + $0x1d0] sm:$0xff]  }
 0x380   : > { %11413 = vmatprep.subr.bf16.mxu1 %v12335_v7  ;;  %v7891_v36 = vld [vmem:[#allocation3 + $0x100] sm:$0x1] }
 0x381   : > { %11126 = vmatpush3.bf16.msra.mxu0 %v12334_v58  ;;  %v12367_v58 = vld [vmem:[%s14484_s5 + $0xb8] sm:$0xff]  }
 0x382   : > { %11143 = vmatprep.subr.bf16.mxu0 %v12336_v30 }
 0x383   : > { %11414 = vmatpush3.bf16.msra.mxu1 %v12335_v7  ;;  %v5967_v7 = vrot.slane %v5965_v28, 1 }
 0x384   : > { %11431 = vmatprep.subr.bf16.mxu1 %v12337_v39  ;;  %11128 = vmatmul.mubr.bf16.vlgmr.msra.gmra.mrb[32].mxu0 %v13613_v48  ;;  %v12341_v48 = vld [vmem:[%s14484_s5 + $0x1d0] sm:$0xff]  }
 0x385   : > { %11144 = vmatpush3.bf16.msra.mxu0 %v12336_v30  ;;  %11131 = vmatprep.mubr.bf16.mxu0 %v13644_v62  ;;  %v5970_v30 = vshll.u32 %v5923_v19, 16 }
 0x386   : > { %11416 = vmatmul.mubr.bf16.vlgmr.msra.gmra.mrb[32].mxu1 %v13621_v44  ;;  %11145 = vmatprep.subr.bf16.mxu0 %v12338_v52  ;;  %v12343_v44 = vld [vmem:[%s14484_s5 + $0x1d8] sm:$0xff]  }
 0x387   : > { %11432 = vmatpush3.bf16.msra.mxu1 %v12337_v39  ;;  %11419 = vmatprep.mubr.bf16.mxu1 %v13660_v0  ;;  %v14196_v39 = vld [vmem:[#allocation3 + $0x50] sm:$0xff] }
 0x388   : > { %11433 = vmatprep.subr.bf16.mxu1 %v12339_v46 }
 0x389   : > { %11146 = vmatpush3.bf16.msra.mxu0 %v12338_v52  ;;  %v5951_v52 = vshrl.u32 %v5920_v1, 16 }
 0x38a   : > { %11147 = vmatprep.subr.bf16.mxu0 %v12340_v34 }
 0x38b   : > { %11434 = vmatpush3.bf16.msra.mxu1 %v12339_v46  ;;  %v7926_v46 = vshll.u32 %v7889_v37, 16 }
 0x38c   : > { %11435 = vmatprep.subr.bf16.mxu1 %v12341_v48  ;;  %11132 = vmatmul.mubr.bf16.gmra.mrb[36].mxu0 %v13641_v11 }
 0x38d   : > { %11148 = vmatpush3.bf16.msra.mxu0 %v12340_v34  ;;  %11135 = vmatprep.mubr.bf16.mxu0 %v13693_v32  ;;  %v14198_v34 = vld [vmem:[#allocation3 + $0x68] sm:$0xff] }
 0x38e   : > { %11420 = vmatmul.mubr.bf16.gmra.mrb[36].mxu1 %v13651_v3  ;;  %11149 = vmatprep.subr.bf16.mxu0 %v12342_v57 }
 0x38f   : > { %11436 = vmatpush3.bf16.msra.mxu1 %v12341_v48  ;;  %11423 = vmatprep.mubr.bf16.mxu1 %v13710_v42 }
 0x390   : > { %11437 = vmatprep.subr.bf16.mxu1 %v12343_v44 }
 0x391   : > { %11150 = vmatpush3.bf16.msra.mxu0 %v12342_v57  ;;  %v5963_v57 = vshrl.u32 %v5922_v25, 16  ;;  %v5975_v25 = vshrl.u32 %v14196_v39, 16 }
 0x392   : > { %11151 = vmatprep.subr.bf16.mxu0 %v12344_v63 }
 0x393   : > { %11438 = vmatpush3.bf16.msra.mxu1 %v12343_v44 }
 0x394   : > { %11439 = vmatprep.subr.bf16.mxu1 %v12345_v47  ;;  %11136 = vmatmul.mubr.bf16.gmra.mrb[40].mxu0 %v13687_v2 }
 0x395   : > { %11152 = vmatpush3.bf16.msra.mxu0 %v12344_v63  ;;  %11139 = vmatprep.mubr.bf16.mxu0 %v13749_v18  ;;  %v7938_v63 = vshll.u32 %v7891_v36, 16 }
 0x396   : > { %11424 = vmatmul.mubr.bf16.gmra.mrb[40].mxu1 %v13701_v50  ;;  %11153 = vmatprep.subr.bf16.mxu0 %v12346_v26 }
 0x397   : > { %11440 = vmatpush3.bf16.msra.mxu1 %v12345_v47  ;;  %11427 = vmatprep.mubr.bf16.mxu1 %v13757_v4  ;;  %v14206_v47 = vld [vmem:[#allocation3 + $0x110] sm:$0xff] }
 0x398   : > { %11441 = vmatprep.subr.bf16.mxu1 %v12347_v27  ;;  %v7943_v19 = vshrl.u32 %v14206_v47, 16 }
 0x399   : > { %11154 = vmatpush3.bf16.msra.mxu0 %v12346_v26  ;;  %v5956_v26 = vor.u32 %v5955_v60, %v5951_v52 }
 0x39a   : > { %11155 = vmatprep.subr.bf16.mxu0 %v12348_v9 }
 0x39b   : > { %11442 = vmatpush3.bf16.msra.mxu1 %v12347_v27  ;;  %v5960_v27 = vrot.slane %v5958_v35, 1  ;;  %v5929_v35 = vld [vmem:[#allocation3 + $0x88] sm:$0x1] }
 0x39c   : > { %11443 = vmatprep.subr.bf16.mxu1 %v12349_v23  ;;  %11140 = vmatmul.mubr.bf16.gmra.mrb[44].mxu0 %v13741_v5 }
 0x39d   : > { %11156 = vmatpush3.bf16.msra.mxu0 %v12348_v9  ;;  %11159 = vmatprep.mubr.bf16.mxu0 %v12412_v12  ;;  %v5977_v9 = vshll.u32 %v14196_v39, 16  ;;  %v5931_v39 = vld [vmem:[#allocation3 + $0xa0] sm:$0x1] }
 0x39e   : > { %11428 = vmatmul.mubr.bf16.gmra.mrb[44].mxu1 %v13753_v38  ;;  %11157 = vmatprep.subr.bf16.mxu0 %v12350_v8 }
 0x39f   : > { %11444 = vmatpush3.bf16.msra.mxu1 %v12349_v23  ;;  %11447 = vmatprep.mubr.bf16.mxu1 %v12413_v24  ;;  %v12369_v23 = vld [vmem:[%s14484_s5 + $0x140] sm:$0xff]   ;;  %v5989_v24 = vshll.u32 %v14198_v34, 16  ;;  %v5979_v21 = vrot.slane %v5977_v9, 1 }
 0x3a0   : > { %11445 = vmatprep.subr.bf16.mxu1 %v12351_v40 }
 0x3a1   : > { %11158 = vmatpush3.bf16.msra.mxu0 %v12350_v8  ;;  %v5968_v8 = vor.u32 %v5967_v7, %v5963_v57  ;;  %v5991_v54 = vrot.slane %v5989_v24, 1  ;;  %v5980_v33 = vor.u32 %v5979_v21, %v5975_v25 }
 0x3a2   : > { %11175 = vmatprep.subr.bf16.mxu0 %v12352_v56 }
 0x3a3   : > { %11446 = vmatpush3.bf16.msra.mxu1 %v12351_v40  ;;  %v5972_v40 = vrot.slane %v5970_v30, 1 }
 0x3a4   : > { %11463 = vmatprep.subr.bf16.mxu1 %v12353_v10  ;;  %11160 = vmatmul.mubr.bf16.vlgmr.msra.gmra.mrb[32].mxu0 %v13644_v62  ;;  %v12357_v62 = vld [vmem:[%s14484_s5 + $0x90] sm:$0xff]  }
 0x3a5   : > { %11176 = vmatpush3.bf16.msra.mxu0 %v12352_v56  ;;  %11163 = vmatprep.mubr.bf16.mxu0 %v13641_v11  ;;  %v12358_v11 = vld [vmem:[%s14484_s5 + $0x98] sm:$0xff]   ;;  %v5925_v56 = vld [vmem:[#allocation3 + $0x58] sm:$0x1] }
 0x3a6   : > { %11448 = vmatmul.mubr.bf16.vlgmr.msra.gmra.mrb[32].mxu1 %v13660_v0  ;;  %11177 = vmatprep.subr.bf16.mxu0 %v12354_v49  ;;  %v12359_v0 = vld [vmem:[%s14484_s5 + $0x98] sm:$0xff]  }
 0x3a7   : > { %11464 = vmatpush3.bf16.msra.mxu1 %v12353_v10  ;;  %11451 = vmatprep.mubr.bf16.mxu1 %v13651_v3  ;;  %v12360_v3 = vld [vmem:[%s14484_s5 + $0xa0] sm:$0xff]   ;;  %v7928_v10 = vrot.slane %v7926_v46, 1 }
 0x3a8   : > { %11465 = vmatprep.subr.bf16.mxu1 %v12355_v31 }
 0x3a9   : > { %11178 = vmatpush3.bf16.msra.mxu0 %v12354_v49  ;;  %v7945_v49 = vshll.u32 %v14206_v47, 16  ;;  %v14234_v1 = vsel %vm2094_vm1, %v13856_v20, %v7928_v10  ;;  %v5987_v20 = vshrl.u32 %v14198_v34, 16  ;;  %v12374_v34 = vld [vmem:[%s14484_s5 + $0x158] sm:$0xff]   ;;  %v7899_v47 = vld [vmem:[#allocation3 + $0x160] sm:$0x1]  ;;  %v12376_v10 = vld [vmem:[%s14484_s5 + $0x160] sm:$0xff]  }
 0x3aa   : > { %11179 = vmatprep.subr.bf16.mxu0 %v12356_v17 }
 0x3ab   : > { %11466 = vmatpush3.bf16.msra.mxu1 %v12355_v31  ;;  %v5927_v31 = vld [vmem:[#allocation3 + $0x70] sm:$0x1]  ;;  %v5992_v37 = vor.u32 %v5991_v54, %v5987_v20  ;;  %v7901_v20 = vld [vmem:[#allocation3 + $0x178] sm:$0x1] }
 0x3ac   : > { %11467 = vmatprep.subr.bf16.mxu1 %v12357_v62  ;;  %11164 = vmatmul.mubr.bf16.gmra.mrb[36].mxu0 %v13693_v32  ;;  %v12361_v32 = vld [vmem:[%s14484_s5 + $0xa0] sm:$0xff]  }
 0x3ad   : > { %11180 = vmatpush3.bf16.msra.mxu0 %v12356_v17  ;;  %11167 = vmatprep.mubr.bf16.mxu0 %v13687_v2  ;;  %v12362_v2 = vld [vmem:[%s14484_s5 + $0xa8] sm:$0xff]  }
 0x3ae   : > { %11452 = vmatmul.mubr.bf16.gmra.mrb[36].mxu1 %v13710_v42  ;;  %11181 = vmatprep.subr.bf16.mxu0 %v12358_v11  ;;  %v7909_v42 = vshll.u32 %v7886_v22, 16  ;;  %v14221_v22 = vsel %vm2094_vm1, %v5956_v26, %v5960_v27  ;;  %v12375_v27 = vld [vmem:[%s14484_s5 + $0x158] sm:$0xff]  }
 0x3af   : > { %11468 = vmatpush3.bf16.msra.mxu1 %v12357_v62  ;;  %11455 = vmatprep.mubr.bf16.mxu1 %v13701_v50  ;;  %v7887_v50 = vld [vmem:[#allocation3 + $0xd0] sm:$0x1]  ;;  %v7940_v62 = vrot.slane %v7938_v63, 1  ;;  %v6006_v63 = vshll.u32 %v5929_v35, 16 }
 0x3b0   : > { %11469 = vmatprep.subr.bf16.mxu1 %v12359_v0  ;;  %v7911_v53 = vrot.slane %v7909_v42, 1  ;;  %v7914_v41 = vshll.u32 %v7887_v50, 16  ;;  %v14225_v42 = vsel %vm2094_vm1, %v5968_v8, %v5972_v40  ;;  %v5994_v50 = vshll.u32 %v5927_v31, 16 }
 0x3b1   : > { %11182 = vmatpush3.bf16.msra.mxu0 %v12358_v11  ;;  %v12370_v11 = vld [vmem:[%s14484_s5 + $0x148] sm:$0xff]  }
 0x3b2   : > { %11183 = vmatprep.subr.bf16.mxu0 %v12360_v3  ;;  %v14185_v45 = vor.u32 %v7911_v53, %v7907_v16  ;;  %v14248_v16 = vld [vmem:[#allocation3 + $0x140] sm:$0xff] }
 0x3b3   : > { %11470 = vmatpush3.bf16.msra.mxu1 %v12359_v0  ;;  %v7893_v0 = vld [vmem:[#allocation3 + $0x118] sm:$0x1]  ;;  %v7969_v30 = vshll.u32 %v14248_v16, 16 }
 0x3b4   : > { %11471 = vmatprep.subr.bf16.mxu1 %v12361_v32  ;;  %11168 = vmatmul.mubr.bf16.gmra.mrb[40].mxu0 %v13749_v18  ;;  %v14179_v18 = vor.u32 %v5943_v6, %v4758_v61  ;;  %v7916_v61 = vrot.slane %v7914_v41, 1  ;;  %v12371_v6 = vld [vmem:[%s14484_s5 + $0x148] sm:$0xff]   ;;  %v7950_v53 = vshll.u32 %v7893_v0, 16  ;;  %v6008_v0 = vrot.slane %v6006_v63, 1  ;;  %v12389_v63 = vld [vmem:[%s14484_s5 + $0x210] sm:$0xff]  }
 0x3b5   : > { %11184 = vmatpush3.bf16.msra.mxu0 %v12360_v3  ;;  %11171 = vmatprep.mubr.bf16.mxu0 %v13741_v5  ;;  %v7890_v5 = vld [vmem:[#allocation3 + $0xf8] sm:$0xff] }
 0x3b6   : > { %11456 = vmatmul.mubr.bf16.gmra.mrb[40].mxu1 %v13757_v4  ;;  %11185 = vmatprep.subr.bf16.mxu0 %v12362_v2  ;;  %v12365_v4 = vld [vmem:[%s14484_s5 + $0xb0] sm:$0xff]   ;;  %v5949_v13 = vsel %vm2094_vm1, %v14179_v18, %v5948_v55  ;;  %v7933_v59 = vshll.u32 %v7890_v5, 16  ;;  %v7917_v48 = vsel %vm2094_vm1, %v14185_v45, %v7916_v61  ;;  %v7931_v12 = vshrl.u32 %v7890_v5, 16  ;;  %v14238_v41 = vld [vmem:[#allocation3 + $0x98] sm:$0xff] }
 0x3b7   : > { %11472 = vmatpush3.bf16.msra.mxu1 %v12361_v32  ;;  %11459 = vmatprep.mubr.bf16.mxu1 %v13753_v38  ;;  %v12366_v38 = vld [vmem:[%s14484_s5 + $0xb8] sm:$0xff]   ;;  %v5982_v32 = vshll.u32 %v5925_v56, 16  ;;  %v6013_v36 = vshll.u32 %v14238_v41, 16  ;;  %v7952_v7 = vrot.slane %v7950_v53, 1 }
 0x3b8   : > { %11473 = vmatprep.subr.bf16.mxu1 %v12363_v29  ;;  %v7935_v44 = vrot.slane %v7933_v59, 1  ;;  %v5996_v59 = vrot.slane %v5994_v50, 1  ;;  %v5933_v50 = vld [vmem:[#allocation3 + $0xb8] sm:$0x1] }
 0x3b9   : > { %11186 = vmatpush3.bf16.msra.mxu0 %v12362_v2  ;;  %v7895_v2 = vld [vmem:[#allocation3 + $0x130] sm:$0x1]  ;;  %v5984_v28 = vrot.slane %v5982_v32, 1  ;;  %v6015_v9 = vrot.slane %v6013_v36, 1 }
 0x3ba   : > { %11187 = vmatprep.subr.bf16.mxu0 %v12364_v51  ;;  %v7936_v17 = vor.u32 %v7935_v44, %v7931_v12  ;;  %v14270_v26 = vsel %vm2094_vm1, %v5992_v37, %v5996_v59  ;;  %v7971_v12 = vrot.slane %v7969_v30, 1  ;;  %v12377_v32 = vld [vmem:[%s14484_s5 + $0x160] sm:$0xff]   ;;  %v12380_v59 = vld [vmem:[%s14484_s5 + $0x170] sm:$0xff]  }
 0x3bb   : > { %11474 = vmatpush3.bf16.msra.mxu1 %v12363_v29  ;;  %v14230_v29 = vld [vmem:[#allocation3 + $0x80] sm:$0xff]  ;;  %v14266_v57 = vsel %vm2094_vm1, %v5980_v33, %v5984_v28  ;;  %v12379_v28 = vld [vmem:[%s14484_s5 + $0x168] sm:$0xff]  }
 0x3bc   : > { %11475 = vmatprep.subr.bf16.mxu1 %v12365_v4  ;;  %11172 = vmatmul.mubr.bf16.gmra.mrb[44].mxu0 %v13806_v15  ;;  %v12368_v15 = vld [vmem:[%s14484_s5 + $0x140] sm:$0xff]   ;;  %v14242_v55 = vsel %vm2094_vm1, %v7936_v17, %v7940_v62  ;;  %v6001_v61 = vshll.u32 %v14230_v29, 16  ;;  %v5999_v40 = vshrl.u32 %v14230_v29, 16  ;;  %v7986_v17 = vshll.u32 %v7899_v47, 16  ;;  %v12390_v47 = vld [vmem:[%s14484_s5 + $0x218] sm:$0xff]  }
 0x3bd   : > { %11188 = vmatpush3.bf16.msra.mxu0 %v12364_v51  ;;  %11191 = vmatprep.mubr.bf16.mxu0 %v5949_v13  ;;  %v7947_v51 = vrot.slane %v7945_v49, 1  ;;  %v12373_v13 = vld [vmem:[%s14484_s5 + $0x150] sm:$0xff]   ;;  %v6011_v49 = vshrl.u32 %v14238_v41, 16  ;;  %v7900_v62 = vld [vmem:[#allocation3 + $0x170] sm:$0xff] }
 0x3be   : > { %11460 = vmatmul.mubr.bf16.gmra.mrb[44].mxu1 %v13725_v43  ;;  %11189 = vmatprep.subr.bf16.mxu0 %v12366_v38  ;;  %v14209_v43 = vld [vmem:[#allocation3 + $0x128] sm:$0xff]  ;;  %v6003_v44 = vrot.slane %v6001_v61, 1  ;;  %v7988_v41 = vrot.slane %v7986_v17, 1  ;;  %v7991_v36 = vshrl.u32 %v7900_v62, 16 }
 0x3bf   : > { %11476 = vmatpush3.bf16.msra.mxu1 %v12365_v4  ;;  %11479 = vmatprep.mubr.bf16.mxu1 %v7917_v48  ;;  %v7957_v3 = vshll.u32 %v14209_v43, 16  ;;  %v7962_v4 = vshll.u32 %v7895_v2, 16  ;;  %v7955_v60 = vshrl.u32 %v14209_v43, 16  ;;  %v7897_v48 = vld [vmem:[#allocation3 + $0x148] sm:$0x1]  ;;  %v6018_v43 = vshll.u32 %v5931_v39, 16 }
 0x3c0   : > { %11477 = vmatprep.subr.bf16.mxu1 %v12367_v58  ;;  %v7974_v56 = vshll.u32 %v7897_v48, 16  ;;  %v6016_v2 = vor.u32 %v6015_v9, %v6011_v49  ;;  %v12382_v39 = vld [vmem:[%s14484_s5 + $0x178] sm:$0xff]   ;;  %v12384_v48 = vld [vmem:[%s14484_s5 + $0x200] sm:$0xff]  }
 0x3c1   : > { %11190 = vmatpush3.bf16.msra.mxu0 %v12366_v38  ;;  %v7959_v5 = vrot.slane %v7957_v3, 1  ;;  %v14253_v38 = vld [vmem:[#allocation3 + $0x158] sm:$0xff]  ;;  %v7964_v46 = vrot.slane %v7962_v4, 1  ;;  %v7967_v3 = vshrl.u32 %v14248_v16, 16  ;;  %v6030_v16 = vshll.u32 %v5933_v50, 16  ;;  %v12392_v9 = vld [vmem:[%s14484_s5 + $0x220] sm:$0xff]  }
 0x3c2   : > { %11207 = vmatprep.subr.bf16.mxu0 %v12368_v15  ;;  %v7979_v54 = vshrl.u32 %v14253_v38, 16  ;;  %v7976_v25 = vrot.slane %v7974_v56, 1  ;;  %v12394_v56 = vld [vmem:[%s14484_s5 + $0x228] sm:$0xff]   ;;  %v12399_v50 = vld [vmem:[%s14484_s5 + $0x238] sm:$0xff]  }
 0x3c3   : > { %11478 = vmatpush3.bf16.msra.mxu1 %v12367_v58  ;;  %v7948_v58 = vor.u32 %v7947_v51, %v7943_v19  ;;  %v7960_v52 = vor.u32 %v7959_v5, %v7955_v60  ;;  %v7972_v29 = vor.u32 %v7971_v12, %v7967_v3  ;;  %v7993_v51 = vshll.u32 %v7900_v62, 16 }
 0x3c4   : > { %11495 = vmatprep.subr.bf16.mxu1 %v12369_v23  ;;  %11192 = vmatmul.mubr.bf16.vlgmr.msra.gmra.mrb[32].mxu0 %v14221_v22  ;;  %v6032_v35 = vrot.slane %v6030_v16, 1 }
 0x3c5   : > { %11208 = vmatpush3.bf16.msra.mxu0 %v12368_v15  ;;  %11195 = vmatprep.mubr.bf16.mxu0 %v14225_v42  ;;  %v7981_v15 = vshll.u32 %v14253_v38, 16  ;;  %v14276_v8 = vsel %vm2094_vm1, %v7948_v58, %v7952_v7  ;;  %v14282_v24 = vsel %vm2094_vm1, %v7960_v52, %v7964_v46  ;;  %v14308_v19 = vsel %vm2094_vm1, %v7972_v29, %v7976_v25  ;;  %v12381_v58 = vld [vmem:[%s14484_s5 + $0x170] sm:$0xff]   ;;  %v12383_v46 = vld [vmem:[%s14484_s5 + $0x178] sm:$0xff]  }
 0x3c6   : > { %11480 = vmatmul.mubr.bf16.vlgmr.msra.gmra.mrb[32].mxu1 %v14234_v1  ;;  %11209 = vmatprep.subr.bf16.mxu0 %v12370_v11  ;;  %v7995_v38 = vrot.slane %v7993_v51, 1  ;;  %v7905_v25 = vld [vmem:[#allocation3 + $0x1a8] sm:$0x1] }
 0x3c7   : > { %11496 = vmatpush3.bf16.msra.mxu1 %v12369_v23  ;;  %11483 = vmatprep.mubr.bf16.mxu1 %v14242_v55  ;;  %v5932_v23 = vld [vmem:[#allocation3 + $0xb0] sm:$0xff]  ;;  %v7983_v31 = vrot.slane %v7981_v15, 1 }
 0x3c8   : > { %11497 = vmatprep.subr.bf16.mxu1 %v12371_v6  ;;  %v6025_v21 = vshll.u32 %v5932_v23, 16  ;;  %v6023_v61 = vshrl.u32 %v5932_v23, 16  ;;  %v7996_v7 = vor.u32 %v7995_v38, %v7991_v36  ;;  %v12385_v15 = vld [vmem:[%s14484_s5 + $0x200] sm:$0xff]  }
 0x3c9   : > { %11210 = vmatpush3.bf16.msra.mxu0 %v12370_v11  ;;  %v6004_v11 = vor.u32 %v6003_v44, %v5999_v40  ;;  %v7984_v53 = vor.u32 %v7983_v31, %v7979_v54  ;;  %v12387_v44 = vld [vmem:[%s14484_s5 + $0x208] sm:$0xff]   ;;  %v12393_v23 = vld [vmem:[%s14484_s5 + $0x220] sm:$0xff]  }
 0x3ca   : > { %11211 = vmatprep.subr.bf16.mxu0 %v12372_v14  ;;  %v6027_v4 = vrot.slane %v6025_v21, 1  ;;  %v5935_v40 = vld [vmem:[#allocation3 + $0xd0] sm:$0x1]  ;;  %v12395_v31 = vld [vmem:[%s14484_s5 + $0x228] sm:$0xff]   ;;  %v12397_v21 = vld [vmem:[%s14484_s5 + $0x230] sm:$0xff]  }
 0x3cb   : > { %11498 = vmatpush3.bf16.msra.mxu1 %v12371_v6  ;;  %v6020_v6 = vrot.slane %v6018_v43, 1  ;;  %v14298_v5 = vsel %vm2094_vm1, %v6004_v11, %v6008_v0  ;;  %v14313_v37 = vsel %vm2094_vm1, %v7984_v53, %v7988_v41  ;;  %v7902_v43 = vld [vmem:[#allocation3 + $0x188] sm:$0xff]  ;;  %v6228_v49 = vshll.u32 %v5935_v40, 16  ;;  %v12396_v11 = vld [vmem:[%s14484_s5 + $0x230] sm:$0xff]  }
 0x3cc   : > { %11499 = vmatprep.subr.bf16.mxu1 %v12373_v13  ;;  %11196 = vmatmul.mubr.bf16.gmra.mrb[36].mxu0 %v14266_v57  ;;  %v6028_v60 = vor.u32 %v6027_v4, %v6023_v61  ;;  %v8190_v12 = vshll.u32 %v7902_v43, 16  ;;  %v8188_v3 = vshrl.u32 %v7902_v43, 16  ;;  %v8385_v53 = vshll.u32 %v7905_v25, 16  ;;  %v14419_v4 = vld [vmem:[%s14485_s6] ss:$0 sm:$0xff] }
 0x3cd   : > { %11212 = vmatpush3.bf16.msra.mxu0 %v12372_v14  ;;  %11199 = vmatprep.mubr.bf16.mxu0 %v14270_v26  ;;  %v12378_v14 = vld [vmem:[%s14484_s5 + $0x168] sm:$0xff]   ;;  %v14302_v33 = vsel %vm2094_vm1, %v6016_v2, %v6020_v6  ;;  %v6230_v0 = vrot.slane %v6228_v49, 1  ;;  %v12398_v6 = vld [vmem:[%s14484_s5 + $0x238] sm:$0xff]  }
 0x3ce   : > { %11484 = vmatmul.mubr.bf16.gmra.mrb[36].mxu1 %v14276_v8  ;;  %11213 = vmatprep.subr.bf16.mxu0 %v12374_v34  ;;  %v14326_v52 = vsel %vm2094_vm1, %v6028_v60, %v6032_v35  ;;  %v8192_v17 = vrot.slane %v8190_v12, 1  ;;  %v8387_v41 = vrot.slane %v8385_v53, 1 }
 0x3cf   : > { %11500 = vmatpush3.bf16.msra.mxu1 %v12373_v13  ;;  %11487 = vmatprep.mubr.bf16.mxu1 %v14282_v24  ;;  %v7998_v13 = vshll.u32 %v7901_v20, 16  ;;  %v6231_v54 = vsel %vm2094_vm1, %v14185_v45, %v6230_v0  ;;  %v5936_v45 = vld [vmem:[#allocation3 + $0xe0] sm:$0xff] }
 0x3d0   : > { %11501 = vmatprep.subr.bf16.mxu1 %v12375_v27  ;;  %v8388_v20 = vsel %vm2094_vm1, %v14179_v18, %v8387_v41 }
 0x3d1   : > { %11214 = vmatpush3.bf16.msra.mxu0 %v12374_v34  ;;  %v8000_v30 = vrot.slane %v7998_v13, 1 }
 0x3d2   : > { %11215 = vmatprep.subr.bf16.mxu0 %v12376_v10 }
 0x3d3   : > { %11502 = vmatpush3.bf16.msra.mxu1 %v12375_v27  ;;  %v14333_v34 = vsel %vm2094_vm1, %v7996_v7, %v8000_v30  ;;  %v12391_v27 = vld [vmem:[%s14484_s5 + $0x218] sm:$0xff]  }
 0x3d4   : > { %11503 = vmatprep.subr.bf16.mxu1 %v12377_v32  ;;  %11200 = vmatmul.mubr.bf16.gmra.mrb[40].mxu0 %v14298_v5 }
 0x3d5   : > { %11216 = vmatpush3.bf16.msra.mxu0 %v12376_v10  ;;  %11203 = vmatprep.mubr.bf16.mxu0 %v14302_v33  ;;  %v7903_v10 = vld [vmem:[#allocation3 + $0x190] sm:$0x1] }
 0x3d6   : > { %11488 = vmatmul.mubr.bf16.gmra.mrb[40].mxu1 %v14308_v19  ;;  %11217 = vmatprep.subr.bf16.mxu0 %v12378_v14  ;;  %v8195_v62 = vshll.u32 %v7903_v10, 16 }
 0x3d7   : > { %11504 = vmatpush3.bf16.msra.mxu1 %v12377_v32  ;;  %11491 = vmatprep.mubr.bf16.mxu1 %v14313_v37  ;;  %v8193_v32 = vor.u32 %v8192_v17, %v8188_v3 }
 0x3d8   : > { %11505 = vmatprep.subr.bf16.mxu1 %v12379_v28  ;;  %v8197_v2 = vrot.slane %v8195_v62, 1 }
 0x3d9   : > { %11218 = vmatpush3.bf16.msra.mxu0 %v12378_v14 }
 0x3da   : > { %11219 = vmatprep.subr.bf16.mxu0 %v12380_v59  ;;  %v8198_v29 = vsel %vm2094_vm1, %v8193_v32, %v8197_v2 }
 0x3db   : > { %11506 = vmatpush3.bf16.msra.mxu1 %v12379_v28 }
 0x3dc   : > { %11507 = vmatprep.subr.bf16.mxu1 %v12381_v58  ;;  %11204 = vmatmul.mubr.bf16.gmra.mrb[44].mxu0 %v14326_v52 }
 0x3dd   : > { %11220 = vmatpush3.bf16.msra.mxu0 %v12380_v59  ;;  %11223 = vmatprep.mubr.bf16.mxu0 %v14221_v22  ;;  %v12386_v22 = vld [vmem:[%s14484_s5 + $0x208] sm:$0xff]  }
 0x3de   : > { %11492 = vmatmul.mubr.bf16.gmra.mrb[44].mxu1 %v14333_v34  ;;  %11221 = vmatprep.subr.bf16.mxu0 %v12382_v39 }
 0x3df   : > { %11508 = vmatpush3.bf16.msra.mxu1 %v12381_v58  ;;  %11511 = vmatprep.mubr.bf16.mxu1 %v14234_v1  ;;  %v12388_v1 = vld [vmem:[%s14484_s5 + $0x210] sm:$0xff]  }
 0x3e0   : > { %11509 = vmatprep.subr.bf16.mxu1 %v12383_v46 }
 0x3e1   : > { %11222 = vmatpush3.bf16.msra.mxu0 %v12382_v39 }
 0x3e2   : > { %11239 = vmatprep.subr.bf16.mxu0 %v12384_v48 }
 0x3e3   : > { %11510 = vmatpush3.bf16.msra.mxu1 %v12383_v46 }
 0x3e4   : > { %11527 = vmatprep.subr.bf16.mxu1 %v12385_v15  ;;  %11224 = vmatmul.mubr.bf16.vlgmr.msra.gmra.mrb[32].mxu0 %v14225_v42 }
 0x3e5   : > { %11240 = vmatpush3.bf16.msra.mxu0 %v12384_v48  ;;  %11227 = vmatprep.mubr.bf16.mxu0 %v14266_v57 }
 0x3e6   : > { %11512 = vmatmul.mubr.bf16.vlgmr.msra.gmra.mrb[32].mxu1 %v14242_v55  ;;  %11241 = vmatprep.subr.bf16.mxu0 %v12386_v22 }
 0x3e7   : > { %11528 = vmatpush3.bf16.msra.mxu1 %v12385_v15  ;;  %11515 = vmatprep.mubr.bf16.mxu1 %v14276_v8 }
 0x3e8   : > { %11529 = vmatprep.subr.bf16.mxu1 %v12387_v44 }
 0x3e9   : > { %11242 = vmatpush3.bf16.msra.mxu0 %v12386_v22 }
 0x3ea   : > { %11243 = vmatprep.subr.bf16.mxu0 %v12388_v1 }
 0x3eb   : > { %11530 = vmatpush3.bf16.msra.mxu1 %v12387_v44 }
 0x3ec   : > { %11531 = vmatprep.subr.bf16.mxu1 %v12389_v63  ;;  %11228 = vmatmul.mubr.bf16.gmra.mrb[36].mxu0 %v14270_v26 }
 0x3ed   : > { %11244 = vmatpush3.bf16.msra.mxu0 %v12388_v1  ;;  %11231 = vmatprep.mubr.bf16.mxu0 %v14298_v5 }
 0x3ee   : > { %11516 = vmatmul.mubr.bf16.gmra.mrb[36].mxu1 %v14282_v24  ;;  %11245 = vmatprep.subr.bf16.mxu0 %v12390_v47 }
 0x3ef   : > { %11532 = vmatpush3.bf16.msra.mxu1 %v12389_v63  ;;  %11519 = vmatprep.mubr.bf16.mxu1 %v14308_v19 }
 0x3f0   : > { %11533 = vmatprep.subr.bf16.mxu1 %v12391_v27 }
 0x3f1   : > { %11246 = vmatpush3.bf16.msra.mxu0 %v12390_v47 }
 0x3f2   : > { %11247 = vmatprep.subr.bf16.mxu0 %v12392_v9 }
 0x3f3   : > { %11534 = vmatpush3.bf16.msra.mxu1 %v12391_v27 }
 0x3f4   : > { %11535 = vmatprep.subr.bf16.mxu1 %v12393_v23  ;;  %11232 = vmatmul.mubr.bf16.gmra.mrb[40].mxu0 %v14302_v33 }
 0x3f5   : > { %11248 = vmatpush3.bf16.msra.mxu0 %v12392_v9  ;;  %11235 = vmatprep.mubr.bf16.mxu0 %v14326_v52 }
 0x3f6   : > { %11520 = vmatmul.mubr.bf16.gmra.mrb[40].mxu1 %v14313_v37  ;;  %11249 = vmatprep.subr.bf16.mxu0 %v12394_v56 }
 0x3f7   : > { %11536 = vmatpush3.bf16.msra.mxu1 %v12393_v23  ;;  %11523 = vmatprep.mubr.bf16.mxu1 %v14333_v34 }
 0x3f8   : > { %11537 = vmatprep.subr.bf16.mxu1 %v12395_v31 }
 0x3f9   : > { %11250 = vmatpush3.bf16.msra.mxu0 %v12394_v56 }
 0x3fa   : > { %11251 = vmatprep.subr.bf16.mxu0 %v12396_v11 }
 0x3fb   : > { %11538 = vmatpush3.bf16.msra.mxu1 %v12395_v31 }
 0x3fc   : > { %11539 = vmatprep.subr.bf16.mxu1 %v12397_v21  ;;  %11236 = vmatmul.mubr.bf16.gmra.mrb[44].mxu0 %v6231_v54 }
 0x3fd   : > { %11252 = vmatpush3.bf16.msra.mxu0 %v12396_v11  ;;  %11255 = vmatprep.mubr.bf16.mxu0 %v14225_v42  ;;  %v6414_v42 = vshll.u32 %v5936_v45, 16 }
 0x3fe   : > { %11524 = vmatmul.mubr.bf16.gmra.mrb[44].mxu1 %v8198_v29  ;;  %11253 = vmatprep.subr.bf16.mxu0 %v12398_v6 }
 0x3ff   : > { %11540 = vmatpush3.bf16.msra.mxu1 %v12397_v21  ;;  %11543 = vmatprep.mubr.bf16.mxu1 %v14242_v55  ;;  %v5937_v55 = vld [vmem:[#allocation3 + $0xe8] sm:$0x1]  ;;  %v6416_v51 = vrot.slane %v6414_v42, 1 }
 0x400   : > { %11541 = vmatprep.subr.bf16.mxu1 %v12399_v50 }
 0x401   : > { %11254 = vmatpush3.bf16.msra.mxu0 %v12398_v6 }
 0x403   : > { %11542 = vmatpush3.bf16.msra.mxu1 %v12399_v50 }
 0x404   : > { %11256 = vmatmul.mubr.bf16.vlgmr.msra.gmra.mrb[32].mxu0 %v14266_v57  ;;  %v6419_v57 = vshll.u32 %v5937_v55, 16 }
 0x405   : > { %11259 = vmatprep.mubr.bf16.mxu0 %v14270_v26  ;;  %v6412_v26 = vshrl.u32 %v5936_v45, 16 }
 0x406   : > { %11544 = vmatmul.mubr.bf16.vlgmr.msra.gmra.mrb[32].mxu1 %v14276_v8 }
 0x407   : > { %11547 = vmatprep.mubr.bf16.mxu1 %v14282_v24  ;;  %v6417_v8 = vor.u32 %v6416_v51, %v6412_v26  ;;  %v6421_v24 = vrot.slane %v6419_v57, 1 }
 0x409   : > { %v6422_v14 = vsel %vm2094_vm1, %v6417_v8, %v6421_v24 }
 0x40c   : > { %11260 = vmatmul.mubr.bf16.gmra.mrb[36].mxu0 %v14298_v5 }
 0x40d   : > { %11263 = vmatprep.mubr.bf16.mxu0 %v14302_v33 }
 0x40e   : > { %11548 = vmatmul.mubr.bf16.gmra.mrb[36].mxu1 %v14308_v19 }
 0x40f   : > { %11551 = vmatprep.mubr.bf16.mxu1 %v14313_v37 }
 0x414   : > { %11264 = vmatmul.mubr.bf16.gmra.mrb[40].mxu0 %v14326_v52 }
 0x415   : > { %11267 = vmatprep.mubr.bf16.mxu0 %v6231_v54 }
 0x416   : > { %11552 = vmatmul.mubr.bf16.gmra.mrb[40].mxu1 %v14333_v34 }
 0x417   : > { %11555 = vmatprep.mubr.bf16.mxu1 %v8198_v29 }
 0x41c   : > { %11268 = vmatmul.mubr.bf16.gmra.mrb[44].mxu0 %v6422_v14 }
 0x41e   : > { %11556 = vmatmul.mubr.bf16.gmra.mrb[44].mxu1 %v8388_v20 }
 0x4d7   : > { %v11257_v5 = vpop.f32.mrb[32].mxu0 }
 0x4d8   : > { %v6523_v16 = vpop.f32.mrb[33].mxu0  ;;  %v6611_v19 = vadd.f32 %v11257_v5, %v14419_v4 }
 0x4d9   : > { %v11545_v33 = vpop.f32.mrb[32].mxu1  ;;  %v11258_v28 = vpop.f32.mrb[34].mxu0  ;;  %v6609_v37 = vadd.f32 %v14419_v4, %v6523_v16 }
 0x4da   : > { %v8488_v61 = vpop.f32.mrb[33].mxu1  ;;  %v6612_v38 = vadd.f32 %v11258_v28, %v14419_v4  ;;  %v6526_v13 = vpop.f32.mrb[35].mxu0  ;;  %v8576_v60 = vadd.f32 %v11545_v33, %v14419_v4 }
 0x4db   : > { %v11546_v18 = vpop.f32.mrb[34].mxu1  ;;  %v6610_v59 = vadd.f32 %v14419_v4, %v6526_v13  ;;  %v8574_v7 = vadd.f32 %v14419_v4, %v8488_v61 }
 0x4dc   : > { %v9648_v35 = vpack.c.bf16 %v6612_v38, %v6611_v19  ;;  %v8577_v36 = vadd.f32 %v11546_v18, %v14419_v4  ;;  %v8491_v58 = vpop.f32.mrb[35].mxu1 }
 0x4dd   : > { %v9643_v30 = vpack.c.bf16 %v6610_v59, %v6609_v37  ;;  %v8575_v39 = vadd.f32 %v14419_v4, %v8491_v58 }
 0x4de   : > { %9720 = vst [vmem:[%s14429_s23 + $0x8] sm:$0xff] %v9648_v35   ;;  %v9688_v52 = vpack.c.bf16 %v8577_v36, %v8576_v60 }
 0x4df   : > { %9644 = vst [vmem:[%s14429_s23] sm:$0xff] %v9643_v30   ;;  %v9683_v46 = vpack.c.bf16 %v8575_v39, %v8574_v7  ;;  %v11261_v34 = vpop.f32.mrb[36].mxu0 }
 0x4e0   : > { %9728 = vst [vmem:[%s14429_s23 + $0x48] sm:$0xff] %v9688_v52   ;;  %v6539_v48 = vpop.f32.mrb[37].mxu0  ;;  %v6615_v44 = vadd.f32 %v11261_v34, %v14419_v4 }
 0x4e1   : > { %9727 = vst [vmem:[%s14429_s23 + $0x40] sm:$0xff] %v9683_v46   ;;  %v11549_v15 = vpop.f32.mrb[36].mxu1  ;;  %v11262_v22 = vpop.f32.mrb[38].mxu0  ;;  %v6613_v27 = vadd.f32 %v14419_v4, %v6539_v48 }
 0x4e2   : > { %v8504_v1 = vpop.f32.mrb[37].mxu1  ;;  %v6616_v63 = vadd.f32 %v11262_v22, %v14419_v4  ;;  %v6542_v47 = vpop.f32.mrb[39].mxu0  ;;  %v8580_v23 = vadd.f32 %v11549_v15, %v14419_v4 }
 0x4e3   : > { %v11550_v9 = vpop.f32.mrb[38].mxu1  ;;  %v6614_v43 = vadd.f32 %v14419_v4, %v6542_v47  ;;  %v8578_v10 = vadd.f32 %v14419_v4, %v8504_v1 }
 0x4e4   : > { %v9658_v40 = vpack.c.bf16 %v6616_v63, %v6615_v44  ;;  %v8581_v12 = vadd.f32 %v11550_v9, %v14419_v4  ;;  %v8507_v56 = vpop.f32.mrb[39].mxu1 }
 0x4e5   : > { %v9653_v49 = vpack.c.bf16 %v6614_v43, %v6613_v27  ;;  %v8579_v31 = vadd.f32 %v14419_v4, %v8507_v56 }
 0x4e6   : > { %9722 = vst [vmem:[%s14429_s23 + $0x18] sm:$0xff] %v9658_v40   ;;  %v9698_v17 = vpack.c.bf16 %v8581_v12, %v8580_v23 }
 0x4e7   : > { %9721 = vst [vmem:[%s14429_s23 + $0x10] sm:$0xff] %v9653_v49   ;;  %v9693_v62 = vpack.c.bf16 %v8579_v31, %v8578_v10  ;;  %v11265_v11 = vpop.f32.mrb[40].mxu0 }
 0x4e8   : > { %9730 = vst [vmem:[%s14429_s23 + $0x58] sm:$0xff] %v9698_v17   ;;  %v6555_v0 = vpop.f32.mrb[41].mxu0  ;;  %v6619_v32 = vadd.f32 %v11265_v11, %v14419_v4 }
 0x4e9   : > { %9729 = vst [vmem:[%s14429_s23 + $0x50] sm:$0xff] %v9693_v62   ;;  %v11553_v3 = vpop.f32.mrb[40].mxu1  ;;  %v11266_v21 = vpop.f32.mrb[42].mxu0  ;;  %v6617_v50 = vadd.f32 %v14419_v4, %v6555_v0 }
 0x4ea   : > { %v8520_v2 = vpop.f32.mrb[41].mxu1  ;;  %v6620_v6 = vadd.f32 %v11266_v21, %v14419_v4  ;;  %v6558_v54 = vpop.f32.mrb[43].mxu0  ;;  %v8584_v42 = vadd.f32 %v11553_v3, %v14419_v4 }
 0x4eb   : > { %v11554_v29 = vpop.f32.mrb[42].mxu1  ;;  %v6618_v45 = vadd.f32 %v14419_v4, %v6558_v54  ;;  %v8582_v57 = vadd.f32 %v14419_v4, %v8520_v2 }
 0x4ec   : > { %v9668_v55 = vpack.c.bf16 %v6620_v6, %v6619_v32  ;;  %v8585_v25 = vadd.f32 %v11554_v29, %v14419_v4  ;;  %v8523_v51 = vpop.f32.mrb[43].mxu1 }
 0x4ed   : > { %v9663_v53 = vpack.c.bf16 %v6618_v45, %v6617_v50  ;;  %v8583_v26 = vadd.f32 %v14419_v4, %v8523_v51 }
 0x4ee   : > { %9724 = vst [vmem:[%s14429_s23 + $0x28] sm:$0xff] %v9668_v55   ;;  %v9708_v8 = vpack.c.bf16 %v8585_v25, %v8584_v42 }
 0x4ef   : > { %9723 = vst [vmem:[%s14429_s23 + $0x20] sm:$0xff] %v9663_v53   ;;  %v9703_v24 = vpack.c.bf16 %v8583_v26, %v8582_v57  ;;  %v11269_v41 = vpop.f32.mrb[44].mxu0 }
 0x4f0   : > { %9732 = vst [vmem:[%s14429_s23 + $0x68] sm:$0xff] %v9708_v8   ;;  %v6571_v14 = vpop.f32.mrb[45].mxu0  ;;  %v6623_v16 = vadd.f32 %v11269_v41, %v14419_v4 }
 0x4f1   : > { %9731 = vst [vmem:[%s14429_s23 + $0x60] sm:$0xff] %v9703_v24   ;;  %v11557_v20 = vpop.f32.mrb[44].mxu1  ;;  %v11270_v5 = vpop.f32.mrb[46].mxu0  ;;  %v6621_v61 = vadd.f32 %v14419_v4, %v6571_v14 }
 0x4f2   : > { %v8536_v33 = vpop.f32.mrb[45].mxu1  ;;  %v6624_v28 = vadd.f32 %v11270_v5, %v14419_v4  ;;  %v6574_v19 = vpop.f32.mrb[47].mxu0  ;;  %v8588_v37 = vadd.f32 %v11557_v20, %v14419_v4 }
 0x4f3   : > { %v11558_v38 = vpop.f32.mrb[46].mxu1  ;;  %v6622_v13 = vadd.f32 %v14419_v4, %v6574_v19  ;;  %v8586_v35 = vadd.f32 %v14419_v4, %v8536_v33 }
 0x4f4   : > { %v9678_v18 = vpack.c.bf16 %v6624_v28, %v6623_v16  ;;  %v8589_v59 = vadd.f32 %v11558_v38, %v14419_v4  ;;  %v8539_v60 = vpop.f32.mrb[47].mxu1 }
 0x4f5   : > { %v9673_v36 = vpack.c.bf16 %v6622_v13, %v6621_v61  ;;  %v8587_v58 = vadd.f32 %v14419_v4, %v8539_v60 }
 0x4f6   : > { %9726 = vst [vmem:[%s14429_s23 + $0x38] sm:$0xff] %v9678_v18   ;;  %v9718_v7 = vpack.c.bf16 %v8589_v59, %v8588_v37 }
 0x4f7   : > { %9725 = vst [vmem:[%s14429_s23 + $0x30] sm:$0xff] %v9673_v36   ;;  %v9713_v30 = vpack.c.bf16 %v8587_v58, %v8586_v35 }
 0x4f8   : > { %9734 = vst [vmem:[%s14429_s23 + $0x78] sm:$0xff] %v9718_v7  }
 0x4f9   : > { %9733 = vst [vmem:[%s14429_s23 + $0x70] sm:$0xff] %v9713_v30  }
 0x4fa PF: > { %s17_s24 = sadd.s32 1, %s12420_s24  }
 0x4fb   : > { %p14_p4 = scmp.ge.s32.totalorder %s17_s24, 4  }
 0x4fd   :  { %16 = sbr.rel (!%p14_p4) target bundleno = 1 (0x1), region = 102 }

</bundles_post_ra>
